<compile_context>
chip_gen: v5e
topology: v5e:2x2
jax: 0.10.0
libtpu: 0.0.40
codegen_flags: <defaults>
</compile_context>

<pallas_src>
import jax
import jax.numpy as jnp
import numpy as np
from jax.experimental import pallas as pl
from jax.experimental.pallas import tpu as pltpu

F32 = jnp.float32


# ----------------------------------------------------------------------------
# In-kernel helpers (pure values; all selection matrices are exact 0/1)
# ----------------------------------------------------------------------------
def _iota2(shape):
    r = jax.lax.broadcasted_iota(jnp.int32, shape, 0)
    c = jax.lax.broadcasted_iota(jnp.int32, shape, 1)
    return r, c


def _shift_mat(L, offset):
    """(L, L) 0/1 matrix: (M @ v)[i] = v[i + offset], zero out of range."""
    r, c = _iota2((L, L))
    return jnp.where(c == r + offset, 1.0, 0.0).astype(F32)


def _pool_mat(L, parity):
    """(L//2, L) 0/1 matrix: (M @ v)[i] = v[2*i + parity]."""
    r, c = _iota2((L // 2, L))
    return jnp.where(c == 2 * r + parity, 1.0, 0.0).astype(F32)


def _expand_mat(L, parity):
    """(2L, L) 0/1 matrix: (M @ v)[2*l + parity] = v[l], other rows zero."""
    r, c = _iota2((2 * L, L))
    return jnp.where(r == 2 * c + parity, 1.0, 0.0).astype(F32)


def _dot(a, b):
    return jnp.dot(a, b, preferred_element_type=F32)


def _conv3(v, w_ref, b_ref, relu):
    """Conv1d(k=3, s=1, pad=1) on a (L, Cin) value; padding via shift matmuls."""
    L = v.shape[0]
    vm = _dot(_shift_mat(L, -1), v)          # row i = v[i-1]  (zero at i=0)
    vp = _dot(_shift_mat(L, +1), v)          # row i = v[i+1]  (zero at i=L-1)
    acc = (_dot(vm, w_ref[0]) + _dot(v, w_ref[1]) + _dot(vp, w_ref[2])
           + b_ref[...])
    return jnp.maximum(acc, 0.0) if relu else acc


def _conv3_cat(vd, ve, wd_ref, we_ref, b_ref):
    """Conv1d(k=3) over channel-concat [vd | ve] with the weight pre-split."""
    L = vd.shape[0]
    sm = _shift_mat(L, -1)
    sp = _shift_mat(L, +1)
    acc = (_dot(_dot(sm, vd), wd_ref[0]) + _dot(vd, wd_ref[1])
           + _dot(_dot(sp, vd), wd_ref[2])
           + _dot(_dot(sm, ve), we_ref[0]) + _dot(ve, we_ref[1])
           + _dot(_dot(sp, ve), we_ref[2])
           + b_ref[...])
    return jnp.maximum(acc, 0.0)


def _relu_pool(v):
    """MaxPool1d(2,2) of relu(v); pair compaction via exact selection matmuls."""
    L = v.shape[0]
    r = jnp.maximum(v, 0.0)
    return jnp.maximum(_dot(_pool_mat(L, 0), r), _dot(_pool_mat(L, 1), r))


def _upconv(v, wu_ref, bu_ref):
    """ConvTranspose1d(k=2, s=2): y[2l+k] = v[l] @ W[k] + bias, interleaved."""
    L = v.shape[0]
    bias = bu_ref[...]
    y0 = _dot(v, wu_ref[0]) + bias
    y1 = _dot(v, wu_ref[1]) + bias
    return _dot(_expand_mat(L, 0), y0) + _dot(_expand_mat(L, 1), y1)


# ----------------------------------------------------------------------------
# Fused UNet kernel (one batch element per grid step; everything in VMEM)
# ----------------------------------------------------------------------------
def _unet_kernel(x_ref, we_ref, be_ref, wb_ref, bb_ref, wu_ref, bu_ref,
                 wd1d_ref, wd1e_ref, bd1_ref,
                 wd2d_ref, wd2e_ref, bd2_ref,
                 wd3d_ref, wd3e_ref, bd3_ref,
                 y_ref):
    x = x_ref[...].astype(F32)                       # (N, 32)

    # Encoder (PyTorch forward reuses e_conv1 three times)
    e1 = _conv3(x, we_ref, be_ref, relu=False)       # (N,   32)
    p1 = _relu_pool(e1)                              # (N/2, 32)
    e2 = _conv3(p1, we_ref, be_ref, relu=False)      # (N/2, 32)
    p2 = _relu_pool(e2)                              # (N/4, 32)
    e3 = _conv3(p2, we_ref, be_ref, relu=False)      # (N/4, 32)
    p3 = _relu_pool(e3)                              # (N/8, 32)

    # Bottleneck
    b = _conv3(p3, wb_ref, bb_ref, relu=True)        # (N/8, 32)

    # Decoder (PyTorch forward reuses d_upconv1 three times); skip concat is
    # fused via the pre-split decoder weights.
    u1 = _upconv(b, wu_ref, bu_ref)                  # (N/4, 32)
    d1 = _conv3_cat(u1, e3, wd1d_ref, wd1e_ref, bd1_ref)
    u2 = _upconv(d1, wu_ref, bu_ref)                 # (N/2, 32)
    d2 = _conv3_cat(u2, e2, wd2d_ref, wd2e_ref, bd2_ref)
    u3 = _upconv(d2, wu_ref, bu_ref)                 # (N,   32)
    d3 = _conv3_cat(u3, e1, wd3d_ref, wd3e_ref, bd3_ref)

    y_ref[...] = d3.astype(y_ref.dtype)
    # TODO(synk): the PyTorch forward's debug print() calls are intentionally omitted.


def unet_forward(x, params):
    we, be = params["e_conv1"]
    wb, bb = params["b_conv"]
    wu, bu = params["d_upconv1"]
    wd1, bd1 = params["d_conv1"]
    wd2, bd2 = params["d_conv2"]
    wd3, bd3 = params["d_conv3"]

    B, N, C = x.shape
    assert N % 8 == 0, "depth-3 U-Net needs N divisible by 8"

    # Split decoder conv weights host-side so the skip concat fuses in-kernel:
    # channels [0:C] multiply the upconv path, [C:2C] the skip connection.
    wd1d, wd1e = wd1[:, :C, :], wd1[:, C:, :]
    wd2d, wd2e = wd2[:, :C, :], wd2[:, C:, :]
    wd3d, wd3e = wd3[:, :C, :], wd3[:, C:, :]

    w_spec3 = pl.BlockSpec((3, C, C), lambda i: (0, 0, 0))
    w_spec2 = pl.BlockSpec((2, C, C), lambda i: (0, 0, 0))
    b_spec = pl.BlockSpec((1, C), lambda i: (0, 0))

    return pl.pallas_call(
        _unet_kernel,
        out_shape=jax.ShapeDtypeStruct((B, N, C), x.dtype),
        grid=(B,),
        in_specs=[
            pl.BlockSpec((None, N, C), lambda i: (i, 0, 0)),   # x
            w_spec3, b_spec,            # e_conv1 (reused 3x)
            w_spec3, b_spec,            # b_conv
            w_spec2, b_spec,            # d_upconv1 (reused 3x)
            w_spec3, w_spec3, b_spec,   # d_conv1 (split)
            w_spec3, w_spec3, b_spec,   # d_conv2 (split)
            w_spec3, w_spec3, b_spec,   # d_conv3 (split)
        ],
        out_specs=pl.BlockSpec((None, N, C), lambda i: (i, 0, 0)),
        compiler_params=pltpu.CompilerParams(
            dimension_semantics=("parallel",)),   # 2 TCs on v7x; cheap on 1-TC chips
    )(x, we, be, wb, bb, wu, bu,
      wd1d, wd1e, bd1, wd2d, wd2e, bd2, wd3d, wd3e, bd3)


# ----------------------------------------------------------------------------
# Pure-JAX reference (for correctness check of the Pallas kernel)
# ----------------------------------------------------------------------------
def _conv1d_ref(x, w, b, relu):
    y = jax.lax.conv_general_dilated(
        x, w, window_strides=(1,), padding=((1, 1),),
        dimension_numbers=("NWC", "WIO", "NWC")) + b
    return jnp.maximum(y, 0.0) if relu else y


def _relu_maxpool_ref(x):
    B, L, Cc = x.shape
    return jnp.max(jnp.maximum(x, 0.0).reshape(B, L // 2, 2, Cc), axis=2)


def _upconv_ref(x, w, b):
    y0 = jnp.einsum("blc,cd->bld", x, w[0]) + b
    y1 = jnp.einsum("blc,cd->bld", x, w[1]) + b
    B, L, Cout = y0.shape
    return jnp.stack([y0, y1], axis=2).reshape(B, 2 * L, Cout)


def unet_forward_ref(x, params):
    we, be = params["e_conv1"]
    wb, bb = params["b_conv"]
    wu, bu = params["d_upconv1"]
    wd1, bd1 = params["d_conv1"]
    wd2, bd2 = params["d_conv2"]
    wd3, bd3 = params["d_conv3"]

    e_1 = _conv1d_ref(x, we, be, False)
    e_1_pool = _relu_maxpool_ref(e_1)
    e_2 = _conv1d_ref(e_1_pool, we, be, False)
    e_2_pool = _relu_maxpool_ref(e_2)
    e_3 = _conv1d_ref(e_2_pool, we, be, False)
    e_3_pool = _relu_maxpool_ref(e_3)

    b = _conv1d_ref(e_3_pool, wb, bb, True)

    d_1 = _upconv_ref(b, wu, bu)
    d_1 = _conv1d_ref(jnp.concatenate([d_1, e_3], -1), wd1, bd1, True)
    d_2 = _upconv_ref(d_1, wu, bu)
    d_2 = _conv1d_ref(jnp.concatenate([d_2, e_2], -1), wd2, bd2, True)
    d_3 = _upconv_ref(d_2, wu, bu)
    d_3 = _conv1d_ref(jnp.concatenate([d_3, e_1], -1), wd3, bd3, True)
    return d_3


# ----------------------------------------------------------------------------
# Main
# ----------------------------------------------------------------------------
if __name__ == "__main__":
    B, N, C = 2, 64, 32  # (batch, num_points, feature dim)

    key = jax.random.PRNGKey(0)
    keys = jax.random.split(key, 14)

    def make_conv(kw, kb, K, cin, cout):
        # weights stored as (K, Cin, Cout); equals PyTorch weight[:, :, k].T per tap
        w = 0.05 * jax.random.normal(kw, (K, cin, cout), jnp.float32)
        b = 0.05 * jax.random.normal(kb, (1, cout), jnp.float32)
        return w, b

    params = {
        "e_conv1":   make_conv(keys[0],  keys[1],  3, C,     C),
        "b_conv":    make_conv(keys[2],  keys[3],  3, C,     C),
        "d_upconv1": make_conv(keys[4],  keys[5],  2, C,     C),
        "d_conv1":   make_conv(keys[6],  keys[7],  3, 2 * C, C),
        "d_conv2":   make_conv(keys[8],  keys[9],  3, 2 * C, C),
        "d_conv3":   make_conv(keys[10], keys[11], 3, 2 * C, C),
    }

    x = jax.random.normal(keys[12], (B, N, C), jnp.float32)

    out = jax.block_until_ready(unet_forward(x, params))
    ref = jax.block_until_ready(unet_forward_ref(x, params))

    assert out.shape == (B, N, C), out.shape
    np.testing.assert_allclose(np.asarray(out), np.asarray(ref),
                               rtol=1e-4, atol=1e-4)
    print("KERNEL_OK")
</pallas_src>

<mosaic_0001>
module attributes {stable_mosaic.version = 11 : i64} {
  func.func @_unet_kernel(%arg0: i32, %arg1: memref<1x64x32xf32, #tpu.memory_space<vmem>>, %arg2: memref<3x32x32xf32, #tpu.memory_space<vmem>>, %arg3: memref<1x32xf32, #tpu.memory_space<vmem>>, %arg4: memref<3x32x32xf32, #tpu.memory_space<vmem>>, %arg5: memref<1x32xf32, #tpu.memory_space<vmem>>, %arg6: memref<2x32x32xf32, #tpu.memory_space<vmem>>, %arg7: memref<1x32xf32, #tpu.memory_space<vmem>>, %arg8: memref<3x32x32xf32, #tpu.memory_space<vmem>>, %arg9: memref<3x32x32xf32, #tpu.memory_space<vmem>>, %arg10: memref<1x32xf32, #tpu.memory_space<vmem>>, %arg11: memref<3x32x32xf32, #tpu.memory_space<vmem>>, %arg12: memref<3x32x32xf32, #tpu.memory_space<vmem>>, %arg13: memref<1x32xf32, #tpu.memory_space<vmem>>, %arg14: memref<3x32x32xf32, #tpu.memory_space<vmem>>, %arg15: memref<3x32x32xf32, #tpu.memory_space<vmem>>, %arg16: memref<1x32xf32, #tpu.memory_space<vmem>>, %arg17: memref<1x64x32xf32, #tpu.memory_space<vmem>>) attributes {dimension_semantics = [#tpu.dimension_semantics<parallel>], iteration_bounds = array<i64: 2>, scalar_prefetch = 0 : i64, scratch_operands = 0 : i64, tpu.core_type = #tpu.core_type<tc>, window_params = [{transform_indices = @transform_0, window_bounds = array<i64: 1, 64, 32>}, {pipeline_mode = #tpu.pipeline_mode<synchronous>, transform_indices = @transform_1, window_bounds = array<i64: 3, 32, 32>}, {pipeline_mode = #tpu.pipeline_mode<synchronous>, transform_indices = @transform_2, window_bounds = array<i64: 1, 32>}, {pipeline_mode = #tpu.pipeline_mode<synchronous>, transform_indices = @transform_3, window_bounds = array<i64: 3, 32, 32>}, {pipeline_mode = #tpu.pipeline_mode<synchronous>, transform_indices = @transform_4, window_bounds = array<i64: 1, 32>}, {pipeline_mode = #tpu.pipeline_mode<synchronous>, transform_indices = @transform_5, window_bounds = array<i64: 2, 32, 32>}, {pipeline_mode = #tpu.pipeline_mode<synchronous>, transform_indices = @transform_6, window_bounds = array<i64: 1, 32>}, {pipeline_mode = #tpu.pipeline_mode<synchronous>, transform_indices = @transform_7, window_bounds = array<i64: 3, 32, 32>}, {pipeline_mode = #tpu.pipeline_mode<synchronous>, transform_indices = @transform_8, window_bounds = array<i64: 3, 32, 32>}, {pipeline_mode = #tpu.pipeline_mode<synchronous>, transform_indices = @transform_9, window_bounds = array<i64: 1, 32>}, {pipeline_mode = #tpu.pipeline_mode<synchronous>, transform_indices = @transform_10, window_bounds = array<i64: 3, 32, 32>}, {pipeline_mode = #tpu.pipeline_mode<synchronous>, transform_indices = @transform_11, window_bounds = array<i64: 3, 32, 32>}, {pipeline_mode = #tpu.pipeline_mode<synchronous>, transform_indices = @transform_12, window_bounds = array<i64: 1, 32>}, {pipeline_mode = #tpu.pipeline_mode<synchronous>, transform_indices = @transform_13, window_bounds = array<i64: 3, 32, 32>}, {pipeline_mode = #tpu.pipeline_mode<synchronous>, transform_indices = @transform_14, window_bounds = array<i64: 3, 32, 32>}, {pipeline_mode = #tpu.pipeline_mode<synchronous>, transform_indices = @transform_15, window_bounds = array<i64: 1, 32>}, {transform_indices = @transform_16, window_bounds = array<i64: 1, 64, 32>}]} {
    %c0 = arith.constant 0 : index
    %c0_0 = arith.constant 0 : index
    %c0_1 = arith.constant 0 : index
    %0 = vector.load %arg1[%c0, %c0_0, %c0_1] : memref<1x64x32xf32, #tpu.memory_space<vmem>>, vector<1x64x32xf32>
    %1 = vector.shape_cast %0 : vector<1x64x32xf32> to vector<64x32xf32>
    %2 = tpu.iota {dimensions = array<i32: 0>} : vector<64x64xi32>
    %3 = tpu.iota {dimensions = array<i32: 1>} : vector<64x64xi32>
    %c-1_i32 = arith.constant -1 : i32
    %4 = vector.broadcast %c-1_i32 : i32 to vector<64x64xi32>
    %5 = arith.addi %2, %4 : vector<64x64xi32>
    %6 = arith.cmpi eq, %3, %5 : vector<64x64xi32>
    %cst = arith.constant 1.000000e+00 : f32
    %cst_2 = arith.constant 0.000000e+00 : f32
    %7 = vector.broadcast %cst : f32 to vector<64x64xf32>
    %8 = vector.broadcast %cst_2 : f32 to vector<64x64xf32>
    %9 = arith.select %6, %7, %8 : vector<64x64xi1>, vector<64x64xf32>
    %cst_3 = arith.constant dense<0.000000e+00> : vector<64x32xf32>
    %10 = tpu.matmul %9, %1, %cst_3 {dimension_numbers = #tpu.dot_dimension_numbers<[1], [0], [0], [1], [0, 0, 1, 1], [], []>} : vector<64x64xf32>, vector<64x32xf32>, vector<64x32xf32> -> vector<64x32xf32>
    %11 = tpu.iota {dimensions = array<i32: 0>} : vector<64x64xi32>
    %12 = tpu.iota {dimensions = array<i32: 1>} : vector<64x64xi32>
    %c1_i32 = arith.constant 1 : i32
    %13 = vector.broadcast %c1_i32 : i32 to vector<64x64xi32>
    %14 = arith.addi %11, %13 : vector<64x64xi32>
    %15 = arith.cmpi eq, %12, %14 : vector<64x64xi32>
    %cst_4 = arith.constant 1.000000e+00 : f32
    %cst_5 = arith.constant 0.000000e+00 : f32
    %16 = vector.broadcast %cst_4 : f32 to vector<64x64xf32>
    %17 = vector.broadcast %cst_5 : f32 to vector<64x64xf32>
    %18 = arith.select %15, %16, %17 : vector<64x64xi1>, vector<64x64xf32>
    %cst_6 = arith.constant dense<0.000000e+00> : vector<64x32xf32>
    %19 = tpu.matmul %18, %1, %cst_6 {dimension_numbers = #tpu.dot_dimension_numbers<[1], [0], [0], [1], [0, 0, 1, 1], [], []>} : vector<64x64xf32>, vector<64x32xf32>, vector<64x32xf32> -> vector<64x32xf32>
    %c0_7 = arith.constant 0 : index
    %c0_8 = arith.constant 0 : index
    %c0_9 = arith.constant 0 : index
    %20 = vector.load %arg2[%c0_7, %c0_8, %c0_9] : memref<3x32x32xf32, #tpu.memory_space<vmem>>, vector<1x32x32xf32>
    %21 = vector.shape_cast %20 : vector<1x32x32xf32> to vector<32x32xf32>
    %cst_10 = arith.constant dense<0.000000e+00> : vector<64x32xf32>
    %22 = tpu.matmul %10, %21, %cst_10 {dimension_numbers = #tpu.dot_dimension_numbers<[1], [0], [0], [1], [0, 0, 1, 1], [], []>} : vector<64x32xf32>, vector<32x32xf32>, vector<64x32xf32> -> vector<64x32xf32>
    %c1 = arith.constant 1 : index
    %c0_11 = arith.constant 0 : index
    %c0_12 = arith.constant 0 : index
    %23 = vector.load %arg2[%c1, %c0_11, %c0_12] : memref<3x32x32xf32, #tpu.memory_space<vmem>>, vector<1x32x32xf32>
    %24 = vector.shape_cast %23 : vector<1x32x32xf32> to vector<32x32xf32>
    %cst_13 = arith.constant dense<0.000000e+00> : vector<64x32xf32>
    %25 = tpu.matmul %1, %24, %cst_13 {dimension_numbers = #tpu.dot_dimension_numbers<[1], [0], [0], [1], [0, 0, 1, 1], [], []>} : vector<64x32xf32>, vector<32x32xf32>, vector<64x32xf32> -> vector<64x32xf32>
    %26 = arith.addf %22, %25 : vector<64x32xf32>
    %c2 = arith.constant 2 : index
    %c0_14 = arith.constant 0 : index
    %c0_15 = arith.constant 0 : index
    %27 = vector.load %arg2[%c2, %c0_14, %c0_15] : memref<3x32x32xf32, #tpu.memory_space<vmem>>, vector<1x32x32xf32>
    %28 = vector.shape_cast %27 : vector<1x32x32xf32> to vector<32x32xf32>
    %cst_16 = arith.constant dense<0.000000e+00> : vector<64x32xf32>
    %29 = tpu.matmul %19, %28, %cst_16 {dimension_numbers = #tpu.dot_dimension_numbers<[1], [0], [0], [1], [0, 0, 1, 1], [], []>} : vector<64x32xf32>, vector<32x32xf32>, vector<64x32xf32> -> vector<64x32xf32>
    %30 = arith.addf %26, %29 : vector<64x32xf32>
    %c0_17 = arith.constant 0 : index
    %c0_18 = arith.constant 0 : index
    %31 = vector.load %arg3[%c0_17, %c0_18] : memref<1x32xf32, #tpu.memory_space<vmem>>, vector<1x32xf32>
    %32 = vector.broadcast %31 : vector<1x32xf32> to vector<64x32xf32>
    %33 = arith.addf %30, %32 : vector<64x32xf32>
    %cst_19 = arith.constant 0.000000e+00 : f32
    %34 = vector.broadcast %cst_19 : f32 to vector<64x32xf32>
    %35 = arith.maximumf %33, %34 : vector<64x32xf32>
    %36 = tpu.iota {dimensions = array<i32: 0>} : vector<32x64xi32>
    %37 = tpu.iota {dimensions = array<i32: 1>} : vector<32x64xi32>
    %c2_i32 = arith.constant 2 : i32
    %38 = vector.broadcast %c2_i32 : i32 to vector<32x64xi32>
    %39 = arith.muli %38, %36 : vector<32x64xi32>
    %c0_i32 = arith.constant 0 : i32
    %40 = vector.broadcast %c0_i32 : i32 to vector<32x64xi32>
    %41 = arith.addi %39, %40 : vector<32x64xi32>
    %42 = arith.cmpi eq, %37, %41 : vector<32x64xi32>
    %cst_20 = arith.constant 1.000000e+00 : f32
    %cst_21 = arith.constant 0.000000e+00 : f32
    %43 = vector.broadcast %cst_20 : f32 to vector<32x64xf32>
    %44 = vector.broadcast %cst_21 : f32 to vector<32x64xf32>
    %45 = arith.select %42, %43, %44 : vector<32x64xi1>, vector<32x64xf32>
    %cst_22 = arith.constant dense<0.000000e+00> : vector<32x32xf32>
    %46 = tpu.matmul %45, %35, %cst_22 {dimension_numbers = #tpu.dot_dimension_numbers<[1], [0], [0], [1], [0, 0, 1, 1], [], []>} : vector<32x64xf32>, vector<64x32xf32>, vector<32x32xf32> -> vector<32x32xf32>
    %47 = tpu.iota {dimensions = array<i32: 0>} : vector<32x64xi32>
    %48 = tpu.iota {dimensions = array<i32: 1>} : vector<32x64xi32>
    %c2_i32_23 = arith.constant 2 : i32
    %49 = vector.broadcast %c2_i32_23 : i32 to vector<32x64xi32>
    %50 = arith.muli %49, %47 : vector<32x64xi32>
    %c1_i32_24 = arith.constant 1 : i32
    %51 = vector.broadcast %c1_i32_24 : i32 to vector<32x64xi32>
    %52 = arith.addi %50, %51 : vector<32x64xi32>
    %53 = arith.cmpi eq, %48, %52 : vector<32x64xi32>
    %cst_25 = arith.constant 1.000000e+00 : f32
    %cst_26 = arith.constant 0.000000e+00 : f32
    %54 = vector.broadcast %cst_25 : f32 to vector<32x64xf32>
    %55 = vector.broadcast %cst_26 : f32 to vector<32x64xf32>
    %56 = arith.select %53, %54, %55 : vector<32x64xi1>, vector<32x64xf32>
    %cst_27 = arith.constant dense<0.000000e+00> : vector<32x32xf32>
    %57 = tpu.matmul %56, %35, %cst_27 {dimension_numbers = #tpu.dot_dimension_numbers<[1], [0], [0], [1], [0, 0, 1, 1], [], []>} : vector<32x64xf32>, vector<64x32xf32>, vector<32x32xf32> -> vector<32x32xf32>
    %58 = arith.maximumf %46, %57 : vector<32x32xf32>
    %59 = tpu.iota {dimensions = array<i32: 0>} : vector<32x32xi32>
    %60 = tpu.iota {dimensions = array<i32: 1>} : vector<32x32xi32>
    %c-1_i32_28 = arith.constant -1 : i32
    %61 = vector.broadcast %c-1_i32_28 : i32 to vector<32x32xi32>
    %62 = arith.addi %59, %61 : vector<32x32xi32>
    %63 = arith.cmpi eq, %60, %62 : vector<32x32xi32>
    %cst_29 = arith.constant 1.000000e+00 : f32
    %cst_30 = arith.constant 0.000000e+00 : f32
    %64 = vector.broadcast %cst_29 : f32 to vector<32x32xf32>
    %65 = vector.broadcast %cst_30 : f32 to vector<32x32xf32>
    %66 = arith.select %63, %64, %65 : vector<32x32xi1>, vector<32x32xf32>
    %cst_31 = arith.constant dense<0.000000e+00> : vector<32x32xf32>
    %67 = tpu.matmul %66, %58, %cst_31 {dimension_numbers = #tpu.dot_dimension_numbers<[1], [0], [0], [1], [0, 0, 1, 1], [], []>} : vector<32x32xf32>, vector<32x32xf32>, vector<32x32xf32> -> vector<32x32xf32>
    %68 = tpu.iota {dimensions = array<i32: 0>} : vector<32x32xi32>
    %69 = tpu.iota {dimensions = array<i32: 1>} : vector<32x32xi32>
    %c1_i32_32 = arith.constant 1 : i32
    %70 = vector.broadcast %c1_i32_32 : i32 to vector<32x32xi32>
    %71 = arith.addi %68, %70 : vector<32x32xi32>
    %72 = arith.cmpi eq, %69, %71 : vector<32x32xi32>
    %cst_33 = arith.constant 1.000000e+00 : f32
    %cst_34 = arith.constant 0.000000e+00 : f32
    %73 = vector.broadcast %cst_33 : f32 to vector<32x32xf32>
    %74 = vector.broadcast %cst_34 : f32 to vector<32x32xf32>
    %75 = arith.select %72, %73, %74 : vector<32x32xi1>, vector<32x32xf32>
    %cst_35 = arith.constant dense<0.000000e+00> : vector<32x32xf32>
    %76 = tpu.matmul %75, %58, %cst_35 {dimension_numbers = #tpu.dot_dimension_numbers<[1], [0], [0], [1], [0, 0, 1, 1], [], []>} : vector<32x32xf32>, vector<32x32xf32>, vector<32x32xf32> -> vector<32x32xf32>
    %c0_36 = arith.constant 0 : index
    %c0_37 = arith.constant 0 : index
    %c0_38 = arith.constant 0 : index
    %77 = vector.load %arg2[%c0_36, %c0_37, %c0_38] : memref<3x32x32xf32, #tpu.memory_space<vmem>>, vector<1x32x32xf32>
    %78 = vector.shape_cast %77 : vector<1x32x32xf32> to vector<32x32xf32>
    %cst_39 = arith.constant dense<0.000000e+00> : vector<32x32xf32>
    %79 = tpu.matmul %67, %78, %cst_39 {dimension_numbers = #tpu.dot_dimension_numbers<[1], [0], [0], [1], [0, 0, 1, 1], [], []>} : vector<32x32xf32>, vector<32x32xf32>, vector<32x32xf32> -> vector<32x32xf32>
    %c1_40 = arith.constant 1 : index
    %c0_41 = arith.constant 0 : index
    %c0_42 = arith.constant 0 : index
    %80 = vector.load %arg2[%c1_40, %c0_41, %c0_42] : memref<3x32x32xf32, #tpu.memory_space<vmem>>, vector<1x32x32xf32>
    %81 = vector.shape_cast %80 : vector<1x32x32xf32> to vector<32x32xf32>
    %cst_43 = arith.constant dense<0.000000e+00> : vector<32x32xf32>
    %82 = tpu.matmul %58, %81, %cst_43 {dimension_numbers = #tpu.dot_dimension_numbers<[1], [0], [0], [1], [0, 0, 1, 1], [], []>} : vector<32x32xf32>, vector<32x32xf32>, vector<32x32xf32> -> vector<32x32xf32>
    %83 = arith.addf %79, %82 : vector<32x32xf32>
    %c2_44 = arith.constant 2 : index
    %c0_45 = arith.constant 0 : index
    %c0_46 = arith.constant 0 : index
    %84 = vector.load %arg2[%c2_44, %c0_45, %c0_46] : memref<3x32x32xf32, #tpu.memory_space<vmem>>, vector<1x32x32xf32>
    %85 = vector.shape_cast %84 : vector<1x32x32xf32> to vector<32x32xf32>
    %cst_47 = arith.constant dense<0.000000e+00> : vector<32x32xf32>
    %86 = tpu.matmul %76, %85, %cst_47 {dimension_numbers = #tpu.dot_dimension_numbers<[1], [0], [0], [1], [0, 0, 1, 1], [], []>} : vector<32x32xf32>, vector<32x32xf32>, vector<32x32xf32> -> vector<32x32xf32>
    %87 = arith.addf %83, %86 : vector<32x32xf32>
    %c0_48 = arith.constant 0 : index
    %c0_49 = arith.constant 0 : index
    %88 = vector.load %arg3[%c0_48, %c0_49] : memref<1x32xf32, #tpu.memory_space<vmem>>, vector<1x32xf32>
    %89 = vector.broadcast %88 : vector<1x32xf32> to vector<32x32xf32>
    %90 = arith.addf %87, %89 : vector<32x32xf32>
    %cst_50 = arith.constant 0.000000e+00 : f32
    %91 = vector.broadcast %cst_50 : f32 to vector<32x32xf32>
    %92 = arith.maximumf %90, %91 : vector<32x32xf32>
    %93 = tpu.iota {dimensions = array<i32: 0>} : vector<16x32xi32>
    %94 = tpu.iota {dimensions = array<i32: 1>} : vector<16x32xi32>
    %c2_i32_51 = arith.constant 2 : i32
    %95 = vector.broadcast %c2_i32_51 : i32 to vector<16x32xi32>
    %96 = arith.muli %95, %93 : vector<16x32xi32>
    %c0_i32_52 = arith.constant 0 : i32
    %97 = vector.broadcast %c0_i32_52 : i32 to vector<16x32xi32>
    %98 = arith.addi %96, %97 : vector<16x32xi32>
    %99 = arith.cmpi eq, %94, %98 : vector<16x32xi32>
    %cst_53 = arith.constant 1.000000e+00 : f32
    %cst_54 = arith.constant 0.000000e+00 : f32
    %100 = vector.broadcast %cst_53 : f32 to vector<16x32xf32>
    %101 = vector.broadcast %cst_54 : f32 to vector<16x32xf32>
    %102 = arith.select %99, %100, %101 : vector<16x32xi1>, vector<16x32xf32>
    %cst_55 = arith.constant dense<0.000000e+00> : vector<16x32xf32>
    %103 = tpu.matmul %102, %92, %cst_55 {dimension_numbers = #tpu.dot_dimension_numbers<[1], [0], [0], [1], [0, 0, 1, 1], [], []>} : vector<16x32xf32>, vector<32x32xf32>, vector<16x32xf32> -> vector<16x32xf32>
    %104 = tpu.iota {dimensions = array<i32: 0>} : vector<16x32xi32>
    %105 = tpu.iota {dimensions = array<i32: 1>} : vector<16x32xi32>
    %c2_i32_56 = arith.constant 2 : i32
    %106 = vector.broadcast %c2_i32_56 : i32 to vector<16x32xi32>
    %107 = arith.muli %106, %104 : vector<16x32xi32>
    %c1_i32_57 = arith.constant 1 : i32
    %108 = vector.broadcast %c1_i32_57 : i32 to vector<16x32xi32>
    %109 = arith.addi %107, %108 : vector<16x32xi32>
    %110 = arith.cmpi eq, %105, %109 : vector<16x32xi32>
    %cst_58 = arith.constant 1.000000e+00 : f32
    %cst_59 = arith.constant 0.000000e+00 : f32
    %111 = vector.broadcast %cst_58 : f32 to vector<16x32xf32>
    %112 = vector.broadcast %cst_59 : f32 to vector<16x32xf32>
    %113 = arith.select %110, %111, %112 : vector<16x32xi1>, vector<16x32xf32>
    %cst_60 = arith.constant dense<0.000000e+00> : vector<16x32xf32>
    %114 = tpu.matmul %113, %92, %cst_60 {dimension_numbers = #tpu.dot_dimension_numbers<[1], [0], [0], [1], [0, 0, 1, 1], [], []>} : vector<16x32xf32>, vector<32x32xf32>, vector<16x32xf32> -> vector<16x32xf32>
    %115 = arith.maximumf %103, %114 : vector<16x32xf32>
    %116 = tpu.iota {dimensions = array<i32: 0>} : vector<16x16xi32>
    %117 = tpu.iota {dimensions = array<i32: 1>} : vector<16x16xi32>
    %c-1_i32_61 = arith.constant -1 : i32
    %118 = vector.broadcast %c-1_i32_61 : i32 to vector<16x16xi32>
    %119 = arith.addi %116, %118 : vector<16x16xi32>
    %120 = arith.cmpi eq, %117, %119 : vector<16x16xi32>
    %cst_62 = arith.constant 1.000000e+00 : f32
    %cst_63 = arith.constant 0.000000e+00 : f32
    %121 = vector.broadcast %cst_62 : f32 to vector<16x16xf32>
    %122 = vector.broadcast %cst_63 : f32 to vector<16x16xf32>
    %123 = arith.select %120, %121, %122 : vector<16x16xi1>, vector<16x16xf32>
    %cst_64 = arith.constant dense<0.000000e+00> : vector<16x32xf32>
    %124 = tpu.matmul %123, %115, %cst_64 {dimension_numbers = #tpu.dot_dimension_numbers<[1], [0], [0], [1], [0, 0, 1, 1], [], []>} : vector<16x16xf32>, vector<16x32xf32>, vector<16x32xf32> -> vector<16x32xf32>
    %125 = tpu.iota {dimensions = array<i32: 0>} : vector<16x16xi32>
    %126 = tpu.iota {dimensions = array<i32: 1>} : vector<16x16xi32>
    %c1_i32_65 = arith.constant 1 : i32
    %127 = vector.broadcast %c1_i32_65 : i32 to vector<16x16xi32>
    %128 = arith.addi %125, %127 : vector<16x16xi32>
    %129 = arith.cmpi eq, %126, %128 : vector<16x16xi32>
    %cst_66 = arith.constant 1.000000e+00 : f32
    %cst_67 = arith.constant 0.000000e+00 : f32
    %130 = vector.broadcast %cst_66 : f32 to vector<16x16xf32>
    %131 = vector.broadcast %cst_67 : f32 to vector<16x16xf32>
    %132 = arith.select %129, %130, %131 : vector<16x16xi1>, vector<16x16xf32>
    %cst_68 = arith.constant dense<0.000000e+00> : vector<16x32xf32>
    %133 = tpu.matmul %132, %115, %cst_68 {dimension_numbers = #tpu.dot_dimension_numbers<[1], [0], [0], [1], [0, 0, 1, 1], [], []>} : vector<16x16xf32>, vector<16x32xf32>, vector<16x32xf32> -> vector<16x32xf32>
    %c0_69 = arith.constant 0 : index
    %c0_70 = arith.constant 0 : index
    %c0_71 = arith.constant 0 : index
    %134 = vector.load %arg2[%c0_69, %c0_70, %c0_71] : memref<3x32x32xf32, #tpu.memory_space<vmem>>, vector<1x32x32xf32>
    %135 = vector.shape_cast %134 : vector<1x32x32xf32> to vector<32x32xf32>
    %cst_72 = arith.constant dense<0.000000e+00> : vector<16x32xf32>
    %136 = tpu.matmul %124, %135, %cst_72 {dimension_numbers = #tpu.dot_dimension_numbers<[1], [0], [0], [1], [0, 0, 1, 1], [], []>} : vector<16x32xf32>, vector<32x32xf32>, vector<16x32xf32> -> vector<16x32xf32>
    %c1_73 = arith.constant 1 : index
    %c0_74 = arith.constant 0 : index
    %c0_75 = arith.constant 0 : index
    %137 = vector.load %arg2[%c1_73, %c0_74, %c0_75] : memref<3x32x32xf32, #tpu.memory_space<vmem>>, vector<1x32x32xf32>
    %138 = vector.shape_cast %137 : vector<1x32x32xf32> to vector<32x32xf32>
    %cst_76 = arith.constant dense<0.000000e+00> : vector<16x32xf32>
    %139 = tpu.matmul %115, %138, %cst_76 {dimension_numbers = #tpu.dot_dimension_numbers<[1], [0], [0], [1], [0, 0, 1, 1], [], []>} : vector<16x32xf32>, vector<32x32xf32>, vector<16x32xf32> -> vector<16x32xf32>
    %140 = arith.addf %136, %139 : vector<16x32xf32>
    %c2_77 = arith.constant 2 : index
    %c0_78 = arith.constant 0 : index
    %c0_79 = arith.constant 0 : index
    %141 = vector.load %arg2[%c2_77, %c0_78, %c0_79] : memref<3x32x32xf32, #tpu.memory_space<vmem>>, vector<1x32x32xf32>
    %142 = vector.shape_cast %141 : vector<1x32x32xf32> to vector<32x32xf32>
    %cst_80 = arith.constant dense<0.000000e+00> : vector<16x32xf32>
    %143 = tpu.matmul %133, %142, %cst_80 {dimension_numbers = #tpu.dot_dimension_numbers<[1], [0], [0], [1], [0, 0, 1, 1], [], []>} : vector<16x32xf32>, vector<32x32xf32>, vector<16x32xf32> -> vector<16x32xf32>
    %144 = arith.addf %140, %143 : vector<16x32xf32>
    %c0_81 = arith.constant 0 : index
    %c0_82 = arith.constant 0 : index
    %145 = vector.load %arg3[%c0_81, %c0_82] : memref<1x32xf32, #tpu.memory_space<vmem>>, vector<1x32xf32>
    %146 = vector.broadcast %145 : vector<1x32xf32> to vector<16x32xf32>
    %147 = arith.addf %144, %146 : vector<16x32xf32>
    %cst_83 = arith.constant 0.000000e+00 : f32
    %148 = vector.broadcast %cst_83 : f32 to vector<16x32xf32>
    %149 = arith.maximumf %147, %148 : vector<16x32xf32>
    %150 = tpu.iota {dimensions = array<i32: 0>} : vector<8x16xi32>
    %151 = tpu.iota {dimensions = array<i32: 1>} : vector<8x16xi32>
    %c2_i32_84 = arith.constant 2 : i32
    %152 = vector.broadcast %c2_i32_84 : i32 to vector<8x16xi32>
    %153 = arith.muli %152, %150 : vector<8x16xi32>
    %c0_i32_85 = arith.constant 0 : i32
    %154 = vector.broadcast %c0_i32_85 : i32 to vector<8x16xi32>
    %155 = arith.addi %153, %154 : vector<8x16xi32>
    %156 = arith.cmpi eq, %151, %155 : vector<8x16xi32>
    %cst_86 = arith.constant 1.000000e+00 : f32
    %cst_87 = arith.constant 0.000000e+00 : f32
    %157 = vector.broadcast %cst_86 : f32 to vector<8x16xf32>
    %158 = vector.broadcast %cst_87 : f32 to vector<8x16xf32>
    %159 = arith.select %156, %157, %158 : vector<8x16xi1>, vector<8x16xf32>
    %cst_88 = arith.constant dense<0.000000e+00> : vector<8x32xf32>
    %160 = tpu.matmul %159, %149, %cst_88 {dimension_numbers = #tpu.dot_dimension_numbers<[1], [0], [0], [1], [0, 0, 1, 1], [], []>} : vector<8x16xf32>, vector<16x32xf32>, vector<8x32xf32> -> vector<8x32xf32>
    %161 = tpu.iota {dimensions = array<i32: 0>} : vector<8x16xi32>
    %162 = tpu.iota {dimensions = array<i32: 1>} : vector<8x16xi32>
    %c2_i32_89 = arith.constant 2 : i32
    %163 = vector.broadcast %c2_i32_89 : i32 to vector<8x16xi32>
    %164 = arith.muli %163, %161 : vector<8x16xi32>
    %c1_i32_90 = arith.constant 1 : i32
    %165 = vector.broadcast %c1_i32_90 : i32 to vector<8x16xi32>
    %166 = arith.addi %164, %165 : vector<8x16xi32>
    %167 = arith.cmpi eq, %162, %166 : vector<8x16xi32>
    %cst_91 = arith.constant 1.000000e+00 : f32
    %cst_92 = arith.constant 0.000000e+00 : f32
    %168 = vector.broadcast %cst_91 : f32 to vector<8x16xf32>
    %169 = vector.broadcast %cst_92 : f32 to vector<8x16xf32>
    %170 = arith.select %167, %168, %169 : vector<8x16xi1>, vector<8x16xf32>
    %cst_93 = arith.constant dense<0.000000e+00> : vector<8x32xf32>
    %171 = tpu.matmul %170, %149, %cst_93 {dimension_numbers = #tpu.dot_dimension_numbers<[1], [0], [0], [1], [0, 0, 1, 1], [], []>} : vector<8x16xf32>, vector<16x32xf32>, vector<8x32xf32> -> vector<8x32xf32>
    %172 = arith.maximumf %160, %171 : vector<8x32xf32>
    %173 = tpu.iota {dimensions = array<i32: 0>} : vector<8x8xi32>
    %174 = tpu.iota {dimensions = array<i32: 1>} : vector<8x8xi32>
    %c-1_i32_94 = arith.constant -1 : i32
    %175 = vector.broadcast %c-1_i32_94 : i32 to vector<8x8xi32>
    %176 = arith.addi %173, %175 : vector<8x8xi32>
    %177 = arith.cmpi eq, %174, %176 : vector<8x8xi32>
    %cst_95 = arith.constant 1.000000e+00 : f32
    %cst_96 = arith.constant 0.000000e+00 : f32
    %178 = vector.broadcast %cst_95 : f32 to vector<8x8xf32>
    %179 = vector.broadcast %cst_96 : f32 to vector<8x8xf32>
    %180 = arith.select %177, %178, %179 : vector<8x8xi1>, vector<8x8xf32>
    %cst_97 = arith.constant dense<0.000000e+00> : vector<8x32xf32>
    %181 = tpu.matmul %180, %172, %cst_97 {dimension_numbers = #tpu.dot_dimension_numbers<[1], [0], [0], [1], [0, 0, 1, 1], [], []>} : vector<8x8xf32>, vector<8x32xf32>, vector<8x32xf32> -> vector<8x32xf32>
    %182 = tpu.iota {dimensions = array<i32: 0>} : vector<8x8xi32>
    %183 = tpu.iota {dimensions = array<i32: 1>} : vector<8x8xi32>
    %c1_i32_98 = arith.constant 1 : i32
    %184 = vector.broadcast %c1_i32_98 : i32 to vector<8x8xi32>
    %185 = arith.addi %182, %184 : vector<8x8xi32>
    %186 = arith.cmpi eq, %183, %185 : vector<8x8xi32>
    %cst_99 = arith.constant 1.000000e+00 : f32
    %cst_100 = arith.constant 0.000000e+00 : f32
    %187 = vector.broadcast %cst_99 : f32 to vector<8x8xf32>
    %188 = vector.broadcast %cst_100 : f32 to vector<8x8xf32>
    %189 = arith.select %186, %187, %188 : vector<8x8xi1>, vector<8x8xf32>
    %cst_101 = arith.constant dense<0.000000e+00> : vector<8x32xf32>
    %190 = tpu.matmul %189, %172, %cst_101 {dimension_numbers = #tpu.dot_dimension_numbers<[1], [0], [0], [1], [0, 0, 1, 1], [], []>} : vector<8x8xf32>, vector<8x32xf32>, vector<8x32xf32> -> vector<8x32xf32>
    %c0_102 = arith.constant 0 : index
    %c0_103 = arith.constant 0 : index
    %c0_104 = arith.constant 0 : index
    %191 = vector.load %arg4[%c0_102, %c0_103, %c0_104] : memref<3x32x32xf32, #tpu.memory_space<vmem>>, vector<1x32x32xf32>
    %192 = vector.shape_cast %191 : vector<1x32x32xf32> to vector<32x32xf32>
    %cst_105 = arith.constant dense<0.000000e+00> : vector<8x32xf32>
    %193 = tpu.matmul %181, %192, %cst_105 {dimension_numbers = #tpu.dot_dimension_numbers<[1], [0], [0], [1], [0, 0, 1, 1], [], []>} : vector<8x32xf32>, vector<32x32xf32>, vector<8x32xf32> -> vector<8x32xf32>
    %c1_106 = arith.constant 1 : index
    %c0_107 = arith.constant 0 : index
    %c0_108 = arith.constant 0 : index
    %194 = vector.load %arg4[%c1_106, %c0_107, %c0_108] : memref<3x32x32xf32, #tpu.memory_space<vmem>>, vector<1x32x32xf32>
    %195 = vector.shape_cast %194 : vector<1x32x32xf32> to vector<32x32xf32>
    %cst_109 = arith.constant dense<0.000000e+00> : vector<8x32xf32>
    %196 = tpu.matmul %172, %195, %cst_109 {dimension_numbers = #tpu.dot_dimension_numbers<[1], [0], [0], [1], [0, 0, 1, 1], [], []>} : vector<8x32xf32>, vector<32x32xf32>, vector<8x32xf32> -> vector<8x32xf32>
    %197 = arith.addf %193, %196 : vector<8x32xf32>
    %c2_110 = arith.constant 2 : index
    %c0_111 = arith.constant 0 : index
    %c0_112 = arith.constant 0 : index
    %198 = vector.load %arg4[%c2_110, %c0_111, %c0_112] : memref<3x32x32xf32, #tpu.memory_space<vmem>>, vector<1x32x32xf32>
    %199 = vector.shape_cast %198 : vector<1x32x32xf32> to vector<32x32xf32>
    %cst_113 = arith.constant dense<0.000000e+00> : vector<8x32xf32>
    %200 = tpu.matmul %190, %199, %cst_113 {dimension_numbers = #tpu.dot_dimension_numbers<[1], [0], [0], [1], [0, 0, 1, 1], [], []>} : vector<8x32xf32>, vector<32x32xf32>, vector<8x32xf32> -> vector<8x32xf32>
    %201 = arith.addf %197, %200 : vector<8x32xf32>
    %c0_114 = arith.constant 0 : index
    %c0_115 = arith.constant 0 : index
    %202 = vector.load %arg5[%c0_114, %c0_115] : memref<1x32xf32, #tpu.memory_space<vmem>>, vector<1x32xf32>
    %203 = vector.broadcast %202 : vector<1x32xf32> to vector<8x32xf32>
    %204 = arith.addf %201, %203 : vector<8x32xf32>
    %cst_116 = arith.constant 0.000000e+00 : f32
    %205 = vector.broadcast %cst_116 : f32 to vector<8x32xf32>
    %206 = arith.maximumf %204, %205 : vector<8x32xf32>
    %c0_117 = arith.constant 0 : index
    %c0_118 = arith.constant 0 : index
    %207 = vector.load %arg7[%c0_117, %c0_118] : memref<1x32xf32, #tpu.memory_space<vmem>>, vector<1x32xf32>
    %c0_119 = arith.constant 0 : index
    %c0_120 = arith.constant 0 : index
    %c0_121 = arith.constant 0 : index
    %208 = vector.load %arg6[%c0_119, %c0_120, %c0_121] : memref<2x32x32xf32, #tpu.memory_space<vmem>>, vector<1x32x32xf32>
    %209 = vector.shape_cast %208 : vector<1x32x32xf32> to vector<32x32xf32>
    %cst_122 = arith.constant dense<0.000000e+00> : vector<8x32xf32>
    %210 = tpu.matmul %206, %209, %cst_122 {dimension_numbers = #tpu.dot_dimension_numbers<[1], [0], [0], [1], [0, 0, 1, 1], [], []>} : vector<8x32xf32>, vector<32x32xf32>, vector<8x32xf32> -> vector<8x32xf32>
    %211 = vector.broadcast %207 : vector<1x32xf32> to vector<8x32xf32>
    %212 = arith.addf %210, %211 : vector<8x32xf32>
    %c1_123 = arith.constant 1 : index
    %c0_124 = arith.constant 0 : index
    %c0_125 = arith.constant 0 : index
    %213 = vector.load %arg6[%c1_123, %c0_124, %c0_125] : memref<2x32x32xf32, #tpu.memory_space<vmem>>, vector<1x32x32xf32>
    %214 = vector.shape_cast %213 : vector<1x32x32xf32> to vector<32x32xf32>
    %cst_126 = arith.constant dense<0.000000e+00> : vector<8x32xf32>
    %215 = tpu.matmul %206, %214, %cst_126 {dimension_numbers = #tpu.dot_dimension_numbers<[1], [0], [0], [1], [0, 0, 1, 1], [], []>} : vector<8x32xf32>, vector<32x32xf32>, vector<8x32xf32> -> vector<8x32xf32>
    %216 = vector.broadcast %207 : vector<1x32xf32> to vector<8x32xf32>
    %217 = arith.addf %215, %216 : vector<8x32xf32>
    %218 = tpu.iota {dimensions = array<i32: 0>} : vector<16x8xi32>
    %219 = tpu.iota {dimensions = array<i32: 1>} : vector<16x8xi32>
    %c2_i32_127 = arith.constant 2 : i32
    %220 = vector.broadcast %c2_i32_127 : i32 to vector<16x8xi32>
    %221 = arith.muli %220, %219 : vector<16x8xi32>
    %c0_i32_128 = arith.constant 0 : i32
    %222 = vector.broadcast %c0_i32_128 : i32 to vector<16x8xi32>
    %223 = arith.addi %221, %222 : vector<16x8xi32>
    %224 = arith.cmpi eq, %218, %223 : vector<16x8xi32>
    %cst_129 = arith.constant 1.000000e+00 : f32
    %cst_130 = arith.constant 0.000000e+00 : f32
    %225 = vector.broadcast %cst_129 : f32 to vector<16x8xf32>
    %226 = vector.broadcast %cst_130 : f32 to vector<16x8xf32>
    %227 = arith.select %224, %225, %226 : vector<16x8xi1>, vector<16x8xf32>
    %cst_131 = arith.constant dense<0.000000e+00> : vector<16x32xf32>
    %228 = tpu.matmul %227, %212, %cst_131 {dimension_numbers = #tpu.dot_dimension_numbers<[1], [0], [0], [1], [0, 0, 1, 1], [], []>} : vector<16x8xf32>, vector<8x32xf32>, vector<16x32xf32> -> vector<16x32xf32>
    %229 = tpu.iota {dimensions = array<i32: 0>} : vector<16x8xi32>
    %230 = tpu.iota {dimensions = array<i32: 1>} : vector<16x8xi32>
    %c2_i32_132 = arith.constant 2 : i32
    %231 = vector.broadcast %c2_i32_132 : i32 to vector<16x8xi32>
    %232 = arith.muli %231, %230 : vector<16x8xi32>
    %c1_i32_133 = arith.constant 1 : i32
    %233 = vector.broadcast %c1_i32_133 : i32 to vector<16x8xi32>
    %234 = arith.addi %232, %233 : vector<16x8xi32>
    %235 = arith.cmpi eq, %229, %234 : vector<16x8xi32>
    %cst_134 = arith.constant 1.000000e+00 : f32
    %cst_135 = arith.constant 0.000000e+00 : f32
    %236 = vector.broadcast %cst_134 : f32 to vector<16x8xf32>
    %237 = vector.broadcast %cst_135 : f32 to vector<16x8xf32>
    %238 = arith.select %235, %236, %237 : vector<16x8xi1>, vector<16x8xf32>
    %cst_136 = arith.constant dense<0.000000e+00> : vector<16x32xf32>
    %239 = tpu.matmul %238, %217, %cst_136 {dimension_numbers = #tpu.dot_dimension_numbers<[1], [0], [0], [1], [0, 0, 1, 1], [], []>} : vector<16x8xf32>, vector<8x32xf32>, vector<16x32xf32> -> vector<16x32xf32>
    %240 = arith.addf %228, %239 : vector<16x32xf32>
    %241 = tpu.iota {dimensions = array<i32: 0>} : vector<16x16xi32>
    %242 = tpu.iota {dimensions = array<i32: 1>} : vector<16x16xi32>
    %c-1_i32_137 = arith.constant -1 : i32
    %243 = vector.broadcast %c-1_i32_137 : i32 to vector<16x16xi32>
    %244 = arith.addi %241, %243 : vector<16x16xi32>
    %245 = arith.cmpi eq, %242, %244 : vector<16x16xi32>
    %cst_138 = arith.constant 1.000000e+00 : f32
    %cst_139 = arith.constant 0.000000e+00 : f32
    %246 = vector.broadcast %cst_138 : f32 to vector<16x16xf32>
    %247 = vector.broadcast %cst_139 : f32 to vector<16x16xf32>
    %248 = arith.select %245, %246, %247 : vector<16x16xi1>, vector<16x16xf32>
    %249 = tpu.iota {dimensions = array<i32: 0>} : vector<16x16xi32>
    %250 = tpu.iota {dimensions = array<i32: 1>} : vector<16x16xi32>
    %c1_i32_140 = arith.constant 1 : i32
    %251 = vector.broadcast %c1_i32_140 : i32 to vector<16x16xi32>
    %252 = arith.addi %249, %251 : vector<16x16xi32>
    %253 = arith.cmpi eq, %250, %252 : vector<16x16xi32>
    %cst_141 = arith.constant 1.000000e+00 : f32
    %cst_142 = arith.constant 0.000000e+00 : f32
    %254 = vector.broadcast %cst_141 : f32 to vector<16x16xf32>
    %255 = vector.broadcast %cst_142 : f32 to vector<16x16xf32>
    %256 = arith.select %253, %254, %255 : vector<16x16xi1>, vector<16x16xf32>
    %cst_143 = arith.constant dense<0.000000e+00> : vector<16x32xf32>
    %257 = tpu.matmul %248, %240, %cst_143 {dimension_numbers = #tpu.dot_dimension_numbers<[1], [0], [0], [1], [0, 0, 1, 1], [], []>} : vector<16x16xf32>, vector<16x32xf32>, vector<16x32xf32> -> vector<16x32xf32>
    %c0_144 = arith.constant 0 : index
    %c0_145 = arith.constant 0 : index
    %c0_146 = arith.constant 0 : index
    %258 = vector.load %arg8[%c0_144, %c0_145, %c0_146] : memref<3x32x32xf32, #tpu.memory_space<vmem>>, vector<1x32x32xf32>
    %259 = vector.shape_cast %258 : vector<1x32x32xf32> to vector<32x32xf32>
    %cst_147 = arith.constant dense<0.000000e+00> : vector<16x32xf32>
    %260 = tpu.matmul %257, %259, %cst_147 {dimension_numbers = #tpu.dot_dimension_numbers<[1], [0], [0], [1], [0, 0, 1, 1], [], []>} : vector<16x32xf32>, vector<32x32xf32>, vector<16x32xf32> -> vector<16x32xf32>
    %c1_148 = arith.constant 1 : index
    %c0_149 = arith.constant 0 : index
    %c0_150 = arith.constant 0 : index
    %261 = vector.load %arg8[%c1_148, %c0_149, %c0_150] : memref<3x32x32xf32, #tpu.memory_space<vmem>>, vector<1x32x32xf32>
    %262 = vector.shape_cast %261 : vector<1x32x32xf32> to vector<32x32xf32>
    %cst_151 = arith.constant dense<0.000000e+00> : vector<16x32xf32>
    %263 = tpu.matmul %240, %262, %cst_151 {dimension_numbers = #tpu.dot_dimension_numbers<[1], [0], [0], [1], [0, 0, 1, 1], [], []>} : vector<16x32xf32>, vector<32x32xf32>, vector<16x32xf32> -> vector<16x32xf32>
    %264 = arith.addf %260, %263 : vector<16x32xf32>
    %cst_152 = arith.constant dense<0.000000e+00> : vector<16x32xf32>
    %265 = tpu.matmul %256, %240, %cst_152 {dimension_numbers = #tpu.dot_dimension_numbers<[1], [0], [0], [1], [0, 0, 1, 1], [], []>} : vector<16x16xf32>, vector<16x32xf32>, vector<16x32xf32> -> vector<16x32xf32>
    %c2_153 = arith.constant 2 : index
    %c0_154 = arith.constant 0 : index
    %c0_155 = arith.constant 0 : index
    %266 = vector.load %arg8[%c2_153, %c0_154, %c0_155] : memref<3x32x32xf32, #tpu.memory_space<vmem>>, vector<1x32x32xf32>
    %267 = vector.shape_cast %266 : vector<1x32x32xf32> to vector<32x32xf32>
    %cst_156 = arith.constant dense<0.000000e+00> : vector<16x32xf32>
    %268 = tpu.matmul %265, %267, %cst_156 {dimension_numbers = #tpu.dot_dimension_numbers<[1], [0], [0], [1], [0, 0, 1, 1], [], []>} : vector<16x32xf32>, vector<32x32xf32>, vector<16x32xf32> -> vector<16x32xf32>
    %269 = arith.addf %264, %268 : vector<16x32xf32>
    %cst_157 = arith.constant dense<0.000000e+00> : vector<16x32xf32>
    %270 = tpu.matmul %248, %147, %cst_157 {dimension_numbers = #tpu.dot_dimension_numbers<[1], [0], [0], [1], [0, 0, 1, 1], [], []>} : vector<16x16xf32>, vector<16x32xf32>, vector<16x32xf32> -> vector<16x32xf32>
    %c0_158 = arith.constant 0 : index
    %c0_159 = arith.constant 0 : index
    %c0_160 = arith.constant 0 : index
    %271 = vector.load %arg9[%c0_158, %c0_159, %c0_160] : memref<3x32x32xf32, #tpu.memory_space<vmem>>, vector<1x32x32xf32>
    %272 = vector.shape_cast %271 : vector<1x32x32xf32> to vector<32x32xf32>
    %cst_161 = arith.constant dense<0.000000e+00> : vector<16x32xf32>
    %273 = tpu.matmul %270, %272, %cst_161 {dimension_numbers = #tpu.dot_dimension_numbers<[1], [0], [0], [1], [0, 0, 1, 1], [], []>} : vector<16x32xf32>, vector<32x32xf32>, vector<16x32xf32> -> vector<16x32xf32>
    %274 = arith.addf %269, %273 : vector<16x32xf32>
    %c1_162 = arith.constant 1 : index
    %c0_163 = arith.constant 0 : index
    %c0_164 = arith.constant 0 : index
    %275 = vector.load %arg9[%c1_162, %c0_163, %c0_164] : memref<3x32x32xf32, #tpu.memory_space<vmem>>, vector<1x32x32xf32>
    %276 = vector.shape_cast %275 : vector<1x32x32xf32> to vector<32x32xf32>
    %cst_165 = arith.constant dense<0.000000e+00> : vector<16x32xf32>
    %277 = tpu.matmul %147, %276, %cst_165 {dimension_numbers = #tpu.dot_dimension_numbers<[1], [0], [0], [1], [0, 0, 1, 1], [], []>} : vector<16x32xf32>, vector<32x32xf32>, vector<16x32xf32> -> vector<16x32xf32>
    %278 = arith.addf %274, %277 : vector<16x32xf32>
    %cst_166 = arith.constant dense<0.000000e+00> : vector<16x32xf32>
    %279 = tpu.matmul %256, %147, %cst_166 {dimension_numbers = #tpu.dot_dimension_numbers<[1], [0], [0], [1], [0, 0, 1, 1], [], []>} : vector<16x16xf32>, vector<16x32xf32>, vector<16x32xf32> -> vector<16x32xf32>
    %c2_167 = arith.constant 2 : index
    %c0_168 = arith.constant 0 : index
    %c0_169 = arith.constant 0 : index
    %280 = vector.load %arg9[%c2_167, %c0_168, %c0_169] : memref<3x32x32xf32, #tpu.memory_space<vmem>>, vector<1x32x32xf32>
    %281 = vector.shape_cast %280 : vector<1x32x32xf32> to vector<32x32xf32>
    %cst_170 = arith.constant dense<0.000000e+00> : vector<16x32xf32>
    %282 = tpu.matmul %279, %281, %cst_170 {dimension_numbers = #tpu.dot_dimension_numbers<[1], [0], [0], [1], [0, 0, 1, 1], [], []>} : vector<16x32xf32>, vector<32x32xf32>, vector<16x32xf32> -> vector<16x32xf32>
    %283 = arith.addf %278, %282 : vector<16x32xf32>
    %c0_171 = arith.constant 0 : index
    %c0_172 = arith.constant 0 : index
    %284 = vector.load %arg10[%c0_171, %c0_172] : memref<1x32xf32, #tpu.memory_space<vmem>>, vector<1x32xf32>
    %285 = vector.broadcast %284 : vector<1x32xf32> to vector<16x32xf32>
    %286 = arith.addf %283, %285 : vector<16x32xf32>
    %cst_173 = arith.constant 0.000000e+00 : f32
    %287 = vector.broadcast %cst_173 : f32 to vector<16x32xf32>
    %288 = arith.maximumf %286, %287 : vector<16x32xf32>
    %c0_174 = arith.constant 0 : index
    %c0_175 = arith.constant 0 : index
    %289 = vector.load %arg7[%c0_174, %c0_175] : memref<1x32xf32, #tpu.memory_space<vmem>>, vector<1x32xf32>
    %c0_176 = arith.constant 0 : index
    %c0_177 = arith.constant 0 : index
    %c0_178 = arith.constant 0 : index
    %290 = vector.load %arg6[%c0_176, %c0_177, %c0_178] : memref<2x32x32xf32, #tpu.memory_space<vmem>>, vector<1x32x32xf32>
    %291 = vector.shape_cast %290 : vector<1x32x32xf32> to vector<32x32xf32>
    %cst_179 = arith.constant dense<0.000000e+00> : vector<16x32xf32>
    %292 = tpu.matmul %288, %291, %cst_179 {dimension_numbers = #tpu.dot_dimension_numbers<[1], [0], [0], [1], [0, 0, 1, 1], [], []>} : vector<16x32xf32>, vector<32x32xf32>, vector<16x32xf32> -> vector<16x32xf32>
    %293 = vector.broadcast %289 : vector<1x32xf32> to vector<16x32xf32>
    %294 = arith.addf %292, %293 : vector<16x32xf32>
    %c1_180 = arith.constant 1 : index
    %c0_181 = arith.constant 0 : index
    %c0_182 = arith.constant 0 : index
    %295 = vector.load %arg6[%c1_180, %c0_181, %c0_182] : memref<2x32x32xf32, #tpu.memory_space<vmem>>, vector<1x32x32xf32>
    %296 = vector.shape_cast %295 : vector<1x32x32xf32> to vector<32x32xf32>
    %cst_183 = arith.constant dense<0.000000e+00> : vector<16x32xf32>
    %297 = tpu.matmul %288, %296, %cst_183 {dimension_numbers = #tpu.dot_dimension_numbers<[1], [0], [0], [1], [0, 0, 1, 1], [], []>} : vector<16x32xf32>, vector<32x32xf32>, vector<16x32xf32> -> vector<16x32xf32>
    %298 = vector.broadcast %289 : vector<1x32xf32> to vector<16x32xf32>
    %299 = arith.addf %297, %298 : vector<16x32xf32>
    %300 = tpu.iota {dimensions = array<i32: 0>} : vector<32x16xi32>
    %301 = tpu.iota {dimensions = array<i32: 1>} : vector<32x16xi32>
    %c2_i32_184 = arith.constant 2 : i32
    %302 = vector.broadcast %c2_i32_184 : i32 to vector<32x16xi32>
    %303 = arith.muli %302, %301 : vector<32x16xi32>
    %c0_i32_185 = arith.constant 0 : i32
    %304 = vector.broadcast %c0_i32_185 : i32 to vector<32x16xi32>
    %305 = arith.addi %303, %304 : vector<32x16xi32>
    %306 = arith.cmpi eq, %300, %305 : vector<32x16xi32>
    %cst_186 = arith.constant 1.000000e+00 : f32
    %cst_187 = arith.constant 0.000000e+00 : f32
    %307 = vector.broadcast %cst_186 : f32 to vector<32x16xf32>
    %308 = vector.broadcast %cst_187 : f32 to vector<32x16xf32>
    %309 = arith.select %306, %307, %308 : vector<32x16xi1>, vector<32x16xf32>
    %cst_188 = arith.constant dense<0.000000e+00> : vector<32x32xf32>
    %310 = tpu.matmul %309, %294, %cst_188 {dimension_numbers = #tpu.dot_dimension_numbers<[1], [0], [0], [1], [0, 0, 1, 1], [], []>} : vector<32x16xf32>, vector<16x32xf32>, vector<32x32xf32> -> vector<32x32xf32>
    %311 = tpu.iota {dimensions = array<i32: 0>} : vector<32x16xi32>
    %312 = tpu.iota {dimensions = array<i32: 1>} : vector<32x16xi32>
    %c2_i32_189 = arith.constant 2 : i32
    %313 = vector.broadcast %c2_i32_189 : i32 to vector<32x16xi32>
    %314 = arith.muli %313, %312 : vector<32x16xi32>
    %c1_i32_190 = arith.constant 1 : i32
    %315 = vector.broadcast %c1_i32_190 : i32 to vector<32x16xi32>
    %316 = arith.addi %314, %315 : vector<32x16xi32>
    %317 = arith.cmpi eq, %311, %316 : vector<32x16xi32>
    %cst_191 = arith.constant 1.000000e+00 : f32
    %cst_192 = arith.constant 0.000000e+00 : f32
    %318 = vector.broadcast %cst_191 : f32 to vector<32x16xf32>
    %319 = vector.broadcast %cst_192 : f32 to vector<32x16xf32>
    %320 = arith.select %317, %318, %319 : vector<32x16xi1>, vector<32x16xf32>
    %cst_193 = arith.constant dense<0.000000e+00> : vector<32x32xf32>
    %321 = tpu.matmul %320, %299, %cst_193 {dimension_numbers = #tpu.dot_dimension_numbers<[1], [0], [0], [1], [0, 0, 1, 1], [], []>} : vector<32x16xf32>, vector<16x32xf32>, vector<32x32xf32> -> vector<32x32xf32>
    %322 = arith.addf %310, %321 : vector<32x32xf32>
    %323 = tpu.iota {dimensions = array<i32: 0>} : vector<32x32xi32>
    %324 = tpu.iota {dimensions = array<i32: 1>} : vector<32x32xi32>
    %c-1_i32_194 = arith.constant -1 : i32
    %325 = vector.broadcast %c-1_i32_194 : i32 to vector<32x32xi32>
    %326 = arith.addi %323, %325 : vector<32x32xi32>
    %327 = arith.cmpi eq, %324, %326 : vector<32x32xi32>
    %cst_195 = arith.constant 1.000000e+00 : f32
    %cst_196 = arith.constant 0.000000e+00 : f32
    %328 = vector.broadcast %cst_195 : f32 to vector<32x32xf32>
    %329 = vector.broadcast %cst_196 : f32 to vector<32x32xf32>
    %330 = arith.select %327, %328, %329 : vector<32x32xi1>, vector<32x32xf32>
    %331 = tpu.iota {dimensions = array<i32: 0>} : vector<32x32xi32>
    %332 = tpu.iota {dimensions = array<i32: 1>} : vector<32x32xi32>
    %c1_i32_197 = arith.constant 1 : i32
    %333 = vector.broadcast %c1_i32_197 : i32 to vector<32x32xi32>
    %334 = arith.addi %331, %333 : vector<32x32xi32>
    %335 = arith.cmpi eq, %332, %334 : vector<32x32xi32>
    %cst_198 = arith.constant 1.000000e+00 : f32
    %cst_199 = arith.constant 0.000000e+00 : f32
    %336 = vector.broadcast %cst_198 : f32 to vector<32x32xf32>
    %337 = vector.broadcast %cst_199 : f32 to vector<32x32xf32>
    %338 = arith.select %335, %336, %337 : vector<32x32xi1>, vector<32x32xf32>
    %cst_200 = arith.constant dense<0.000000e+00> : vector<32x32xf32>
    %339 = tpu.matmul %330, %322, %cst_200 {dimension_numbers = #tpu.dot_dimension_numbers<[1], [0], [0], [1], [0, 0, 1, 1], [], []>} : vector<32x32xf32>, vector<32x32xf32>, vector<32x32xf32> -> vector<32x32xf32>
    %c0_201 = arith.constant 0 : index
    %c0_202 = arith.constant 0 : index
    %c0_203 = arith.constant 0 : index
    %340 = vector.load %arg11[%c0_201, %c0_202, %c0_203] : memref<3x32x32xf32, #tpu.memory_space<vmem>>, vector<1x32x32xf32>
    %341 = vector.shape_cast %340 : vector<1x32x32xf32> to vector<32x32xf32>
    %cst_204 = arith.constant dense<0.000000e+00> : vector<32x32xf32>
    %342 = tpu.matmul %339, %341, %cst_204 {dimension_numbers = #tpu.dot_dimension_numbers<[1], [0], [0], [1], [0, 0, 1, 1], [], []>} : vector<32x32xf32>, vector<32x32xf32>, vector<32x32xf32> -> vector<32x32xf32>
    %c1_205 = arith.constant 1 : index
    %c0_206 = arith.constant 0 : index
    %c0_207 = arith.constant 0 : index
    %343 = vector.load %arg11[%c1_205, %c0_206, %c0_207] : memref<3x32x32xf32, #tpu.memory_space<vmem>>, vector<1x32x32xf32>
    %344 = vector.shape_cast %343 : vector<1x32x32xf32> to vector<32x32xf32>
    %cst_208 = arith.constant dense<0.000000e+00> : vector<32x32xf32>
    %345 = tpu.matmul %322, %344, %cst_208 {dimension_numbers = #tpu.dot_dimension_numbers<[1], [0], [0], [1], [0, 0, 1, 1], [], []>} : vector<32x32xf32>, vector<32x32xf32>, vector<32x32xf32> -> vector<32x32xf32>
    %346 = arith.addf %342, %345 : vector<32x32xf32>
    %cst_209 = arith.constant dense<0.000000e+00> : vector<32x32xf32>
    %347 = tpu.matmul %338, %322, %cst_209 {dimension_numbers = #tpu.dot_dimension_numbers<[1], [0], [0], [1], [0, 0, 1, 1], [], []>} : vector<32x32xf32>, vector<32x32xf32>, vector<32x32xf32> -> vector<32x32xf32>
    %c2_210 = arith.constant 2 : index
    %c0_211 = arith.constant 0 : index
    %c0_212 = arith.constant 0 : index
    %348 = vector.load %arg11[%c2_210, %c0_211, %c0_212] : memref<3x32x32xf32, #tpu.memory_space<vmem>>, vector<1x32x32xf32>
    %349 = vector.shape_cast %348 : vector<1x32x32xf32> to vector<32x32xf32>
    %cst_213 = arith.constant dense<0.000000e+00> : vector<32x32xf32>
    %350 = tpu.matmul %347, %349, %cst_213 {dimension_numbers = #tpu.dot_dimension_numbers<[1], [0], [0], [1], [0, 0, 1, 1], [], []>} : vector<32x32xf32>, vector<32x32xf32>, vector<32x32xf32> -> vector<32x32xf32>
    %351 = arith.addf %346, %350 : vector<32x32xf32>
    %cst_214 = arith.constant dense<0.000000e+00> : vector<32x32xf32>
    %352 = tpu.matmul %330, %90, %cst_214 {dimension_numbers = #tpu.dot_dimension_numbers<[1], [0], [0], [1], [0, 0, 1, 1], [], []>} : vector<32x32xf32>, vector<32x32xf32>, vector<32x32xf32> -> vector<32x32xf32>
    %c0_215 = arith.constant 0 : index
    %c0_216 = arith.constant 0 : index
    %c0_217 = arith.constant 0 : index
    %353 = vector.load %arg12[%c0_215, %c0_216, %c0_217] : memref<3x32x32xf32, #tpu.memory_space<vmem>>, vector<1x32x32xf32>
    %354 = vector.shape_cast %353 : vector<1x32x32xf32> to vector<32x32xf32>
    %cst_218 = arith.constant dense<0.000000e+00> : vector<32x32xf32>
    %355 = tpu.matmul %352, %354, %cst_218 {dimension_numbers = #tpu.dot_dimension_numbers<[1], [0], [0], [1], [0, 0, 1, 1], [], []>} : vector<32x32xf32>, vector<32x32xf32>, vector<32x32xf32> -> vector<32x32xf32>
    %356 = arith.addf %351, %355 : vector<32x32xf32>
    %c1_219 = arith.constant 1 : index
    %c0_220 = arith.constant 0 : index
    %c0_221 = arith.constant 0 : index
    %357 = vector.load %arg12[%c1_219, %c0_220, %c0_221] : memref<3x32x32xf32, #tpu.memory_space<vmem>>, vector<1x32x32xf32>
    %358 = vector.shape_cast %357 : vector<1x32x32xf32> to vector<32x32xf32>
    %cst_222 = arith.constant dense<0.000000e+00> : vector<32x32xf32>
    %359 = tpu.matmul %90, %358, %cst_222 {dimension_numbers = #tpu.dot_dimension_numbers<[1], [0], [0], [1], [0, 0, 1, 1], [], []>} : vector<32x32xf32>, vector<32x32xf32>, vector<32x32xf32> -> vector<32x32xf32>
    %360 = arith.addf %356, %359 : vector<32x32xf32>
    %cst_223 = arith.constant dense<0.000000e+00> : vector<32x32xf32>
    %361 = tpu.matmul %338, %90, %cst_223 {dimension_numbers = #tpu.dot_dimension_numbers<[1], [0], [0], [1], [0, 0, 1, 1], [], []>} : vector<32x32xf32>, vector<32x32xf32>, vector<32x32xf32> -> vector<32x32xf32>
    %c2_224 = arith.constant 2 : index
    %c0_225 = arith.constant 0 : index
    %c0_226 = arith.constant 0 : index
    %362 = vector.load %arg12[%c2_224, %c0_225, %c0_226] : memref<3x32x32xf32, #tpu.memory_space<vmem>>, vector<1x32x32xf32>
    %363 = vector.shape_cast %362 : vector<1x32x32xf32> to vector<32x32xf32>
    %cst_227 = arith.constant dense<0.000000e+00> : vector<32x32xf32>
    %364 = tpu.matmul %361, %363, %cst_227 {dimension_numbers = #tpu.dot_dimension_numbers<[1], [0], [0], [1], [0, 0, 1, 1], [], []>} : vector<32x32xf32>, vector<32x32xf32>, vector<32x32xf32> -> vector<32x32xf32>
    %365 = arith.addf %360, %364 : vector<32x32xf32>
    %c0_228 = arith.constant 0 : index
    %c0_229 = arith.constant 0 : index
    %366 = vector.load %arg13[%c0_228, %c0_229] : memref<1x32xf32, #tpu.memory_space<vmem>>, vector<1x32xf32>
    %367 = vector.broadcast %366 : vector<1x32xf32> to vector<32x32xf32>
    %368 = arith.addf %365, %367 : vector<32x32xf32>
    %cst_230 = arith.constant 0.000000e+00 : f32
    %369 = vector.broadcast %cst_230 : f32 to vector<32x32xf32>
    %370 = arith.maximumf %368, %369 : vector<32x32xf32>
    %c0_231 = arith.constant 0 : index
    %c0_232 = arith.constant 0 : index
    %371 = vector.load %arg7[%c0_231, %c0_232] : memref<1x32xf32, #tpu.memory_space<vmem>>, vector<1x32xf32>
    %c0_233 = arith.constant 0 : index
    %c0_234 = arith.constant 0 : index
    %c0_235 = arith.constant 0 : index
    %372 = vector.load %arg6[%c0_233, %c0_234, %c0_235] : memref<2x32x32xf32, #tpu.memory_space<vmem>>, vector<1x32x32xf32>
    %373 = vector.shape_cast %372 : vector<1x32x32xf32> to vector<32x32xf32>
    %cst_236 = arith.constant dense<0.000000e+00> : vector<32x32xf32>
    %374 = tpu.matmul %370, %373, %cst_236 {dimension_numbers = #tpu.dot_dimension_numbers<[1], [0], [0], [1], [0, 0, 1, 1], [], []>} : vector<32x32xf32>, vector<32x32xf32>, vector<32x32xf32> -> vector<32x32xf32>
    %375 = vector.broadcast %371 : vector<1x32xf32> to vector<32x32xf32>
    %376 = arith.addf %374, %375 : vector<32x32xf32>
    %c1_237 = arith.constant 1 : index
    %c0_238 = arith.constant 0 : index
    %c0_239 = arith.constant 0 : index
    %377 = vector.load %arg6[%c1_237, %c0_238, %c0_239] : memref<2x32x32xf32, #tpu.memory_space<vmem>>, vector<1x32x32xf32>
    %378 = vector.shape_cast %377 : vector<1x32x32xf32> to vector<32x32xf32>
    %cst_240 = arith.constant dense<0.000000e+00> : vector<32x32xf32>
    %379 = tpu.matmul %370, %378, %cst_240 {dimension_numbers = #tpu.dot_dimension_numbers<[1], [0], [0], [1], [0, 0, 1, 1], [], []>} : vector<32x32xf32>, vector<32x32xf32>, vector<32x32xf32> -> vector<32x32xf32>
    %380 = vector.broadcast %371 : vector<1x32xf32> to vector<32x32xf32>
    %381 = arith.addf %379, %380 : vector<32x32xf32>
    %382 = tpu.iota {dimensions = array<i32: 0>} : vector<64x32xi32>
    %383 = tpu.iota {dimensions = array<i32: 1>} : vector<64x32xi32>
    %c2_i32_241 = arith.constant 2 : i32
    %384 = vector.broadcast %c2_i32_241 : i32 to vector<64x32xi32>
    %385 = arith.muli %384, %383 : vector<64x32xi32>
    %c0_i32_242 = arith.constant 0 : i32
    %386 = vector.broadcast %c0_i32_242 : i32 to vector<64x32xi32>
    %387 = arith.addi %385, %386 : vector<64x32xi32>
    %388 = arith.cmpi eq, %382, %387 : vector<64x32xi32>
    %cst_243 = arith.constant 1.000000e+00 : f32
    %cst_244 = arith.constant 0.000000e+00 : f32
    %389 = vector.broadcast %cst_243 : f32 to vector<64x32xf32>
    %390 = vector.broadcast %cst_244 : f32 to vector<64x32xf32>
    %391 = arith.select %388, %389, %390 : vector<64x32xi1>, vector<64x32xf32>
    %cst_245 = arith.constant dense<0.000000e+00> : vector<64x32xf32>
    %392 = tpu.matmul %391, %376, %cst_245 {dimension_numbers = #tpu.dot_dimension_numbers<[1], [0], [0], [1], [0, 0, 1, 1], [], []>} : vector<64x32xf32>, vector<32x32xf32>, vector<64x32xf32> -> vector<64x32xf32>
    %393 = tpu.iota {dimensions = array<i32: 0>} : vector<64x32xi32>
    %394 = tpu.iota {dimensions = array<i32: 1>} : vector<64x32xi32>
    %c2_i32_246 = arith.constant 2 : i32
    %395 = vector.broadcast %c2_i32_246 : i32 to vector<64x32xi32>
    %396 = arith.muli %395, %394 : vector<64x32xi32>
    %c1_i32_247 = arith.constant 1 : i32
    %397 = vector.broadcast %c1_i32_247 : i32 to vector<64x32xi32>
    %398 = arith.addi %396, %397 : vector<64x32xi32>
    %399 = arith.cmpi eq, %393, %398 : vector<64x32xi32>
    %cst_248 = arith.constant 1.000000e+00 : f32
    %cst_249 = arith.constant 0.000000e+00 : f32
    %400 = vector.broadcast %cst_248 : f32 to vector<64x32xf32>
    %401 = vector.broadcast %cst_249 : f32 to vector<64x32xf32>
    %402 = arith.select %399, %400, %401 : vector<64x32xi1>, vector<64x32xf32>
    %cst_250 = arith.constant dense<0.000000e+00> : vector<64x32xf32>
    %403 = tpu.matmul %402, %381, %cst_250 {dimension_numbers = #tpu.dot_dimension_numbers<[1], [0], [0], [1], [0, 0, 1, 1], [], []>} : vector<64x32xf32>, vector<32x32xf32>, vector<64x32xf32> -> vector<64x32xf32>
    %404 = arith.addf %392, %403 : vector<64x32xf32>
    %405 = tpu.iota {dimensions = array<i32: 0>} : vector<64x64xi32>
    %406 = tpu.iota {dimensions = array<i32: 1>} : vector<64x64xi32>
    %c-1_i32_251 = arith.constant -1 : i32
    %407 = vector.broadcast %c-1_i32_251 : i32 to vector<64x64xi32>
    %408 = arith.addi %405, %407 : vector<64x64xi32>
    %409 = arith.cmpi eq, %406, %408 : vector<64x64xi32>
    %cst_252 = arith.constant 1.000000e+00 : f32
    %cst_253 = arith.constant 0.000000e+00 : f32
    %410 = vector.broadcast %cst_252 : f32 to vector<64x64xf32>
    %411 = vector.broadcast %cst_253 : f32 to vector<64x64xf32>
    %412 = arith.select %409, %410, %411 : vector<64x64xi1>, vector<64x64xf32>
    %413 = tpu.iota {dimensions = array<i32: 0>} : vector<64x64xi32>
    %414 = tpu.iota {dimensions = array<i32: 1>} : vector<64x64xi32>
    %c1_i32_254 = arith.constant 1 : i32
    %415 = vector.broadcast %c1_i32_254 : i32 to vector<64x64xi32>
    %416 = arith.addi %413, %415 : vector<64x64xi32>
    %417 = arith.cmpi eq, %414, %416 : vector<64x64xi32>
    %cst_255 = arith.constant 1.000000e+00 : f32
    %cst_256 = arith.constant 0.000000e+00 : f32
    %418 = vector.broadcast %cst_255 : f32 to vector<64x64xf32>
    %419 = vector.broadcast %cst_256 : f32 to vector<64x64xf32>
    %420 = arith.select %417, %418, %419 : vector<64x64xi1>, vector<64x64xf32>
    %cst_257 = arith.constant dense<0.000000e+00> : vector<64x32xf32>
    %421 = tpu.matmul %412, %404, %cst_257 {dimension_numbers = #tpu.dot_dimension_numbers<[1], [0], [0], [1], [0, 0, 1, 1], [], []>} : vector<64x64xf32>, vector<64x32xf32>, vector<64x32xf32> -> vector<64x32xf32>
    %c0_258 = arith.constant 0 : index
    %c0_259 = arith.constant 0 : index
    %c0_260 = arith.constant 0 : index
    %422 = vector.load %arg14[%c0_258, %c0_259, %c0_260] : memref<3x32x32xf32, #tpu.memory_space<vmem>>, vector<1x32x32xf32>
    %423 = vector.shape_cast %422 : vector<1x32x32xf32> to vector<32x32xf32>
    %cst_261 = arith.constant dense<0.000000e+00> : vector<64x32xf32>
    %424 = tpu.matmul %421, %423, %cst_261 {dimension_numbers = #tpu.dot_dimension_numbers<[1], [0], [0], [1], [0, 0, 1, 1], [], []>} : vector<64x32xf32>, vector<32x32xf32>, vector<64x32xf32> -> vector<64x32xf32>
    %c1_262 = arith.constant 1 : index
    %c0_263 = arith.constant 0 : index
    %c0_264 = arith.constant 0 : index
    %425 = vector.load %arg14[%c1_262, %c0_263, %c0_264] : memref<3x32x32xf32, #tpu.memory_space<vmem>>, vector<1x32x32xf32>
    %426 = vector.shape_cast %425 : vector<1x32x32xf32> to vector<32x32xf32>
    %cst_265 = arith.constant dense<0.000000e+00> : vector<64x32xf32>
    %427 = tpu.matmul %404, %426, %cst_265 {dimension_numbers = #tpu.dot_dimension_numbers<[1], [0], [0], [1], [0, 0, 1, 1], [], []>} : vector<64x32xf32>, vector<32x32xf32>, vector<64x32xf32> -> vector<64x32xf32>
    %428 = arith.addf %424, %427 : vector<64x32xf32>
    %cst_266 = arith.constant dense<0.000000e+00> : vector<64x32xf32>
    %429 = tpu.matmul %420, %404, %cst_266 {dimension_numbers = #tpu.dot_dimension_numbers<[1], [0], [0], [1], [0, 0, 1, 1], [], []>} : vector<64x64xf32>, vector<64x32xf32>, vector<64x32xf32> -> vector<64x32xf32>
    %c2_267 = arith.constant 2 : index
    %c0_268 = arith.constant 0 : index
    %c0_269 = arith.constant 0 : index
    %430 = vector.load %arg14[%c2_267, %c0_268, %c0_269] : memref<3x32x32xf32, #tpu.memory_space<vmem>>, vector<1x32x32xf32>
    %431 = vector.shape_cast %430 : vector<1x32x32xf32> to vector<32x32xf32>
    %cst_270 = arith.constant dense<0.000000e+00> : vector<64x32xf32>
    %432 = tpu.matmul %429, %431, %cst_270 {dimension_numbers = #tpu.dot_dimension_numbers<[1], [0], [0], [1], [0, 0, 1, 1], [], []>} : vector<64x32xf32>, vector<32x32xf32>, vector<64x32xf32> -> vector<64x32xf32>
    %433 = arith.addf %428, %432 : vector<64x32xf32>
    %cst_271 = arith.constant dense<0.000000e+00> : vector<64x32xf32>
    %434 = tpu.matmul %412, %33, %cst_271 {dimension_numbers = #tpu.dot_dimension_numbers<[1], [0], [0], [1], [0, 0, 1, 1], [], []>} : vector<64x64xf32>, vector<64x32xf32>, vector<64x32xf32> -> vector<64x32xf32>
    %c0_272 = arith.constant 0 : index
    %c0_273 = arith.constant 0 : index
    %c0_274 = arith.constant 0 : index
    %435 = vector.load %arg15[%c0_272, %c0_273, %c0_274] : memref<3x32x32xf32, #tpu.memory_space<vmem>>, vector<1x32x32xf32>
    %436 = vector.shape_cast %435 : vector<1x32x32xf32> to vector<32x32xf32>
    %cst_275 = arith.constant dense<0.000000e+00> : vector<64x32xf32>
    %437 = tpu.matmul %434, %436, %cst_275 {dimension_numbers = #tpu.dot_dimension_numbers<[1], [0], [0], [1], [0, 0, 1, 1], [], []>} : vector<64x32xf32>, vector<32x32xf32>, vector<64x32xf32> -> vector<64x32xf32>
    %438 = arith.addf %433, %437 : vector<64x32xf32>
    %c1_276 = arith.constant 1 : index
    %c0_277 = arith.constant 0 : index
    %c0_278 = arith.constant 0 : index
    %439 = vector.load %arg15[%c1_276, %c0_277, %c0_278] : memref<3x32x32xf32, #tpu.memory_space<vmem>>, vector<1x32x32xf32>
    %440 = vector.shape_cast %439 : vector<1x32x32xf32> to vector<32x32xf32>
    %cst_279 = arith.constant dense<0.000000e+00> : vector<64x32xf32>
    %441 = tpu.matmul %33, %440, %cst_279 {dimension_numbers = #tpu.dot_dimension_numbers<[1], [0], [0], [1], [0, 0, 1, 1], [], []>} : vector<64x32xf32>, vector<32x32xf32>, vector<64x32xf32> -> vector<64x32xf32>
    %442 = arith.addf %438, %441 : vector<64x32xf32>
    %cst_280 = arith.constant dense<0.000000e+00> : vector<64x32xf32>
    %443 = tpu.matmul %420, %33, %cst_280 {dimension_numbers = #tpu.dot_dimension_numbers<[1], [0], [0], [1], [0, 0, 1, 1], [], []>} : vector<64x64xf32>, vector<64x32xf32>, vector<64x32xf32> -> vector<64x32xf32>
    %c2_281 = arith.constant 2 : index
    %c0_282 = arith.constant 0 : index
    %c0_283 = arith.constant 0 : index
    %444 = vector.load %arg15[%c2_281, %c0_282, %c0_283] : memref<3x32x32xf32, #tpu.memory_space<vmem>>, vector<1x32x32xf32>
    %445 = vector.shape_cast %444 : vector<1x32x32xf32> to vector<32x32xf32>
    %cst_284 = arith.constant dense<0.000000e+00> : vector<64x32xf32>
    %446 = tpu.matmul %443, %445, %cst_284 {dimension_numbers = #tpu.dot_dimension_numbers<[1], [0], [0], [1], [0, 0, 1, 1], [], []>} : vector<64x32xf32>, vector<32x32xf32>, vector<64x32xf32> -> vector<64x32xf32>
    %447 = arith.addf %442, %446 : vector<64x32xf32>
    %c0_285 = arith.constant 0 : index
    %c0_286 = arith.constant 0 : index
    %448 = vector.load %arg16[%c0_285, %c0_286] : memref<1x32xf32, #tpu.memory_space<vmem>>, vector<1x32xf32>
    %449 = vector.broadcast %448 : vector<1x32xf32> to vector<64x32xf32>
    %450 = arith.addf %447, %449 : vector<64x32xf32>
    %cst_287 = arith.constant 0.000000e+00 : f32
    %451 = vector.broadcast %cst_287 : f32 to vector<64x32xf32>
    %452 = arith.maximumf %450, %451 : vector<64x32xf32>
    %c0_288 = arith.constant 0 : index
    %c0_289 = arith.constant 0 : index
    %c0_290 = arith.constant 0 : index
    %453 = vector.load %arg17[%c0_288, %c0_289, %c0_290] : memref<1x64x32xf32, #tpu.memory_space<vmem>>, vector<1x64x32xf32>
    %454 = vector.shape_cast %453 : vector<1x64x32xf32> to vector<64x32xf32>
    %455 = vector.shape_cast %452 : vector<64x32xf32> to vector<1x64x32xf32>
    tpu.vector_store %arg17[%c0_288, %c0_289, %c0_290], %455 {strides = array<i32>} : memref<1x64x32xf32, #tpu.memory_space<vmem>>, vector<1x64x32xf32>,
    return
  }
  func.func @transform_0(%arg0: i32) -> (i32, i32, i32) {
    %c0_i32 = arith.constant 0 : i32
    %c0_i32_0 = arith.constant 0 : i32
    %c0_i32_1 = arith.constant 0 : i32
    return %arg0, %c0_i32, %c0_i32_0 : i32, i32, i32
  }
  func.func @transform_1(%arg0: i32) -> (i32, i32, i32) {
    %c0_i32 = arith.constant 0 : i32
    %c0_i32_0 = arith.constant 0 : i32
    %c0_i32_1 = arith.constant 0 : i32
    %c0_i32_2 = arith.constant 0 : i32
    return %c0_i32, %c0_i32_0, %c0_i32_1 : i32, i32, i32
  }
  func.func @transform_2(%arg0: i32) -> (i32, i32) {
    %c0_i32 = arith.constant 0 : i32
    %c0_i32_0 = arith.constant 0 : i32
    %c0_i32_1 = arith.constant 0 : i32
    return %c0_i32, %c0_i32_0 : i32, i32
  }
  func.func @transform_3(%arg0: i32) -> (i32, i32, i32) {
    %c0_i32 = arith.constant 0 : i32
    %c0_i32_0 = arith.constant 0 : i32
    %c0_i32_1 = arith.constant 0 : i32
    %c0_i32_2 = arith.constant 0 : i32
    return %c0_i32, %c0_i32_0, %c0_i32_1 : i32, i32, i32
  }
  func.func @transform_4(%arg0: i32) -> (i32, i32) {
    %c0_i32 = arith.constant 0 : i32
    %c0_i32_0 = arith.constant 0 : i32
    %c0_i32_1 = arith.constant 0 : i32
    return %c0_i32, %c0_i32_0 : i32, i32
  }
  func.func @transform_5(%arg0: i32) -> (i32, i32, i32) {
    %c0_i32 = arith.constant 0 : i32
    %c0_i32_0 = arith.constant 0 : i32
    %c0_i32_1 = arith.constant 0 : i32
    %c0_i32_2 = arith.constant 0 : i32
    return %c0_i32, %c0_i32_0, %c0_i32_1 : i32, i32, i32
  }
  func.func @transform_6(%arg0: i32) -> (i32, i32) {
    %c0_i32 = arith.constant 0 : i32
    %c0_i32_0 = arith.constant 0 : i32
    %c0_i32_1 = arith.constant 0 : i32
    return %c0_i32, %c0_i32_0 : i32, i32
  }
  func.func @transform_7(%arg0: i32) -> (i32, i32, i32) {
    %c0_i32 = arith.constant 0 : i32
    %c0_i32_0 = arith.constant 0 : i32
    %c0_i32_1 = arith.constant 0 : i32
    %c0_i32_2 = arith.constant 0 : i32
    return %c0_i32, %c0_i32_0, %c0_i32_1 : i32, i32, i32
  }
  func.func @transform_8(%arg0: i32) -> (i32, i32, i32) {
    %c0_i32 = arith.constant 0 : i32
    %c0_i32_0 = arith.constant 0 : i32
    %c0_i32_1 = arith.constant 0 : i32
    %c0_i32_2 = arith.constant 0 : i32
    return %c0_i32, %c0_i32_0, %c0_i32_1 : i32, i32, i32
  }
  func.func @transform_9(%arg0: i32) -> (i32, i32) {
    %c0_i32 = arith.constant 0 : i32
    %c0_i32_0 = arith.constant 0 : i32
    %c0_i32_1 = arith.constant 0 : i32
    return %c0_i32, %c0_i32_0 : i32, i32
  }
  func.func @transform_10(%arg0: i32) -> (i32, i32, i32) {
    %c0_i32 = arith.constant 0 : i32
    %c0_i32_0 = arith.constant 0 : i32
    %c0_i32_1 = arith.constant 0 : i32
    %c0_i32_2 = arith.constant 0 : i32
    return %c0_i32, %c0_i32_0, %c0_i32_1 : i32, i32, i32
  }
  func.func @transform_11(%arg0: i32) -> (i32, i32, i32) {
    %c0_i32 = arith.constant 0 : i32
    %c0_i32_0 = arith.constant 0 : i32
    %c0_i32_1 = arith.constant 0 : i32
    %c0_i32_2 = arith.constant 0 : i32
    return %c0_i32, %c0_i32_0, %c0_i32_1 : i32, i32, i32
  }
  func.func @transform_12(%arg0: i32) -> (i32, i32) {
    %c0_i32 = arith.constant 0 : i32
    %c0_i32_0 = arith.constant 0 : i32
    %c0_i32_1 = arith.constant 0 : i32
    return %c0_i32, %c0_i32_0 : i32, i32
  }
  func.func @transform_13(%arg0: i32) -> (i32, i32, i32) {
    %c0_i32 = arith.constant 0 : i32
    %c0_i32_0 = arith.constant 0 : i32
    %c0_i32_1 = arith.constant 0 : i32
    %c0_i32_2 = arith.constant 0 : i32
    return %c0_i32, %c0_i32_0, %c0_i32_1 : i32, i32, i32
  }
  func.func @transform_14(%arg0: i32) -> (i32, i32, i32) {
    %c0_i32 = arith.constant 0 : i32
    %c0_i32_0 = arith.constant 0 : i32
    %c0_i32_1 = arith.constant 0 : i32
    %c0_i32_2 = arith.constant 0 : i32
    return %c0_i32, %c0_i32_0, %c0_i32_1 : i32, i32, i32
  }
  func.func @transform_15(%arg0: i32) -> (i32, i32) {
    %c0_i32 = arith.constant 0 : i32
    %c0_i32_0 = arith.constant 0 : i32
    %c0_i32_1 = arith.constant 0 : i32
    return %c0_i32, %c0_i32_0 : i32, i32
  }
  func.func @transform_16(%arg0: i32) -> (i32, i32, i32) {
    %c0_i32 = arith.constant 0 : i32
    %c0_i32_0 = arith.constant 0 : i32
    %c0_i32_1 = arith.constant 0 : i32
    return %arg0, %c0_i32, %c0_i32_0 : i32, i32, i32
  }
}

</mosaic_0001>

<bundles_post_ra>
// kernel: tpu_custom_call.1
= control target key start
LH: loop header
LB: loop body
LE: loop exit
PB: predicated region body
PF: predicated region fallthrough
CT: control target
= control target key end

     0   :  { %s5693_s0 = inlined_call_operand.vmem [shape: f32[2,64,32], index: 0, kind: input, shape index: {}]   ;;  %s5694_s1 = inlined_call_operand.vmem [shape: f32[3,32,32], index: 1, kind: input, shape index: {}]   ;;  %s5695_s2 = inlined_call_operand.hbm [shape: f32[1,32], index: 2, kind: input, shape index: {}]   ;;  %s5696_s3 = inlined_call_operand.vmem [shape: f32[3,32,32], index: 3, kind: input, shape index: {}]   ;;  %s5697_s4 = inlined_call_operand.vmem [shape: f32[1,32], index: 4, kind: input, shape index: {}]   ;;  %s5698_s5 = inlined_call_operand.hbm [shape: f32[2,32,32], index: 5, kind: input, shape index: {}]   ;;  %s5699_s6 = inlined_call_operand.vmem [shape: f32[1,32], index: 6, kind: input, shape index: {}]   ;;  %s5700_s7 = inlined_call_operand.hbm [shape: f32[3,32,32], index: 7, kind: input, shape index: {}]   ;;  %s5701_s8 = inlined_call_operand.hbm [shape: f32[3,32,32], index: 8, kind: input, shape index: {}]   ;;  %s5702_s9 = inlined_call_operand.vmem [shape: f32[1,32], index: 9, kind: input, shape index: {}]   ;;  %s5703_s10 = inlined_call_operand.hbm [shape: f32[3,32,32], index: 10, kind: input, shape index: {}]   ;;  %s5704_s11 = inlined_call_operand.hbm [shape: f32[3,32,32], index: 11, kind: input, shape index: {}]   ;;  %s5705_s12 = inlined_call_operand.vmem [shape: f32[1,32], index: 12, kind: input, shape index: {}]   ;;  %s5706_s13 = inlined_call_operand.hbm [shape: f32[3,32,32], index: 13, kind: input, shape index: {}]   ;;  %s5707_s14 = inlined_call_operand.hbm [shape: f32[3,32,32], index: 14, kind: input, shape index: {}]   ;;  %s5708_s15 = inlined_call_operand.vmem [shape: f32[1,32], index: 15, kind: input, shape index: {}]   ;;  %s5709_s16 = inlined_call_operand.vmem [shape: f32[2,64,32], index: 16, kind: output, shape index: {}]  }
   0x1   :  { %5732 = sst [smem:[#allocation30_spill]] %s5693_s0 }
   0x2   :  { %5733 = sst [smem:[#allocation31_spill]] %s5695_s2 }
   0x3   :  { %5734 = sst [smem:[#allocation32_spill]] %s5698_s5 }
   0x4   :  { %5735 = sst [smem:[#allocation33_spill]] %s5701_s8 }
   0x5   :  { %5736 = sst [smem:[#allocation34_spill]] %s5704_s11 }
   0x6   :  { %21 = vsyncpa [#allocation3], 0 }
   0x7   :  { %22 = vsyncpa [#allocation5], 0 }
   0x8   :  { %23 = vsyncpa [#allocation8], 0 }
   0x9   :  { %24 = vsyncpa [#allocation11], 0 }
   0xa   :  { %25 = vsyncpa [#allocation14], 0  ;;  %s4556_s21 = smov 0  }
   0xb LB: > { %s5737_s5 = sld [smem:[#allocation32_spill]]  ;;  %s4565_s25 = sadd.s32 4294967295, %s4458_s21   ;;  %s4458_s21 = sphi %s4556_s21, %s31_s21  }
   0xc   : > { %p3768_p0 = scmp.ge.s32.totalorder %s4458_s21, 1  ;;  %p403_p1 = scmp.lt.s32.totalorder %s4458_s21, 3 }
   0xd   : > { %p4151_p2 = scmp.eq.s32.totalorder %s4565_s25, 0  ;;  %s4460_s27 = smov [#allocation4]  }
   0xe   : > { %p4570_p3 = pnand %p3768_p0, %p403_p1  ;;  %s437_s28 = sshll.u32 %s4460_s27, 4  ;;  %s438_s28 = int_to_ptr.vmem [resolvable:$true] %s437_s28 }
   0xf   : > { %s5739_s8 = sld [smem:[#allocation33_spill]]  ;;  %s4461_s18 = smov [#allocation7]  }
  0x10   : > { %p4126_p4 = pneg %p4570_p3  ;;  %s468_s19 = sshll.u32 %s4461_s18, 4  ;;  %s469_s19 = int_to_ptr.vmem [resolvable:$true] %s468_s19 }
  0x11   : > { %s435_s24 = sshll.u32 %s5737_s5, 4  ;;  %s5741_s11 = sld [smem:[#allocation34_spill]]  ;;  %s436_s24 = int_to_ptr.hbm [resolvable:$true] %s435_s24 }
  0x12   : > { %p4581_p5 = pnand %p4151_p2, %p4126_p4  ;;  %s4462_s27 = smov 128  }
  0x13   : > { %s4463_s29 = smov 8   ;;  %s4464_s30 = smov [#allocation10]  }
  0x14   : > { %4132 = dma.hbm_to_vmem [thread:$0]  (!%p4581_p5), %s436_s24, 1024, %s438_s28, [#allocation5], %s4462_s27, %s4462_s27, %s4463_s29  }
  0x15   : > { %s466_s0 = sshll.u32 %s5739_s8, 4  ;;  %s499_s18 = sshll.u32 %s4464_s30, 4  ;;  %s467_s0 = int_to_ptr.hbm [resolvable:$true] %s466_s0  ;;  %s500_s18 = int_to_ptr.vmem [resolvable:$true] %s499_s18 }
  0x16   : > { %4138 = dma.hbm_to_vmem [thread:$0]  (!%p4581_p5), %s467_s0, 1536, %s469_s19, [#allocation8], %s4462_s27, %s4462_s27, %s4463_s29  }
  0x17   : > { %s497_s23 = sshll.u32 %s5741_s11, 4  ;;  %s5742_s2 = sld [smem:[#allocation31_spill]]  ;;  %s498_s23 = int_to_ptr.hbm [resolvable:$true] %s497_s23 }
  0x18   : > { %4144 = dma.hbm_to_vmem [thread:$0]  (!%p4581_p5), %s498_s23, 1536, %s500_s18, [#allocation11], %s4462_s27, %s4462_s27, %s4463_s29  }
  0x19   : > { %s452_s8 = sshll.u32 %s5700_s7, 4  ;;  %s4465_s0 = smov [#allocation2]   ;;  %s453_s8 = int_to_ptr.hbm [resolvable:$true] %s452_s8 }
  0x1a   : > { %s420_s19 = sshll.u32 %s4465_s0, 4  ;;  %s4466_s5 = smov [#allocation6]   ;;  %s421_s19 = int_to_ptr.vmem [resolvable:$true] %s420_s19 }
  0x1b   : > { %s454_s30 = sshll.u32 %s4466_s5, 4  ;;  %s483_s11 = sshll.u32 %s5703_s10, 4  ;;  %s455_s30 = int_to_ptr.vmem [resolvable:$true] %s454_s30  ;;  %s484_s11 = int_to_ptr.hbm [resolvable:$true] %s483_s11 }
  0x1c   : > { %4135 = dma.hbm_to_vmem [thread:$0]  (!%p4581_p5), %s453_s8, 1536, %s455_s30, [#allocation5], %s4462_s27, %s4462_s27, %s4463_s29  }
  0x1d   : > { %s418_s22 = sshll.u32 %s5742_s2, 4  ;;  %s514_s24 = sshll.u32 %s5706_s13, 4  ;;  %s419_s22 = int_to_ptr.hbm [resolvable:$true] %s418_s22  ;;  %s515_s24 = int_to_ptr.hbm [resolvable:$true] %s514_s24 }
  0x1e   : > { %4129 = dma.hbm_to_vmem [thread:$0]  (!%p4581_p5), %s419_s22, 16, %s421_s19, [#allocation3]  }
  0x1f   : > { %s4467_s22 = smov [#allocation9]   ;;  %s4468_s2 = smov [#allocation12]  }
  0x20   : > { %s485_s28 = sshll.u32 %s4467_s22, 4  ;;  %s516_s0 = sshll.u32 %s4468_s2, 4  ;;  %s486_s28 = int_to_ptr.vmem [resolvable:$true] %s485_s28  ;;  %s517_s0 = int_to_ptr.vmem [resolvable:$true] %s516_s0 }
  0x21   : > { %4141 = dma.hbm_to_vmem [thread:$0]  (!%p4581_p5), %s484_s11, 1536, %s486_s28, [#allocation8], %s4462_s27, %s4462_s27, %s4463_s29  }
  0x22   : > { %s528_s8 = sshll.u32 %s5707_s14, 4  ;;  %s4469_s30 = smov [#allocation13]   ;;  %s529_s8 = int_to_ptr.hbm [resolvable:$true] %s528_s8 }
  0x23   : > { %4147 = dma.hbm_to_vmem [thread:$0]  (!%p4581_p5), %s515_s24, 1536, %s517_s0, [#allocation11], %s4462_s27, %s4462_s27, %s4463_s29  }
  0x24   : > { %s530_s20 = sshll.u32 %s4469_s30, 4  ;;  %557 = sbr.rel (%p4570_p3) target bundleno = 4022 (0xfb6), region = 84  ;;  %s531_s20 = int_to_ptr.vmem [resolvable:$true] %s530_s20 }
  0x25   : > { %4150 = dma.hbm_to_vmem [thread:$0]  (!%p4581_p5), %s529_s8, 1536, %s531_s20, [#allocation14], %s4462_s27, %s4462_s27, %s4463_s29  }
  0x29   : > { %4437 = dma.done.wait (%p4151_p2), [#allocation3], 16  }
  0x2a   : > { %4439 = vsyncadd (%p4151_p2), [#allocation3], 4294967280 }
  0x2b   : > { %4441 = dma.done.wait (%p4151_p2), [#allocation5], 2560  }
  0x2c   : > { %4443 = vsyncadd (%p4151_p2), [#allocation5], 4294964736 }
  0x2d   : > { %4445 = dma.done.wait (%p4151_p2), [#allocation8], 3072  }
  0x2e   : > { %4447 = vsyncadd (%p4151_p2), [#allocation8], 4294964224 }
  0x2f   : > { %4449 = dma.done.wait (%p4151_p2), [#allocation11], 3072  }
  0x30   : > { %4451 = vsyncadd (%p4151_p2), [#allocation11], 4294964224 }
  0x31   : > { %4453 = dma.done.wait (%p4151_p2), [#allocation14], 1536  }
  0x32   : > { %4455 = vsyncadd (%p4151_p2), [#allocation14], 4294965760  ;;  %p643_p6 = scmp.lt.s32.totalorder %s4565_s25, 1  ;;  %s5743_s27 = sld [smem:[#allocation30_spill]]  ;;  %v661_v0 = vlaneseq  ;;  %v5710_v14 = vmov 0.0   ;;  %vm696_vm2 = vcmask 523264  }
  0x33   : > { %v4777_v34 = vld [vmem:[%s5694_s1 + $0x38] sm:$0xff]  ;;  %v4782_v35 = vld [vmem:[%s5694_s1 + $0x30] sm:$0xff]  ;;  %v4793_v37 = vld [vmem:[%s5694_s1 + $0x28] sm:$0xff]  ;;  %vm860_vm11 = vcmask 261120  }
  0x34   : > { %s5766_s25 = smov (!%p643_p6, %s4565_s25), 1  ;;  %v4680_v4 = vshrl.u32 %v661_v0, 7  ;;  %v4690_v7 = vand.u32 127, %v661_v0  ;;  %897 = vmatpush.msra.mxu2 %v4777_v34  ;;  %v4799_v38 = vld [vmem:[%s5694_s1 + $0x20] sm:$0xff]  ;;  %v4857_v53 = vld [vmem:[%s5694_s1 + $0x58] sm:$0xff]  ;;  %v4883_v57 = vld [vmem:[%s5694_s1 + $0x10] sm:$0xff] }
  0x35   : > { %s4080_s11 = sshll.u32 %s5766_s25, 6  ;;  %v4862_v54 = vld [vmem:[%s5694_s1 + $0x18] sm:$0xff]  ;;  %v4888_v58 = vld [vmem:[%s5694_s1 + $0x8] sm:$0xff]  ;;  %v4893_v59 = vld [vmem:[%s5694_s1 + $0x50] sm:$0xff] }
  0x36   : > { %v672_v8 = vadd.s32 4294967295, %v4680_v4  ;;  %v762_v9 = vadd.s32 1, %v4680_v4  ;;  %v4705_v12 = vadd.s32 8, %v4680_v4  ;;  %v4726_v19 = vadd.s32 16, %v4680_v4  ;;  %898 = vmatpush.msra.mxu2 %v4782_v35  ;;  %962 = vmatpush.msra.mxu3 %v4862_v54  ;;  %v4909_v60 = vld [vmem:[%s5694_s1] sm:$0xff]  ;;  %v4914_v61 = vld [vmem:[%s5694_s1 + $0x48] sm:$0xff]  ;;  %s5652_s26 = scalar_lea.vmem %s5709_s16, %s4080_s11 }
  0x37   : > { %v4743_v24 = vadd.s32 24, %v4680_v4  ;;  %v4760_v29 = vadd.s32 32, %v4680_v4  ;;  %v4788_v36 = vadd.s32 40, %v4680_v4  ;;  %v4819_v43 = vadd.s32 48, %v4680_v4  ;;  %v4921_v62 = vld [vmem:[%s5694_s1 + $0x40] sm:$0xff] }
  0x38   : > { %s647_s29 = scalar_lea.vmem %s5743_s27, %s4080_s11  ;;  %vm680_vm0 = vcmp.eq.s32.totalorder %v4690_v7, %v672_v8  ;;  %vm770_vm1 = vcmp.eq.s32.totalorder %v4690_v7, %v762_v9  ;;  %v673_v17 = vadd.s32 4294967295, %v4705_v12  ;;  %v763_v18 = vadd.s32 1, %v4705_v12  ;;  %899 = vmatpush.msra.mxu2 %v4793_v37  ;;  %963 = vmatpush.msra.mxu3 %v4883_v57 }
  0x39   : > { %v4672_v1 = vld [vmem:[%s647_s29 + $0x38] sm:$0xff]  ;;  %v4674_v2 = vld [vmem:[%s647_s29 + $0x30] sm:$0xff]  ;;  %v4678_v3 = vld [vmem:[%s647_s29 + $0x28] sm:$0xff]  ;;  %v4712_v15 = vsel %vm680_vm0, 1.0, %v5710_v14  ;;  %v4715_v16 = vsel %vm770_vm1, 1.0, %v5710_v14  ;;  %v674_v22 = vadd.s32 4294967295, %v4726_v19 }
  0x3a   : > { %729 = vmatpush.msra.mxu0 %v4672_v1  ;;  %818 = vmatpush.msra.mxu1 %v4672_v1  ;;  %v4684_v5 = vld [vmem:[%s647_s29 + $0x20] sm:$0xff]  ;;  %v4688_v6 = vld [vmem:[%s647_s29 + $0x18] sm:$0xff]  ;;  %v4696_v10 = vld [vmem:[%s647_s29 + $0x10] sm:$0xff]  ;;  %vm681_vm3 = vcmp.eq.s32.totalorder %v4690_v7, %v673_v17  ;;  %vm771_vm4 = vcmp.eq.s32.totalorder %v4690_v7, %v763_v18  ;;  %v764_v23 = vadd.s32 1, %v4726_v19  ;;  %v675_v27 = vadd.s32 4294967295, %v4743_v24  ;;  %5746 = vst [vmem:[#allocation22_spill] sm:$0xff] %v4819_v43 }
  0x3b   : > { %v4700_v11 = vld [vmem:[%s647_s29 + $0x8] sm:$0xff]  ;;  %v653_v13 = vld [vmem:[%s647_s29] sm:$0xff]  ;;  %v4729_v20 = vsel %vm681_vm3, 1.0, %v5710_v14  ;;  %v4732_v21 = vsel %vm771_vm4, 1.0, %v5710_v14  ;;  %vm682_vm5 = vcmp.eq.s32.totalorder %v4690_v7, %v674_v22  ;;  %v765_v28 = vadd.s32 1, %v4743_v24  ;;  %900 = vmatpush.msra.mxu2 %v4799_v38  ;;  %964 = vmatpush.msra.mxu3 %v4888_v58 }
  0x3c   : > { %730 = vmatpush.msra.mxu0 %v4674_v2  ;;  %819 = vmatpush.msra.mxu1 %v4674_v2  ;;  %vm772_vm6 = vcmp.eq.s32.totalorder %v4690_v7, %v764_v23  ;;  %v4746_v25 = vsel %vm682_vm5, 1.0, %v5710_v14  ;;  %vm683_vm7 = vcmp.eq.s32.totalorder %v4690_v7, %v675_v27  ;;  %v676_v32 = vadd.s32 4294967295, %v4760_v29 }
  0x3d   : > { %v4749_v26 = vsel %vm772_vm6, 1.0, %v5710_v14  ;;  %vm773_vm8 = vcmp.eq.s32.totalorder %v4690_v7, %v765_v28  ;;  %v4763_v30 = vsel %vm683_vm7, 1.0, %v5710_v14  ;;  %v766_v33 = vadd.s32 1, %v4760_v29  ;;  %3811 = vmatmul.msk.f32.vlgmr.msra.gmra.mxu2 %vm860_vm11, %v653_v13  ;;  %965 = vmatpush.msra.mxu3 %v4909_v60 }
  0x3e   : > { %731 = vmatpush.msra.mxu0 %v4678_v3  ;;  %820 = vmatpush.msra.mxu1 %v4678_v3  ;;  %v4766_v31 = vsel %vm773_vm8, 1.0, %v5710_v14  ;;  %vm684_vm9 = vcmp.eq.s32.totalorder %v4690_v7, %v676_v32  ;;  %v677_v41 = vadd.s32 4294967295, %v4788_v36  ;;  %v767_v42 = vadd.s32 1, %v4788_v36 }
  0x3f   : > { %vm774_vm10 = vcmp.eq.s32.totalorder %v4690_v7, %v766_v33  ;;  %v4802_v39 = vsel %vm684_vm9, 1.0, %v5710_v14  ;;  %v678_v46 = vadd.s32 4294967295, %v4819_v43  ;;  %v768_v47 = vadd.s32 1, %v4819_v43  ;;  %1032 = vmatpush.msrb.mxu2 %v4857_v53 }
  0x40   : > { %732 = vmatpush.msra.mxu0 %v4684_v5  ;;  %821 = vmatpush.msra.mxu1 %v4684_v5  ;;  %5744 = vst [vmem:[#allocation20_spill] sm:$0xff] %v4802_v39  ;;  %v4805_v40 = vsel %vm774_vm10, 1.0, %v5710_v14  ;;  %vm685_vm12 = vcmp.eq.s32.totalorder %v4690_v7, %v677_v41  ;;  %vm775_vm13 = vcmp.eq.s32.totalorder %v4690_v7, %v767_v42  ;;  %v4838_v48 = vadd.s32 56, %v4680_v4 }
  0x41   : > { %5745 = vst [vmem:[#allocation21_spill] sm:$0xff] %v4805_v40  ;;  %v4822_v44 = vsel %vm685_vm12, 1.0, %v5710_v14  ;;  %v4825_v45 = vsel %vm775_vm13, 1.0, %v5710_v14  ;;  %vm686_vm14 = vcmp.eq.s32.totalorder %v4690_v7, %v678_v46  ;;  %vm776_vm15 = vcmp.eq.s32.totalorder %v4690_v7, %v768_v47  ;;  %1033 = vmatpush.msrb.mxu2 %v4893_v59 }
  0x42   : > { %733 = vmatpush.msra.mxu0 %v4688_v6  ;;  %822 = vmatpush.msra.mxu1 %v4688_v6  ;;  %5747 = vst [vmem:[#allocation23_spill] sm:$0xff] %v4822_v44  ;;  %v4841_v49 = vsel %vm686_vm14, 1.0, %v5710_v14  ;;  %v4844_v50 = vsel %vm776_vm15, 1.0, %v5710_v14  ;;  %v679_v51 = vadd.s32 4294967295, %v4838_v48  ;;  %v769_v52 = vadd.s32 1, %v4838_v48 }
  0x43   : > { %5748 = vst [vmem:[#allocation24_spill] sm:$0xff] %v4825_v45  ;;  %1034 = vmatpush.msrb.mxu2 %v4914_v61  ;;  %vm1464_vm12 = vcmask 130048   ;;  %vm1657_vm13 = vcmask 64512  }
  0x44   : > { %734 = vmatpush.msra.mxu0 %v4696_v10  ;;  %823 = vmatpush.msra.mxu1 %v4696_v10  ;;  %5749 = vst [vmem:[#allocation25_spill] sm:$0xff] %v4838_v48  ;;  %vm687_vm0 = vcmp.eq.s32.totalorder %v4690_v7, %v679_v51  ;;  %vm777_vm1 = vcmp.eq.s32.totalorder %v4690_v7, %v769_v52 }
  0x45   : > { %3812 = vmatmul.msk.f32.gmra.mxu2 %vm860_vm11, %v4700_v11  ;;  %5750 = vst [vmem:[#allocation26_spill] sm:$0xff] %v4841_v49  ;;  %v4869_v55 = vsel %vm687_vm0, 1.0, %v5710_v14  ;;  %v4872_v56 = vsel %vm777_vm1, 1.0, %v5710_v14 }
  0x46   : > { %735 = vmatpush.msra.mxu0 %v4700_v11  ;;  %824 = vmatpush.msra.mxu1 %v4700_v11  ;;  %5751 = vst [vmem:[#allocation27_spill] sm:$0xff] %v4844_v50 }
  0x47   : > { %5752 = vst [vmem:[#allocation28_spill] sm:$0xff] %v4869_v55  ;;  %1035 = vmatpush.msrb.mxu2 %v4921_v62 }
  0x48   : > { %736 = vmatpush.msra.mxu0 %v653_v13  ;;  %825 = vmatpush.msra.mxu1 %v653_v13  ;;  %5753 = vst [vmem:[#allocation29_spill] sm:$0xff] %v4872_v56 }
  0x49   : > { %3791 = vmatmul.msk.f32.vlgmr.msra.gmra.mxu0 %vm696_vm2, %v4712_v15  ;;  %3799 = vmatmul.msk.f32.vlgmr.msra.gmra.mxu1 %vm696_vm2, %v4715_v16 }
  0x4a   : > { %1379 = vmatpush.msra.mxu2 %v4857_v53 }
  0x4c   : > { %1380 = vmatpush.msra.mxu2 %v4893_v59 }
  0x4d   : > { %3813 = vmatmul.msk.f32.gmra.mxu2 %vm860_vm11, %v4696_v10 }
  0x4e   : > { %1381 = vmatpush.msra.mxu2 %v4914_v61 }
  0x50   : > { %1382 = vmatpush.msra.mxu2 %v4921_v62 }
  0x51   : > { %3792 = vmatmul.msk.f32.gmra.mxu0 %vm696_vm2, %v4729_v20  ;;  %3800 = vmatmul.msk.f32.gmra.mxu1 %vm696_vm2, %v4732_v21 }
  0x55   : > { %3814 = vmatmul.msk.f32.gmra.mxu2 %vm860_vm11, %v4688_v6 }
  0x59   : > { %3793 = vmatmul.msk.f32.gmra.mxu0 %vm696_vm2, %v4746_v25  ;;  %3801 = vmatmul.msk.f32.gmra.mxu1 %vm696_vm2, %v4749_v26 }
  0x5d   : > { %3815 = vmatmul.msk.f32.gmra.mxu2 %vm860_vm11, %v4684_v5 }
  0x61   : > { %3794 = vmatmul.msk.f32.gmra.mxu0 %vm696_vm2, %v4763_v30  ;;  %3802 = vmatmul.msk.f32.gmra.mxu1 %vm696_vm2, %v4766_v31 }
  0x65   : > { %3816 = vmatmul.msk.f32.gmra.mxu2 %vm860_vm11, %v4678_v3 }
  0x69   : > { %3795 = vmatmul.msk.f32.gmra.mxu0 %vm696_vm2, %v4802_v39  ;;  %3803 = vmatmul.msk.f32.gmra.mxu1 %vm696_vm2, %v4805_v40 }
  0x6d   : > { %3817 = vmatmul.msk.f32.gmra.mxu2 %vm860_vm11, %v4674_v2 }
  0x71   : > { %3796 = vmatmul.msk.f32.gmra.mxu0 %vm696_vm2, %v4822_v44  ;;  %3804 = vmatmul.msk.f32.gmra.mxu1 %vm696_vm2, %v4825_v45 }
  0x75   : > { %3818 = vmatmul.msk.f32.gmra.mxu2 %vm860_vm11, %v4672_v1 }
  0x79   : > { %3797 = vmatmul.msk.f32.gmra.mxu0 %vm696_vm2, %v4841_v49  ;;  %3805 = vmatmul.msk.f32.gmra.mxu1 %vm696_vm2, %v4844_v50  ;;  %v4944_v50 = vld [vmem:[#allocation2] ss:$0 sm:$0xff] }
  0x81   : > { %3798 = vmatmul.msk.f32.gmra.mxu0 %vm696_vm2, %v4869_v55  ;;  %3806 = vmatmul.msk.f32.gmra.mxu1 %vm696_vm2, %v4872_v56 }
  0xc0   : > { %v902_v22 = vpop.f32.mrf.mxu2 }
  0xc6   : > { %v738_v63 = vpop.f32.mrf.mxu0  ;;  %v827_v0 = vpop.f32.mrf.mxu1 }
  0xc7   : > { %3819 = vmatmul.msk.f32.vlgmr.msra.gmra.mxu3 %vm860_vm11, %v738_v63  ;;  %3831 = vmatmul.msk.f32.vlgmr.msrb.gmra.mxu2 %vm860_vm11, %v827_v0 }
  0xc8   : > { %v905_v28 = vpop.f32.mrf.mxu2 }
  0xce   : > { %v741_v1 = vpop.f32.mrf.mxu0  ;;  %v830_v2 = vpop.f32.mrf.mxu1 }
  0xcf   : > { %3820 = vmatmul.msk.f32.gmra.mxu3 %vm860_vm11, %v741_v1  ;;  %3832 = vmatmul.msk.f32.gmra.mxu2 %vm860_vm11, %v830_v2 }
  0xd0   : > { %v908_v32 = vpop.f32.mrf.mxu2 }
  0xd6   : > { %v744_v3 = vpop.f32.mrf.mxu0  ;;  %v833_v5 = vpop.f32.mrf.mxu1 }
  0xd7   : > { %3821 = vmatmul.msk.f32.gmra.mxu3 %vm860_vm11, %v744_v3  ;;  %3833 = vmatmul.msk.f32.gmra.mxu2 %vm860_vm11, %v833_v5 }
  0xd8   : > { %v911_v33 = vpop.f32.mrf.mxu2 }
  0xde   : > { %v747_v6 = vpop.f32.mrf.mxu0  ;;  %v836_v8 = vpop.f32.mrf.mxu1 }
  0xdf   : > { %3822 = vmatmul.msk.f32.gmra.mxu3 %vm860_vm11, %v747_v6  ;;  %3834 = vmatmul.msk.f32.gmra.mxu2 %vm860_vm11, %v836_v8 }
  0xe0   : > { %v914_v41 = vpop.f32.mrf.mxu2 }
  0xe6   : > { %v750_v9 = vpop.f32.mrf.mxu0  ;;  %v839_v10 = vpop.f32.mrf.mxu1 }
  0xe7   : > { %3823 = vmatmul.msk.f32.gmra.mxu3 %vm860_vm11, %v750_v9  ;;  %3835 = vmatmul.msk.f32.gmra.mxu2 %vm860_vm11, %v839_v10 }
  0xe8   : > { %v917_v42 = vpop.f32.mrf.mxu2 }
  0xee   : > { %v753_v11 = vpop.f32.mrf.mxu0  ;;  %v842_v13 = vpop.f32.mrf.mxu1 }
  0xef   : > { %3824 = vmatmul.msk.f32.gmra.mxu3 %vm860_vm11, %v753_v11  ;;  %3836 = vmatmul.msk.f32.gmra.mxu2 %vm860_vm11, %v842_v13 }
  0xf0   : > { %v920_v46 = vpop.f32.mrf.mxu2 }
  0xf6   : > { %v756_v17 = vpop.f32.mrf.mxu0  ;;  %v845_v18 = vpop.f32.mrf.mxu1 }
  0xf7   : > { %3825 = vmatmul.msk.f32.gmra.mxu3 %vm860_vm11, %v756_v17  ;;  %3837 = vmatmul.msk.f32.gmra.mxu2 %vm860_vm11, %v845_v18 }
  0xf8   : > { %v923_v47 = vpop.f32.mrf.mxu2 }
  0xfe   : > { %v759_v23 = vpop.f32.mrf.mxu0  ;;  %v848_v27 = vpop.f32.mrf.mxu1 }
  0xff   : > { %3826 = vmatmul.msk.f32.gmra.mxu3 %vm860_vm11, %v759_v23  ;;  %3838 = vmatmul.msk.f32.gmra.mxu2 %vm860_vm11, %v848_v27 }
 0x14a   : > { %v967_v51 = vpop.f32.mrf.mxu3  ;;  %v1037_v52 = vpop.f32.mrf.mxu2 }
 0x152   : > { %v970_v63 = vpop.f32.mrf.mxu3  ;;  %v1040_v0 = vpop.f32.mrf.mxu2 }
 0x15a   : > { %v973_v1 = vpop.f32.mrf.mxu3  ;;  %v1043_v2 = vpop.f32.mrf.mxu2 }
 0x15b   : > { %v974_v40 = vadd.f32 %v973_v1, %v908_v32 }
 0x162   : > { %v976_v3 = vpop.f32.mrf.mxu3  ;;  %v1046_v5 = vpop.f32.mrf.mxu2 }
 0x163   : > { %v977_v49 = vadd.f32 %v976_v3, %v911_v33  ;;  %v5754_v3 = vmov 0.0  }
 0x16a   : > { %v979_v6 = vpop.f32.mrf.mxu3  ;;  %v1049_v8 = vpop.f32.mrf.mxu2 }
 0x16b   : > { %v980_v14 = vadd.f32 %v979_v6, %v914_v41  ;;  %v1063_v6 = vadd.f32 %v1043_v2, %v974_v40 }
 0x16d   : > { %v1065_v39 = vadd.f32 %v1049_v8, %v980_v14  ;;  %v4965_v40 = vadd.f32 %v4944_v50, %v1063_v6  ;;  %v1090_v8 = vmul.u32 2, %v4705_v12 }
 0x16f   : > { %v4957_v33 = vadd.f32 %v4944_v50, %v1065_v39  ;;  %vm1094_vm6 = vcmp.eq.s32.totalorder %v4690_v7, %v1090_v8 }
 0x171   : > { %v1085_v39 = vmax.f32 %v4957_v33, 0.0 }
 0x172   : > { %v982_v9 = vpop.f32.mrf.mxu3  ;;  %v1052_v10 = vpop.f32.mrf.mxu2 }
 0x173   : > { %v983_v18 = vadd.f32 %v982_v9, %v917_v42  ;;  %v1064_v42 = vadd.f32 %v1046_v5, %v977_v49 }
 0x175   : > { %v1066_v45 = vadd.f32 %v1052_v10, %v983_v18  ;;  %v1091_v18 = vmul.u32 2, %v4726_v19 }
 0x177   : > { %v4953_v9 = vadd.f32 %v4944_v50, %v1066_v45  ;;  %vm1095_vm8 = vcmp.eq.s32.totalorder %v4690_v7, %v1091_v18 }
 0x179   : > { %v1086_v45 = vmax.f32 %v4953_v9, 0.0 }
 0x17a   : > { %v985_v11 = vpop.f32.mrf.mxu3  ;;  %v1055_v13 = vpop.f32.mrf.mxu2 }
 0x17b   : > { %v986_v17 = vadd.f32 %v985_v11, %v920_v46  ;;  %v971_v46 = vadd.f32 %v970_v63, %v905_v28 }
 0x17d   : > { %v1067_v56 = vadd.f32 %v1055_v13, %v986_v17  ;;  %v1143_v13 = vadd.s32 1, %v1090_v8  ;;  %v5001_v17 = vsel %vm1094_vm6, 1.0, %v5754_v3 }
 0x17f   : > { %v4947_v48 = vadd.f32 %v4944_v50, %v1067_v56  ;;  %v1089_v56 = vmul.u32 2, %v4680_v4  ;;  %vm1147_vm7 = vcmp.eq.s32.totalorder %v4690_v7, %v1143_v13 }
 0x181   : > { %v1087_v14 = vmax.f32 %v4947_v48, 0.0  ;;  %vm1093_vm3 = vcmp.eq.s32.totalorder %v4690_v7, %v1089_v56 }
 0x182   : > { %v988_v23 = vpop.f32.mrf.mxu3  ;;  %v1058_v27 = vpop.f32.mrf.mxu2  ;;  %v4984_v5 = vsel %vm1093_vm3, 1.0, %v5754_v3 }
 0x183   : > { %v989_v55 = vadd.f32 %v988_v23, %v923_v47  ;;  %v968_v47 = vadd.f32 %v967_v51, %v902_v22  ;;  %v1092_v22 = vmul.u32 2, %v4743_v24  ;;  %v1142_v51 = vadd.s32 1, %v1089_v56 }
 0x184   : > { %v5005_v23 = vsel %vm1147_vm7, 1.0, %v5754_v3 }
 0x185   : > { %v1068_v44 = vadd.f32 %v1058_v27, %v989_v55  ;;  %v1062_v55 = vadd.f32 %v1040_v0, %v971_v46  ;;  %v1061_v49 = vadd.f32 %v1037_v52, %v968_v47  ;;  %v1145_v52 = vadd.s32 1, %v1092_v22 }
 0x186   : > { %v1083_v0 = vmax.f32 %v4965_v40, 0.0  ;;  %vm1146_vm4 = vcmp.eq.s32.totalorder %v4690_v7, %v1142_v51  ;;  %v1144_v27 = vadd.s32 1, %v1091_v18  ;;  %v1099_v46 = vsel %vm1095_vm8, 1.0, %v5754_v3 }
 0x187   : > { %v4950_v43 = vadd.f32 %v4944_v50, %v1068_v44  ;;  %v4961_v44 = vadd.f32 %v4944_v50, %v1064_v42  ;;  %v4971_v28 = vadd.f32 %v4944_v50, %v1062_v55  ;;  %v4975_v63 = vadd.f32 %v4944_v50, %v1061_v49 }
 0x188   : > { %vm1149_vm5 = vcmp.eq.s32.totalorder %v4690_v7, %v1145_v52  ;;  %v4988_v10 = vsel %vm1146_vm4, 1.0, %v5754_v3  ;;  %vm1148_vm9 = vcmp.eq.s32.totalorder %v4690_v7, %v1144_v27  ;;  %vm1096_vm10 = vcmp.eq.s32.totalorder %v4690_v7, %v1092_v22 }
 0x189   : > { %v1088_v41 = vmax.f32 %v4950_v43, 0.0  ;;  %v1084_v32 = vmax.f32 %v4961_v44, 0.0  ;;  %v1082_v1 = vmax.f32 %v4971_v28, 0.0  ;;  %v1081_v2 = vmax.f32 %v4975_v63, 0.0 }
 0x18a   : > { %v1153_v11 = vsel %vm1149_vm5, 1.0, %v5754_v3  ;;  %v1152_v42 = vsel %vm1148_vm9, 1.0, %v5754_v3 }
 0x18b   : > { %1121 = vmatpush.msrb.mxu3 %v1088_v41  ;;  %1174 = vmatpush.msrb.mxu0 %v1088_v41 }
 0x18c   : > { %4082 = vmatpush.msrb.mxu1 %v1088_v41  ;;  %v1100_v41 = vsel %vm1096_vm10, 1.0, %v5754_v3 }
 0x18d   : > { %1122 = vmatpush.msrb.mxu3 %v1087_v14  ;;  %1175 = vmatpush.msrb.mxu0 %v1087_v14 }
 0x18e   : > { %4083 = vmatpush.msrb.mxu1 %v1087_v14 }
 0x18f   : > { %1123 = vmatpush.msrb.mxu3 %v1086_v45  ;;  %1176 = vmatpush.msrb.mxu0 %v1086_v45 }
 0x190   : > { %4084 = vmatpush.msrb.mxu1 %v1086_v45 }
 0x191   : > { %1124 = vmatpush.msrb.mxu3 %v1085_v39  ;;  %1177 = vmatpush.msrb.mxu0 %v1085_v39 }
 0x192   : > { %4085 = vmatpush.msrb.mxu1 %v1085_v39 }
 0x193   : > { %1125 = vmatpush.msrb.mxu3 %v1084_v32  ;;  %1178 = vmatpush.msrb.mxu0 %v1084_v32 }
 0x194   : > { %4086 = vmatpush.msrb.mxu1 %v1084_v32 }
 0x195   : > { %1126 = vmatpush.msrb.mxu3 %v1083_v0  ;;  %1179 = vmatpush.msrb.mxu0 %v1083_v0 }
 0x196   : > { %4087 = vmatpush.msrb.mxu1 %v1083_v0 }
 0x197   : > { %1127 = vmatpush.msrb.mxu3 %v1082_v1  ;;  %1180 = vmatpush.msrb.mxu0 %v1082_v1 }
 0x198   : > { %4088 = vmatpush.msrb.mxu1 %v1082_v1 }
 0x199   : > { %1128 = vmatpush.msrb.mxu3 %v1081_v2  ;;  %1181 = vmatpush.msrb.mxu0 %v1081_v2 }
 0x19a   : > { %4089 = vmatpush.msrb.mxu1 %v1081_v2  ;;  %3839 = vmatmul.msk.f32.vlgmr.msrb.gmra.mxu3 %vm696_vm2, %v4984_v5 }
 0x19b   : > { %3843 = vmatmul.msk.f32.vlgmr.msrb.gmra.mxu0 %vm696_vm2, %v4988_v10  ;;  %3846 = vmatmul.msk.f32.vlgmr.msrb.gmra.mxu1 %vm696_vm2, %v1153_v11 }
 0x19c   : > { %1297 = vmatpush.msra.mxu0 %v4777_v34 }
 0x19e   : > { %1298 = vmatpush.msra.mxu0 %v4782_v35 }
 0x1a0   : > { %1299 = vmatpush.msra.mxu0 %v4793_v37 }
 0x1a2   : > { %3840 = vmatmul.msk.f32.gmra.mxu3 %vm696_vm2, %v5001_v17  ;;  %1300 = vmatpush.msra.mxu0 %v4799_v38 }
 0x1a3   : > { %3844 = vmatmul.msk.f32.gmra.mxu0 %vm696_vm2, %v5005_v23 }
 0x1aa   : > { %3841 = vmatmul.msk.f32.gmra.mxu3 %vm696_vm2, %v1099_v46 }
 0x1ab   : > { %3845 = vmatmul.msk.f32.gmra.mxu0 %vm696_vm2, %v1152_v42 }
 0x1b2   : > { %3842 = vmatmul.msk.f32.gmra.mxu3 %vm696_vm2, %v1100_v41 }
 0x218   : > { %v1183_v47 = vpop.f32.mrf.mxu0  ;;  %v1192_v22 = vpop.f32.mrf.mxu1 }
 0x21d   : > { %v1130_v6 = vpop.f32.mrf.mxu3 }
 0x21e   : > { %v1195_v14 = vmax.f32 %v1130_v6, %v1183_v47 }
 0x220   : > { %3855 = vmatmul.msk.f32.vlgmr.msra.gmra.mxu0 %vm860_vm11, %v1195_v14  ;;  %v1186_v55 = vpop.f32.mrf.mxu0 }
 0x225   : > { %v1133_v45 = vpop.f32.mrf.mxu3 }
 0x226   : > { %v1196_v49 = vmax.f32 %v1133_v45, %v1186_v55 }
 0x228   : > { %3856 = vmatmul.msk.f32.gmra.mxu0 %vm860_vm11, %v1196_v49  ;;  %v1189_v39 = vpop.f32.mrf.mxu0 }
 0x22d   : > { %v1136_v56 = vpop.f32.mrf.mxu3 }
 0x22e   : > { %v1197_v32 = vmax.f32 %v1136_v56, %v1189_v39 }
 0x230   : > { %3857 = vmatmul.msk.f32.gmra.mxu0 %vm860_vm11, %v1197_v32 }
 0x235   : > { %v1139_v51 = vpop.f32.mrf.mxu3 }
 0x236   : > { %v1198_v52 = vmax.f32 %v1139_v51, %v1192_v22 }
 0x238   : > { %1219 = vmatpush.msra.mxu1 %v1198_v52  ;;  %1256 = vmatpush.msra.mxu3 %v1198_v52 }
 0x239   : > { %3858 = vmatmul.msk.f32.gmra.mxu0 %vm860_vm11, %v1198_v52 }
 0x23a   : > { %1220 = vmatpush.msra.mxu1 %v1197_v32  ;;  %1257 = vmatpush.msra.mxu3 %v1197_v32 }
 0x23c   : > { %1221 = vmatpush.msra.mxu1 %v1196_v49  ;;  %1258 = vmatpush.msra.mxu3 %v1196_v49 }
 0x23e   : > { %1222 = vmatpush.msra.mxu1 %v1195_v14  ;;  %1259 = vmatpush.msra.mxu3 %v1195_v14 }
 0x23f   : > { %3847 = vmatmul.msk.f32.vlgmr.msra.gmra.mxu1 %vm860_vm11, %v4712_v15  ;;  %3851 = vmatmul.msk.f32.vlgmr.msra.gmra.mxu3 %vm860_vm11, %v4715_v16 }
 0x240   : > { %1338 = vmatpush.msrb.mxu1 %v4862_v54 }
 0x242   : > { %1339 = vmatpush.msrb.mxu1 %v4883_v57 }
 0x244   : > { %1340 = vmatpush.msrb.mxu1 %v4888_v58 }
 0x246   : > { %1341 = vmatpush.msrb.mxu1 %v4909_v60 }
 0x247   : > { %3848 = vmatmul.msk.f32.gmra.mxu1 %vm860_vm11, %v4729_v20  ;;  %3852 = vmatmul.msk.f32.gmra.mxu3 %vm860_vm11, %v4732_v21 }
 0x24f   : > { %3849 = vmatmul.msk.f32.gmra.mxu1 %vm860_vm11, %v4746_v25  ;;  %3853 = vmatmul.msk.f32.gmra.mxu3 %vm860_vm11, %v4749_v26 }
 0x257   : > { %3850 = vmatmul.msk.f32.gmra.mxu1 %vm860_vm11, %v4763_v30  ;;  %3854 = vmatmul.msk.f32.gmra.mxu3 %vm860_vm11, %v4766_v31 }
 0x29d   : > { %v1302_v42 = vpop.f32.mrf.mxu0 }
 0x2a5   : > { %v1305_v6 = vpop.f32.mrf.mxu0 }
 0x2ad   : > { %v1308_v45 = vpop.f32.mrf.mxu0 }
 0x2b6   : > { %v1311_v32 = vpop.f32.mrf.mxu0 }
 0x2bc   : > { %v1224_v0 = vpop.f32.mrf.mxu1 }
 0x2bd   : > { %3859 = vmatmul.msk.f32.vlgmr.msrb.gmra.mxu1 %vm860_vm11, %v1224_v0 }
 0x2c2   : > { %v1261_v1 = vpop.f32.mrf.mxu3 }
 0x2c3   : > { %3863 = vmatmul.msk.f32.vlgmr.msra.gmra.mxu2 %vm860_vm11, %v1261_v1 }
 0x2c4   : > { %v1227_v2 = vpop.f32.mrf.mxu1 }
 0x2c5   : > { %3860 = vmatmul.msk.f32.gmra.mxu1 %vm860_vm11, %v1227_v2 }
 0x2ca   : > { %v1264_v8 = vpop.f32.mrf.mxu3 }
 0x2cb   : > { %3864 = vmatmul.msk.f32.gmra.mxu2 %vm860_vm11, %v1264_v8 }
 0x2cc   : > { %v1230_v11 = vpop.f32.mrf.mxu1 }
 0x2cd   : > { %3861 = vmatmul.msk.f32.gmra.mxu1 %vm860_vm11, %v1230_v11 }
 0x2d2   : > { %v1267_v13 = vpop.f32.mrf.mxu3 }
 0x2d3   : > { %3865 = vmatmul.msk.f32.gmra.mxu2 %vm860_vm11, %v1267_v13 }
 0x2d4   : > { %v1233_v18 = vpop.f32.mrf.mxu1 }
 0x2d5   : > { %3862 = vmatmul.msk.f32.gmra.mxu1 %vm860_vm11, %v1233_v18 }
 0x2da   : > { %v1270_v27 = vpop.f32.mrf.mxu3 }
 0x2db   : > { %3866 = vmatmul.msk.f32.gmra.mxu2 %vm860_vm11, %v1270_v27 }
 0x33a   : > { %v1343_v46 = vpop.f32.mrf.mxu1 }
 0x33b   : > { %v1344_v1 = vadd.f32 %v1343_v46, %v1302_v42 }
 0x342   : > { %v1346_v41 = vpop.f32.mrf.mxu1 }
 0x343   : > { %v1347_v22 = vadd.f32 %v1346_v41, %v1305_v6 }
 0x346   : > { %v1384_v47 = vpop.f32.mrf.mxu2 }
 0x347   : > { %v1396_v11 = vadd.f32 %v1384_v47, %v1344_v1  ;;  %v3886_v1 = vld [vmem:[%s5696_s3 + $0x28] sm:$0xff] }
 0x349   : > { %v5065_v41 = vadd.f32 %v4944_v50, %v1396_v11 }
 0x34a   : > { %v1349_v55 = vpop.f32.mrf.mxu1 }
 0x34b   : > { %v1350_v56 = vadd.f32 %v1349_v55, %v1308_v45  ;;  %v1404_v47 = vmax.f32 %v5065_v41, 0.0 }
 0x34e   : > { %v1387_v14 = vpop.f32.mrf.mxu2 }
 0x34f   : > { %v1397_v2 = vadd.f32 %v1387_v14, %v1347_v22 }
 0x351   : > { %v5061_v27 = vadd.f32 %v4944_v50, %v1397_v2  ;;  %v3885_v2 = vld [vmem:[%s5696_s3 + $0x20] sm:$0xff] }
 0x352   : > { %v1352_v39 = vpop.f32.mrf.mxu1 }
 0x353   : > { %v1353_v51 = vadd.f32 %v1352_v39, %v1311_v32  ;;  %v1405_v42 = vmax.f32 %v5061_v27, 0.0 }
 0x356   : > { %v1390_v49 = vpop.f32.mrf.mxu2 }
 0x357   : > { %v1398_v52 = vadd.f32 %v1390_v49, %v1350_v56 }
 0x359   : > { %v5055_v13 = vadd.f32 %v4944_v50, %v1398_v52 }
 0x35b   : > { %v1406_v46 = vmax.f32 %v5055_v13, 0.0 }
 0x35e   : > { %v1393_v0 = vpop.f32.mrf.mxu2 }
 0x35f   : > { %v1399_v8 = vadd.f32 %v1393_v0, %v1353_v51  ;;  %v3888_v0 = vld [vmem:[%s5696_s3 + $0x38] sm:$0xff] }
 0x361   : > { %v5058_v18 = vadd.f32 %v4944_v50, %v1399_v8 }
 0x363   : > { %v1407_v55 = vmax.f32 %v5058_v18, 0.0 }
 0x365   : > { %1424 = vmatpush.msrb.mxu3 %v1407_v55  ;;  %1451 = vmatpush.msrb.mxu0 %v1407_v55 }
 0x366   : > { %4090 = vmatpush.msrb.mxu2 %v1407_v55  ;;  %v1704_v55 = vld [vmem:[%s5696_s3 + $0x10] sm:$0xff] }
 0x367   : > { %1425 = vmatpush.msrb.mxu3 %v1406_v46  ;;  %1452 = vmatpush.msrb.mxu0 %v1406_v46 }
 0x368   : > { %4091 = vmatpush.msrb.mxu2 %v1406_v46  ;;  %v1703_v46 = vld [vmem:[%s5696_s3 + $0x8] sm:$0xff] }
 0x369   : > { %1426 = vmatpush.msrb.mxu3 %v1405_v42  ;;  %1453 = vmatpush.msrb.mxu0 %v1405_v42 }
 0x36a   : > { %4092 = vmatpush.msrb.mxu2 %v1405_v42  ;;  %v1702_v42 = vld [vmem:[%s5696_s3] sm:$0xff] }
 0x36b   : > { %1427 = vmatpush.msrb.mxu3 %v1404_v47  ;;  %1454 = vmatpush.msrb.mxu0 %v1404_v47 }
 0x36c   : > { %4093 = vmatpush.msrb.mxu2 %v1404_v47  ;;  %3867 = vmatmul.msk.f32.vlgmr.msrb.gmra.mxu3 %vm860_vm11, %v4984_v5  ;;  %v3894_v47 = vld [vmem:[%s5696_s3 + $0x58] sm:$0xff] }
 0x36d   : > { %3869 = vmatmul.msk.f32.vlgmr.msrb.gmra.mxu0 %vm860_vm11, %v4988_v10  ;;  %3870 = vmatmul.msk.f32.vlgmr.msrb.gmra.mxu2 %vm860_vm11, %v5005_v23 }
 0x36e   : > { %1537 = vmatpush.msra.mxu0 %v4777_v34  ;;  %1595 = vmatpush.msra.mxu2 %v4857_v53 }
 0x370   : > { %1538 = vmatpush.msra.mxu0 %v4782_v35  ;;  %1596 = vmatpush.msra.mxu2 %v4893_v59 }
 0x372   : > { %1539 = vmatpush.msra.mxu0 %v4793_v37  ;;  %1597 = vmatpush.msra.mxu2 %v4914_v61 }
 0x374   : > { %3868 = vmatmul.msk.f32.gmra.mxu3 %vm860_vm11, %v5001_v17  ;;  %1540 = vmatpush.msra.mxu0 %v4799_v38 }
 0x375   : > { %1598 = vmatpush.msra.mxu2 %v4921_v62 }
 0x377   : > { %1777 = vmatpush.msrb.mxu2 %v3894_v47 }
 0x3ea   : > { %v1456_v23 = vpop.f32.mrf.mxu0 }
 0x3ef   : > { %v1429_v6 = vpop.f32.mrf.mxu3 }
 0x3f0   : > { %v1462_v34 = vmax.f32 %v1429_v6, %v1456_v23  ;;  %v1459_v53 = vpop.f32.mrf.mxu2  ;;  %v3893_v23 = vld [vmem:[%s5696_s3 + $0x50] sm:$0xff]  ;;  %v3892_v6 = vld [vmem:[%s5696_s3 + $0x48] sm:$0xff] }
 0x3f1   : > { %1778 = vmatpush.msrb.mxu2 %v3893_v23 }
 0x3f2   : > { %3875 = vmatmul.msk.f32.vlgmr.msra.gmra.mxu0 %vm860_vm11, %v1462_v34 }
 0x3f3   : > { %1779 = vmatpush.msrb.mxu2 %v3892_v6 }
 0x3f7   : > { %v1432_v35 = vpop.f32.mrf.mxu3 }
 0x3f8   : > { %v1463_v14 = vmax.f32 %v1432_v35, %v1459_v53 }
 0x3fa   : > { %1483 = vmatpush.msra.mxu1 %v1463_v14  ;;  %1510 = vmatpush.msra.mxu3 %v1463_v14 }
 0x3fb   : > { %3876 = vmatmul.msk.f32.gmra.mxu0 %vm860_vm11, %v1463_v14  ;;  %v5159_v14 = vld [vmem:[#allocation4 + $0x38] sm:$0xff] }
 0x3fc   : > { %1484 = vmatpush.msra.mxu1 %v1462_v34  ;;  %1511 = vmatpush.msra.mxu3 %v1462_v34  ;;  %v3891_v34 = vld [vmem:[%s5696_s3 + $0x40] sm:$0xff] }
 0x3fd   : > { %3871 = vmatmul.msk.f32.vlgmr.msra.gmra.mxu1 %vm1464_vm12, %v4712_v15  ;;  %3873 = vmatmul.msk.f32.vlgmr.msra.gmra.mxu3 %vm1464_vm12, %v4715_v16 }
 0x3fe   : > { %1566 = vmatpush.msrb.mxu1 %v4862_v54  ;;  %1780 = vmatpush.msrb.mxu2 %v3891_v34 }
 0x400   : > { %1567 = vmatpush.msrb.mxu1 %v4883_v57 }
 0x402   : > { %1568 = vmatpush.msrb.mxu1 %v4888_v58 }
 0x404   : > { %1569 = vmatpush.msrb.mxu1 %v4909_v60 }
 0x405   : > { %3872 = vmatmul.msk.f32.gmra.mxu1 %vm1464_vm12, %v4729_v20  ;;  %3874 = vmatmul.msk.f32.gmra.mxu3 %vm1464_vm12, %v4732_v21 }
 0x46f   : > { %v1542_v58 = vpop.f32.mrf.mxu0 }
 0x478   : > { %v1545_v17 = vpop.f32.mrf.mxu0 }
 0x47a   : > { %v1486_v37 = vpop.f32.mrf.mxu1 }
 0x47b   : > { %3877 = vmatmul.msk.f32.vlgmr.msrb.gmra.mxu1 %vm860_vm11, %v1486_v37  ;;  %v5161_v37 = vld [vmem:[#allocation4 + $0x30] sm:$0xff] }
 0x480   : > { %v1513_v38 = vpop.f32.mrf.mxu3 }
 0x481   : > { %3879 = vmatmul.msk.f32.vlgmr.msra.gmra.mxu2 %vm860_vm11, %v1513_v38  ;;  %v5164_v38 = vld [vmem:[#allocation4 + $0x28] sm:$0xff] }
 0x482   : > { %v1489_v59 = vpop.f32.mrf.mxu1 }
 0x483   : > { %3878 = vmatmul.msk.f32.gmra.mxu1 %vm860_vm11, %v1489_v59  ;;  %v5167_v59 = vld [vmem:[#allocation4 + $0x20] sm:$0xff] }
 0x488   : > { %v1516_v54 = vpop.f32.mrf.mxu3 }
 0x489   : > { %3880 = vmatmul.msk.f32.gmra.mxu2 %vm860_vm11, %v1516_v54  ;;  %v5171_v54 = vld [vmem:[#allocation4 + $0x18] sm:$0xff] }
 0x4f8   : > { %v1571_v57 = vpop.f32.mrf.mxu1 }
 0x4f9   : > { %v1572_v62 = vadd.f32 %v1571_v57, %v1542_v58  ;;  %v1947_v57 = vld [vmem:[#allocation6 + $0x38] sm:$0xff]  ;;  %v5174_v58 = vld [vmem:[#allocation4 + $0x10] sm:$0xff] }
 0x500   : > { %v1574_v61 = vpop.f32.mrf.mxu1 }
 0x501   : > { %v1575_v45 = vadd.f32 %v1574_v61, %v1545_v17  ;;  %v5177_v61 = vld [vmem:[#allocation4 + $0x8] sm:$0xff]  ;;  %v5180_v17 = vld [vmem:[#allocation4] sm:$0xff] }
 0x504   : > { %v1600_v60 = vpop.f32.mrf.mxu2 }
 0x505   : > { %v1606_v49 = vadd.f32 %v1600_v60, %v1572_v62  ;;  %v1946_v60 = vld [vmem:[#allocation6 + $0x30] sm:$0xff]  ;;  %v1945_v62 = vld [vmem:[#allocation6 + $0x28] sm:$0xff] }
 0x507   : > { %v5105_v32 = vadd.f32 %v4944_v50, %v1606_v49 }
 0x509   : > { %v1610_v52 = vmax.f32 %v5105_v32, 0.0 }
 0x50c   : > { %v1603_v39 = vpop.f32.mrf.mxu2 }
 0x50d   : > { %v1607_v56 = vadd.f32 %v1603_v39, %v1575_v45  ;;  %v1944_v45 = vld [vmem:[#allocation6 + $0x20] sm:$0xff] }
 0x50f   : > { %v5108_v22 = vadd.f32 %v4944_v50, %v1607_v56  ;;  %v3887_v50 = vld [vmem:[%s5696_s3 + $0x30] sm:$0xff] }
 0x511   : > { %v1611_v51 = vmax.f32 %v5108_v22, 0.0 }
 0x513   : > { %1628 = vmatpush.msrb.mxu3 %v1611_v51  ;;  %1650 = vmatpush.msrb.mxu0 %v1611_v51  ;;  %v4187_v51 = vld [vmem:[%s5697_s4] ss:$0 sm:$0xff] }
 0x515   : > { %1629 = vmatpush.msrb.mxu3 %v1610_v52  ;;  %1651 = vmatpush.msrb.mxu0 %v1610_v52 }
 0x516   : > { %3881 = vmatmul.msk.f32.vlgmr.msrb.gmra.mxu3 %vm1464_vm12, %v4984_v5  ;;  %3882 = vmatmul.msk.f32.vlgmr.msrb.gmra.mxu0 %vm1464_vm12, %v4988_v10  ;;  %v1705_v10 = vld [vmem:[%s5696_s3 + $0x18] sm:$0xff] }
 0x517   : > { %1726 = vmatpush.msra.mxu0 %v3888_v0 }
 0x519   : > { %1727 = vmatpush.msra.mxu0 %v3887_v50 }
 0x51b   : > { %1728 = vmatpush.msra.mxu0 %v3886_v1 }
 0x51d   : > { %1729 = vmatpush.msra.mxu0 %v3885_v2  ;;  %v5191_v2 = vmul.u32 2, %v4690_v7 }
 0x51f   : > { %1840 = vmatpush.msrb.mxu0 %v5159_v14  ;;  %vm1849_vm15 = vcmp.eq.s32.totalorder %v4680_v4, %v5191_v2  ;;  %vm1850_vm1 = vcmp.eq.s32.totalorder %v4705_v12, %v5191_v2  ;;  %vm2278_vm3 = vcmp.eq.s32.totalorder %v4726_v19, %v5191_v2  ;;  %vm2279_vm5 = vcmp.eq.s32.totalorder %v4743_v24, %v5191_v2 }
 0x520   : > { %vm2852_vm8 = vcmp.eq.s32.totalorder %v4760_v29, %v5191_v2  ;;  %vm2853_vm10 = vcmp.eq.s32.totalorder %v4788_v36, %v5191_v2 }
 0x521   : > { %1841 = vmatpush.msrb.mxu0 %v5161_v37 }
 0x523   : > { %1842 = vmatpush.msrb.mxu0 %v5164_v38 }
 0x525   : > { %1843 = vmatpush.msrb.mxu0 %v5167_v59 }
 0x593   : > { %v1653_v5 = vpop.f32.mrf.mxu0 }
 0x599   : > { %v1631_v8 = vpop.f32.mrf.mxu3 }
 0x59a   : > { %v1656_v11 = vmax.f32 %v1631_v8, %v1653_v5  ;;  %v5194_v5 = vadd.s32 1, %v5191_v2  ;;  %v5199_v8 = vld [vmem:[%s5699_s6] ss:$0 sm:$0xff] }
 0x59c   : > { %1675 = vmatpush.msra.mxu1 %v1656_v11  ;;  %1697 = vmatpush.msra.mxu3 %v1656_v11  ;;  %vm1854_vm14 = vcmp.eq.s32.totalorder %v4680_v4, %v5194_v5  ;;  %vm1855_vm0 = vcmp.eq.s32.totalorder %v4705_v12, %v5194_v5  ;;  %v5227_v4 = vsel %vm1850_vm1, 1.0, %v5754_v3  ;;  %v2033_v12 = vld [vmem:[#allocation6 + $0x58] sm:$0xff]  ;;  %vm2282_vm4 = vcmp.eq.s32.totalorder %v4726_v19, %v5194_v5 }
 0x59d   : > { %3889 = vmatmul.msk.f32.vlgmr.msra.gmra.mxu0 %vm860_vm11, %v1656_v11  ;;  %3883 = vmatmul.msk.f32.vlgmr.msra.gmra.mxu1 %vm1657_vm13, %v4712_v15  ;;  %v5218_v47 = vsel %vm1855_vm0, 1.0, %v5754_v3  ;;  %vm2283_vm6 = vcmp.eq.s32.totalorder %v4743_v24, %v5194_v5  ;;  %vm2860_vm7 = vcmp.eq.s32.totalorder %v4760_v29, %v5194_v5  ;;  %vm2861_vm9 = vcmp.eq.s32.totalorder %v4788_v36, %v5194_v5 }
 0x59e   : > { %3884 = vmatmul.msk.f32.vlgmr.msra.gmra.mxu3 %vm1657_vm13, %v4715_v16  ;;  %1749 = vmatpush.msrb.mxu1 %v1705_v10  ;;  %v5318_v19 = vsel %vm2283_vm6, 1.0, %v5754_v3  ;;  %v2857_v29 = vsel %vm2853_vm10, 1.0, %v5754_v3 }
 0x59f   : > { %1815 = vmatpush.msrb.mxu3 %v5171_v54  ;;  %1966 = vmatpush.msra.mxu0 %v1947_v57 }
 0x5a0   : > { %1750 = vmatpush.msrb.mxu1 %v1704_v55  ;;  %v5205_v55 = vsel %vm1854_vm14, 1.0, %v5754_v3 }
 0x5a1   : > { %1816 = vmatpush.msrb.mxu3 %v5174_v58  ;;  %1967 = vmatpush.msra.mxu0 %v1946_v60  ;;  %v2127_v60 = vld [vmem:[#allocation7 + $0x38] sm:$0xff] }
 0x5a2   : > { %1751 = vmatpush.msrb.mxu1 %v1703_v46 }
 0x5a3   : > { %1817 = vmatpush.msrb.mxu3 %v5177_v61  ;;  %1968 = vmatpush.msra.mxu0 %v1945_v62  ;;  %v2032_v62 = vld [vmem:[#allocation6 + $0x50] sm:$0xff] }
 0x5a4   : > { %1752 = vmatpush.msrb.mxu1 %v1702_v42  ;;  %v5215_v42 = vsel %vm1849_vm15, 1.0, %v5754_v3 }
 0x5a5   : > { %1818 = vmatpush.msrb.mxu3 %v5180_v17  ;;  %1969 = vmatpush.msra.mxu0 %v1944_v45  ;;  %v2126_v45 = vld [vmem:[#allocation7 + $0x30] sm:$0xff] }
 0x61a   : > { %v1677_v53 = vpop.f32.mrf.mxu1  ;;  %v1731_v39 = vpop.f32.mrf.mxu0 }
 0x61b   : > { %3890 = vmatmul.msk.f32.vlgmr.msrb.gmra.mxu1 %vm860_vm11, %v1677_v53 }
 0x621   : > { %v1699_v35 = vpop.f32.mrf.mxu3 }
 0x622   : > { %3895 = vmatmul.msk.f32.vlgmr.msrb.gmra.mxu2 %vm860_vm11, %v1699_v35 }
 0x698   : > { %v1754_v49 = vpop.f32.mrf.mxu1 }
 0x699   : > { %v1755_v56 = vadd.f32 %v1754_v49, %v1731_v39  ;;  %v2031_v49 = vld [vmem:[#allocation6 + $0x48] sm:$0xff] }
 0x69a   : > { %v2125_v39 = vld [vmem:[#allocation7 + $0x28] sm:$0xff] }
 0x6a5   : > { %v1782_v52 = vpop.f32.mrf.mxu2 }
 0x6a6   : > { %v1785_v0 = vadd.f32 %v1782_v52, %v1755_v56  ;;  %v2030_v56 = vld [vmem:[#allocation6 + $0x40] sm:$0xff]  ;;  %v1942_v52 = vld [vmem:[#allocation6 + $0x18] sm:$0xff] }
 0x6a8   : > { %v1790_v50 = vadd.f32 %v4187_v51, %v1785_v0  ;;  %v2124_v51 = vld [vmem:[#allocation7 + $0x20] sm:$0xff]  ;;  %v1941_v0 = vld [vmem:[#allocation6 + $0x10] sm:$0xff] }
 0x6aa   : > { %v1791_v1 = vmax.f32 %v1790_v50, 0.0  ;;  %v1940_v50 = vld [vmem:[#allocation6 + $0x8] sm:$0xff] }
 0x6ac   : > { %3896 = vmatmul.msk.f32.vlgmr.msrb.gmra.mxu3 %vm860_vm11, %v1791_v1  ;;  %3897 = vmatmul.msk.f32.vlgmr.msrb.gmra.mxu0 %vm860_vm11, %v1791_v1  ;;  %v1939_v1 = vld [vmem:[#allocation6] sm:$0xff] }
 0x6ad   : > { %2079 = vmatpush.msrb.mxu0 %v5108_v22 }
 0x6af   : > { %2080 = vmatpush.msrb.mxu0 %v5105_v32 }
 0x729   : > { %v1845_v11 = vpop.f32.mrf.mxu0 }
 0x72a   : > { %v1846_v10 = vadd.f32 %v5199_v8, %v1845_v11  ;;  %v2091_v11 = vld [vmem:[#allocation7 + $0x18] sm:$0xff] }
 0x72c   : > { %1879 = vmatpush.msra.mxu1 %v1846_v10  ;;  %v2090_v10 = vld [vmem:[#allocation7 + $0x10] sm:$0xff] }
 0x72d   : > { %3898 = vmatmul.msk.f32.vlgmr.msra.gmra.mxu1 %vm1657_vm13, %v5205_v55 }
 0x72e   : > { %1995 = vmatpush.msrb.mxu1 %v1942_v52  ;;  %v2401_v52 = vld [vmem:[#allocation9 + $0x38] sm:$0xff] }
 0x72f   : > { %v1820_v7 = vpop.f32.mrf.mxu3 }
 0x730   : > { %v1821_v46 = vadd.f32 %v5199_v8, %v1820_v7  ;;  %1996 = vmatpush.msrb.mxu1 %v1941_v0  ;;  %v2089_v7 = vld [vmem:[#allocation7 + $0x8] sm:$0xff]  ;;  %v2400_v0 = vld [vmem:[#allocation9 + $0x30] sm:$0xff] }
 0x732   : > { %1908 = vmatpush.msra.mxu2 %v1821_v46  ;;  %1997 = vmatpush.msrb.mxu1 %v1940_v50  ;;  %v2088_v46 = vld [vmem:[#allocation7] sm:$0xff] }
 0x733   : > { %3900 = vmatmul.msk.f32.vlgmr.msra.gmra.mxu2 %vm1657_vm13, %v5215_v42 }
 0x734   : > { %1998 = vmatpush.msrb.mxu1 %v1939_v1  ;;  %v2399_v1 = vld [vmem:[#allocation9 + $0x28] sm:$0xff] }
 0x735   : > { %3899 = vmatmul.msk.f32.gmra.mxu1 %vm1657_vm13, %v5218_v47 }
 0x736   : > { %2110 = vmatpush.msra.mxu1 %v2091_v11  ;;  %v2398_v11 = vld [vmem:[#allocation9 + $0x20] sm:$0xff] }
 0x738   : > { %2111 = vmatpush.msra.mxu1 %v2090_v10 }
 0x73a   : > { %2112 = vmatpush.msra.mxu1 %v2089_v7 }
 0x73b   : > { %3901 = vmatmul.msk.f32.gmra.mxu2 %vm1657_vm13, %v5227_v4 }
 0x73c   : > { %2113 = vmatpush.msra.mxu1 %v2088_v46 }
 0x7aa   : > { %v1881_v23 = vpop.f32.mrf.mxu1 }
 0x7b2   : > { %v1884_v53 = vpop.f32.mrf.mxu1 }
 0x7b6   : > { %v1910_v6 = vpop.f32.mrf.mxu2 }
 0x7b7   : > { %v1911_v34 = vadd.f32 %v1910_v6, %v1881_v23 }
 0x7b9   : > { %3904 = vmatmul.msk.f32.vlgmr.msra.gmra.mxu0 %vm860_vm11, %v1911_v34 }
 0x7be   : > { %v1913_v35 = vpop.f32.mrf.mxu2 }
 0x7bf   : > { %v1914_v57 = vadd.f32 %v1913_v35, %v1884_v53 }
 0x7c1   : > { %1930 = vmatpush.msra.mxu3 %v1914_v57  ;;  %3905 = vmatmul.msk.f32.gmra.mxu0 %vm860_vm11, %v1914_v57 }
 0x7c2   : > { %2020 = vmatpush.msrb.mxu2 %v1914_v57 }
 0x7c3   : > { %1931 = vmatpush.msra.mxu3 %v1911_v34 }
 0x7c4   : > { %2021 = vmatpush.msrb.mxu2 %v1911_v34  ;;  %3902 = vmatmul.msk.f32.vlgmr.msra.gmra.mxu3 %vm1464_vm12, %v4712_v15 }
 0x7c5   : > { %3908 = vmatmul.msk.f32.vlgmr.msrb.gmra.mxu2 %vm1464_vm12, %v4715_v16  ;;  %2052 = vmatpush.msrb.mxu3 %v2033_v12  ;;  %v2186_v12 = vld [vmem:[#allocation7 + $0x58] sm:$0xff] }
 0x7c6   : > { %2146 = vmatpush.msra.mxu2 %v2127_v60  ;;  %2205 = vmatpush.msra.mxu0 %v2186_v12  ;;  %v2185_v60 = vld [vmem:[#allocation7 + $0x50] sm:$0xff] }
 0x7c7   : > { %2053 = vmatpush.msrb.mxu3 %v2032_v62  ;;  %v2184_v62 = vld [vmem:[#allocation7 + $0x48] sm:$0xff] }
 0x7c8   : > { %2147 = vmatpush.msra.mxu2 %v2126_v45  ;;  %2206 = vmatpush.msra.mxu0 %v2185_v60  ;;  %v2183_v45 = vld [vmem:[#allocation7 + $0x40] sm:$0xff] }
 0x7c9   : > { %2054 = vmatpush.msrb.mxu3 %v2031_v49  ;;  %3912 = vmatmul.msk.f32.vlgmr.msrb.gmra.mxu0 %vm1464_vm12, %v4712_v15 }
 0x7ca   : > { %2148 = vmatpush.msra.mxu2 %v2125_v39  ;;  %2207 = vmatpush.msra.mxu0 %v2184_v62 }
 0x7cb   : > { %2055 = vmatpush.msrb.mxu3 %v2030_v56 }
 0x7cc   : > { %2149 = vmatpush.msra.mxu2 %v2124_v51  ;;  %3903 = vmatmul.msk.f32.gmra.mxu3 %vm1464_vm12, %v4729_v20 }
 0x7cd   : > { %2173 = vmatpush.msra.mxu3 %v5108_v22  ;;  %3909 = vmatmul.msk.f32.gmra.mxu2 %vm1464_vm12, %v4732_v21 }
 0x7ce   : > { %2267 = vmatpush.msrb.mxu2 %v5159_v14  ;;  %2208 = vmatpush.msra.mxu0 %v2183_v45 }
 0x7cf   : > { %2174 = vmatpush.msra.mxu3 %v5105_v32 }
 0x7d0   : > { %2268 = vmatpush.msrb.mxu2 %v5161_v37 }
 0x7d1   : > { %3913 = vmatmul.msk.f32.gmra.mxu0 %vm1464_vm12, %v4729_v20 }
 0x7d2   : > { %2269 = vmatpush.msrb.mxu2 %v5164_v38 }
 0x7d4   : > { %2270 = vmatpush.msrb.mxu2 %v5167_v59 }
 0x7d5   : > { %3916 = vmatmul.msk.f32.vlgmr.msra.gmra.mxu2 %vm860_vm11, %v5105_v32 }
 0x7d6   : > { %2426 = vmatpush.msra.mxu2 %v2401_v52 }
 0x7d8   : > { %2427 = vmatpush.msra.mxu2 %v2400_v0 }
 0x7da   : > { %2428 = vmatpush.msra.mxu2 %v2399_v1 }
 0x7dc   : > { %2429 = vmatpush.msra.mxu2 %v2398_v11 }
 0x7dd   : > { %3917 = vmatmul.msk.f32.gmra.mxu2 %vm860_vm11, %v5108_v22 }
 0x836   : > { %v1971_v32 = vpop.f32.mrf.mxu0 }
 0x83e   : > { %v1974_v22 = vpop.f32.mrf.mxu0 }
 0x846   : > { %v2082_v35 = vpop.f32.mrf.mxu0 }
 0x847   : > { %v1933_v23 = vpop.f32.mrf.mxu3 }
 0x848   : > { %v2023_v6 = vpop.f32.mrf.mxu2  ;;  %3906 = vmatmul.msk.f32.vlgmr.msrb.gmra.mxu1 %vm860_vm11, %v1933_v23 }
 0x849   : > { %3910 = vmatmul.msk.f32.vlgmr.msrb.gmra.mxu3 %vm860_vm11, %v2023_v6  ;;  %2244 = vmatpush.msrb.mxu1 %v5171_v54 }
 0x84b   : > { %2245 = vmatpush.msrb.mxu1 %v5174_v58 }
 0x84d   : > { %2246 = vmatpush.msrb.mxu1 %v5177_v61 }
 0x84e   : > { %v2085_v57 = vpop.f32.mrf.mxu0 }
 0x84f   : > { %2247 = vmatpush.msrb.mxu1 %v5180_v17  ;;  %v1936_v34 = vpop.f32.mrf.mxu3 }
 0x850   : > { %v2026_v53 = vpop.f32.mrf.mxu2  ;;  %3907 = vmatmul.msk.f32.gmra.mxu1 %vm860_vm11, %v1936_v34 }
 0x851   : > { %3911 = vmatmul.msk.f32.gmra.mxu3 %vm860_vm11, %v2026_v53 }
 0x858   : > { %3914 = vmatmul.msk.f32.vlgmr.msra.gmra.mxu1 %vm860_vm11, %v2082_v35  ;;  %v2151_v34 = vpop.f32.mrf.mxu2 }
 0x859   : > { %3918 = vmatmul.msk.f32.vlgmr.msra.gmra.mxu3 %vm1464_vm12, %v4715_v16 }
 0x860   : > { %3915 = vmatmul.msk.f32.gmra.mxu1 %vm860_vm11, %v2085_v57  ;;  %v4189_v57 = vld [vmem:[%s5702_s9] ss:$0 sm:$0xff]  ;;  %v2154_v0 = vpop.f32.mrf.mxu2 }
 0x861   : > { %3919 = vmatmul.msk.f32.gmra.mxu3 %vm1464_vm12, %v4732_v21 }
 0x8c5   : > { %v2000_v50 = vpop.f32.mrf.mxu1 }
 0x8c6   : > { %v2001_v46 = vadd.f32 %v2000_v50, %v1971_v32 }
 0x8cc   : > { %v2057_v49 = vpop.f32.mrf.mxu3 }
 0x8cd   : > { %v2003_v10 = vpop.f32.mrf.mxu1  ;;  %v2063_v23 = vadd.f32 %v2057_v49, %v2001_v46 }
 0x8ce   : > { %v2004_v53 = vadd.f32 %v2003_v10, %v1974_v22 }
 0x8d4   : > { %v2060_v39 = vpop.f32.mrf.mxu3 }
 0x8d5   : > { %v2115_v7 = vpop.f32.mrf.mxu1  ;;  %v2064_v62 = vadd.f32 %v2060_v39, %v2004_v53  ;;  %v5295_v53 = vsel %vm2278_vm3, 1.0, %v5754_v3 }
 0x8d6   : > { %v2121_v6 = vadd.f32 %v2115_v7, %v2063_v23 }
 0x8d8   : > { %v2157_v35 = vadd.f32 %v2151_v34, %v2121_v6 }
 0x8dc   : > { %v2176_v56 = vpop.f32.mrf.mxu3 }
 0x8dd   : > { %3920 = vmatmul.msk.f32.vlgmr.msra.gmra.mxu0 %vm860_vm11, %v2176_v56  ;;  %v2118_v12 = vpop.f32.mrf.mxu1 }
 0x8de   : > { %v2122_v56 = vadd.f32 %v2118_v12, %v2064_v62 }
 0x8e0   : > { %v2158_v32 = vadd.f32 %v2154_v0, %v2122_v56 }
 0x8e4   : > { %v2179_v51 = vpop.f32.mrf.mxu3 }
 0x8e5   : > { %3921 = vmatmul.msk.f32.gmra.mxu0 %vm860_vm11, %v2179_v51 }
 0x95a   : > { %v2210_v60 = vpop.f32.mrf.mxu0 }
 0x95b   : > { %v2216_v45 = vadd.f32 %v2210_v60, %v2157_v35  ;;  %v5306_v35 = vsel %vm2282_vm4, 1.0, %v5754_v3 }
 0x95d   : > { %v2222_v51 = vadd.f32 %v4189_v57, %v2216_v45 }
 0x95f   : > { %v2224_v52 = vmax.f32 %v2222_v51, 0.0 }
 0x961   : > { %3922 = vmatmul.msk.f32.vlgmr.msrb.gmra.mxu1 %vm860_vm11, %v2224_v52  ;;  %3924 = vmatmul.msk.f32.vlgmr.msrb.gmra.mxu2 %vm860_vm11, %v2224_v52 }
 0x962   : > { %2575 = vmatpush.msrb.mxu2 %v5058_v18  ;;  %v2213_v22 = vpop.f32.mrf.mxu0 }
 0x963   : > { %v2217_v49 = vadd.f32 %v2213_v22, %v2158_v32 }
 0x964   : > { %2576 = vmatpush.msrb.mxu2 %v5055_v13 }
 0x965   : > { %v2223_v50 = vadd.f32 %v4189_v57, %v2217_v49  ;;  %v5309_v57 = vsel %vm2279_vm5, 1.0, %v5754_v3 }
 0x966   : > { %2577 = vmatpush.msrb.mxu2 %v5061_v27 }
 0x967   : > { %v2225_v39 = vmax.f32 %v2223_v50, 0.0  ;;  %v2517_v50 = vld [vmem:[#allocation9 + $0x58] sm:$0xff] }
 0x968   : > { %2578 = vmatpush.msrb.mxu2 %v5065_v41 }
 0x969   : > { %3923 = vmatmul.msk.f32.gmra.mxu1 %vm860_vm11, %v2225_v39  ;;  %3925 = vmatmul.msk.f32.gmra.mxu2 %vm860_vm11, %v2225_v39  ;;  %v2645_v39 = vld [vmem:[#allocation10 + $0x38] sm:$0xff] }
 0x9de   : > { %v2249_v1 = vpop.f32.mrf.mxu1 }
 0x9df   : > { %v2250_v46 = vadd.f32 %v5199_v8, %v2249_v1  ;;  %v2516_v1 = vld [vmem:[#allocation9 + $0x50] sm:$0xff] }
 0x9e4   : > { %v2272_v11 = vpop.f32.mrf.mxu2 }
 0x9e5   : > { %v2273_v34 = vadd.f32 %v5199_v8, %v2272_v11  ;;  %v2644_v11 = vld [vmem:[#allocation10 + $0x30] sm:$0xff] }
 0x9e6   : > { %v2252_v10 = vpop.f32.mrf.mxu1 }
 0x9e7   : > { %v2253_v7 = vadd.f32 %v5199_v8, %v2252_v10  ;;  %v2515_v10 = vld [vmem:[#allocation9 + $0x48] sm:$0xff] }
 0x9e9   : > { %2349 = vmatpush.msrb.mxu0 %v2253_v7  ;;  %v2643_v7 = vld [vmem:[#allocation10 + $0x28] sm:$0xff] }
 0x9eb   : > { %2350 = vmatpush.msrb.mxu0 %v2250_v46  ;;  %v2514_v46 = vld [vmem:[#allocation9 + $0x40] sm:$0xff] }
 0x9ec   : > { %v2275_v23 = vpop.f32.mrf.mxu2  ;;  %3930 = vmatmul.msk.f32.vlgmr.msrb.gmra.mxu0 %vm1464_vm12, %v5215_v42 }
 0x9ed   : > { %v2276_v6 = vadd.f32 %v5199_v8, %v2275_v23  ;;  %v2642_v23 = vld [vmem:[#allocation10 + $0x20] sm:$0xff] }
 0x9ef   : > { %2310 = vmatpush.msrb.mxu3 %v2276_v6 }
 0x9f1   : > { %2311 = vmatpush.msrb.mxu3 %v2273_v34  ;;  %v2594_v34 = vld [vmem:[#allocation10 + $0x10] sm:$0xff] }
 0x9f2   : > { %3926 = vmatmul.msk.f32.vlgmr.msrb.gmra.mxu3 %vm1464_vm12, %v5205_v55 }
 0x9f4   : > { %3931 = vmatmul.msk.f32.gmra.mxu0 %vm1464_vm12, %v5227_v4 }
 0x9fa   : > { %3927 = vmatmul.msk.f32.gmra.mxu3 %vm1464_vm12, %v5218_v47 }
 0x9fc   : > { %3932 = vmatmul.msk.f32.gmra.mxu0 %vm1464_vm12, %v5295_v53 }
 0xa02   : > { %3928 = vmatmul.msk.f32.gmra.mxu3 %vm1464_vm12, %v5306_v35 }
 0xa04   : > { %3933 = vmatmul.msk.f32.gmra.mxu0 %vm1464_vm12, %v5309_v57 }
 0xa0a   : > { %3929 = vmatmul.msk.f32.gmra.mxu3 %vm1464_vm12, %v5318_v19 }
 0xa69   : > { %v2352_v12 = vpop.f32.mrf.mxu0 }
 0xa71   : > { %v2355_v45 = vpop.f32.mrf.mxu0 }
 0xa75   : > { %v2313_v60 = vpop.f32.mrf.mxu3 }
 0xa76   : > { %v2353_v62 = vadd.f32 %v2352_v12, %v2313_v60  ;;  %v2593_v12 = vld [vmem:[#allocation10 + $0x8] sm:$0xff] }
 0xa78   : > { %3938 = vmatmul.msk.f32.vlgmr.msra.gmra.mxu2 %vm860_vm11, %v2353_v62 }
 0xa79   : > { %v2358_v24 = vpop.f32.mrf.mxu0 }
 0xa7d   : > { %v2316_v56 = vpop.f32.mrf.mxu3 }
 0xa7e   : > { %v2356_v51 = vadd.f32 %v2355_v45, %v2316_v56 }
 0xa80   : > { %3939 = vmatmul.msk.f32.gmra.mxu2 %vm860_vm11, %v2356_v51 }
 0xa81   : > { %v2361_v32 = vpop.f32.mrf.mxu0 }
 0xa85   : > { %v2319_v52 = vpop.f32.mrf.mxu3 }
 0xa86   : > { %v2359_v0 = vadd.f32 %v2358_v24, %v2319_v52 }
 0xa88   : > { %3940 = vmatmul.msk.f32.gmra.mxu2 %vm860_vm11, %v2359_v0 }
 0xa8d   : > { %v2322_v22 = vpop.f32.mrf.mxu3 }
 0xa8e   : > { %v2362_v49 = vadd.f32 %v2361_v32, %v2322_v22  ;;  %v2724_v22 = vld [vmem:[#allocation10 + $0x58] sm:$0xff] }
 0xa8f   : > { %2749 = vmatpush.msra.mxu2 %v2724_v22 }
 0xa90   : > { %2376 = vmatpush.msra.mxu1 %v2362_v49  ;;  %3941 = vmatmul.msk.f32.gmra.mxu2 %vm860_vm11, %v2362_v49 }
 0xa91   : > { %2496 = vmatpush.msra.mxu0 %v2362_v49  ;;  %v2723_v49 = vld [vmem:[#allocation10 + $0x50] sm:$0xff] }
 0xa92   : > { %2377 = vmatpush.msra.mxu1 %v2359_v0  ;;  %2750 = vmatpush.msra.mxu2 %v2723_v49 }
 0xa93   : > { %2497 = vmatpush.msra.mxu0 %v2359_v0 }
 0xa94   : > { %2378 = vmatpush.msra.mxu1 %v2356_v51 }
 0xa95   : > { %2498 = vmatpush.msra.mxu0 %v2356_v51 }
 0xa96   : > { %2379 = vmatpush.msra.mxu1 %v2353_v62 }
 0xa97   : > { %2499 = vmatpush.msra.mxu0 %v2353_v62  ;;  %3934 = vmatmul.msk.f32.vlgmr.msra.gmra.mxu1 %vm860_vm11, %v4712_v15 }
 0xa98   : > { %3946 = vmatmul.msk.f32.vlgmr.msra.gmra.mxu0 %vm860_vm11, %v4715_v16  ;;  %2542 = vmatpush.msrb.mxu1 %v2517_v50  ;;  %v2722_v50 = vld [vmem:[#allocation10 + $0x48] sm:$0xff] }
 0xa99   : > { %2670 = vmatpush.msrb.mxu0 %v2645_v39  ;;  %3954 = vmatmul.msk.f32.vlgmr.msrb.gmra.mxu2 %vm860_vm11, %v4712_v15  ;;  %v2721_v39 = vld [vmem:[#allocation10 + $0x40] sm:$0xff] }
 0xa9a   : > { %2543 = vmatpush.msrb.mxu1 %v2516_v1  ;;  %2751 = vmatpush.msra.mxu2 %v2722_v50 }
 0xa9b   : > { %2671 = vmatpush.msrb.mxu0 %v2644_v11 }
 0xa9c   : > { %2544 = vmatpush.msrb.mxu1 %v2515_v10  ;;  %2752 = vmatpush.msra.mxu2 %v2721_v39 }
 0xa9d   : > { %2672 = vmatpush.msrb.mxu0 %v2643_v7 }
 0xa9e   : > { %2545 = vmatpush.msrb.mxu1 %v2514_v46 }
 0xa9f   : > { %2673 = vmatpush.msrb.mxu0 %v2642_v23  ;;  %3935 = vmatmul.msk.f32.gmra.mxu1 %vm860_vm11, %v4729_v20 }
 0xaa0   : > { %2703 = vmatpush.msra.mxu1 %v5058_v18  ;;  %3947 = vmatmul.msk.f32.gmra.mxu0 %vm860_vm11, %v4732_v21 }
 0xaa1   : > { %3955 = vmatmul.msk.f32.gmra.mxu2 %vm860_vm11, %v4729_v20  ;;  %2835 = vmatpush.msra.mxu0 %v5159_v14  ;;  %v2396_v14 = vld [vmem:[#allocation9 + $0x18] sm:$0xff] }
 0xaa2   : > { %2704 = vmatpush.msra.mxu1 %v5055_v13  ;;  %2467 = vmatpush.msra.mxu3 %v2396_v14 }
 0xaa3   : > { %2836 = vmatpush.msra.mxu0 %v5161_v37  ;;  %v2395_v37 = vld [vmem:[#allocation9 + $0x10] sm:$0xff] }
 0xaa4   : > { %2705 = vmatpush.msra.mxu1 %v5061_v27  ;;  %2468 = vmatpush.msra.mxu3 %v2395_v37 }
 0xaa5   : > { %2837 = vmatpush.msra.mxu0 %v5164_v38  ;;  %v2394_v38 = vld [vmem:[#allocation9 + $0x8] sm:$0xff] }
 0xaa6   : > { %2706 = vmatpush.msra.mxu1 %v5065_v41  ;;  %2469 = vmatpush.msra.mxu3 %v2394_v38 }
 0xaa7   : > { %3936 = vmatmul.msk.f32.gmra.mxu1 %vm860_vm11, %v4746_v25  ;;  %2838 = vmatpush.msra.mxu0 %v5167_v59  ;;  %v2393_v59 = vld [vmem:[#allocation9] sm:$0xff] }
 0xaa8   : > { %3948 = vmatmul.msk.f32.gmra.mxu0 %vm860_vm11, %v4749_v26  ;;  %2470 = vmatpush.msra.mxu3 %v2393_v59 }
 0xaa9   : > { %3956 = vmatmul.msk.f32.gmra.mxu2 %vm860_vm11, %v4746_v25 }
 0xaaf   : > { %3937 = vmatmul.msk.f32.gmra.mxu1 %vm860_vm11, %v4763_v30 }
 0xab0   : > { %3949 = vmatmul.msk.f32.gmra.mxu0 %vm860_vm11, %v4766_v31 }
 0xab1   : > { %3957 = vmatmul.msk.f32.gmra.mxu2 %vm860_vm11, %v4763_v30 }
 0xab8   : > { %3962 = vmatmul.msk.f32.vlgmr.msrb.gmra.mxu0 %vm860_vm11, %v5065_v41  ;;  %v2595_v41 = vld [vmem:[#allocation10 + $0x18] sm:$0xff] }
 0xab9   : > { %2620 = vmatpush.msrb.mxu3 %v2595_v41 }
 0xabb   : > { %2621 = vmatpush.msrb.mxu3 %v2594_v34  ;;  %v3039_v34 = vld [vmem:[#allocation12 + $0x38] sm:$0xff] }
 0xabc   : > { %3076 = vmatpush.msrb.mxu0 %v3039_v34 }
 0xabd   : > { %2622 = vmatpush.msrb.mxu3 %v2593_v12  ;;  %v3038_v12 = vld [vmem:[#allocation12 + $0x30] sm:$0xff] }
 0xabe   : > { %3077 = vmatpush.msrb.mxu0 %v3038_v12 }
 0xac0   : > { %3963 = vmatmul.msk.f32.gmra.mxu0 %vm860_vm11, %v5061_v27 }
 0xac8   : > { %3964 = vmatmul.msk.f32.gmra.mxu0 %vm860_vm11, %v5055_v13  ;;  %v2592_v13 = vld [vmem:[#allocation10] sm:$0xff] }
 0xac9   : > { %2623 = vmatpush.msrb.mxu3 %v2592_v13  ;;  %v3037_v13 = vld [vmem:[#allocation12 + $0x28] sm:$0xff] }
 0xaca   : > { %3078 = vmatpush.msrb.mxu0 %v3037_v13 }
 0xad0   : > { %3965 = vmatmul.msk.f32.gmra.mxu0 %vm860_vm11, %v5058_v18 }
 0xafb   : > { %v5366_v6 = vpop.f32.mrf.mxu2 }
 0xb03   : > { %v5368_v27 = vpop.f32.mrf.mxu2 }
 0xb0b   : > { %v5374_v62 = vpop.f32.mrf.mxu2 }
 0xb13   : > { %v5380_v51 = vpop.f32.mrf.mxu2 }
 0xb14   : > { %v2381_v18 = vpop.f32.mrf.mxu1 }
 0xb15   : > { %v2501_v60 = vpop.f32.mrf.mxu0  ;;  %3942 = vmatmul.msk.f32.vlgmr.msra.gmra.mxu3 %vm860_vm11, %v2381_v18  ;;  %v3036_v18 = vld [vmem:[#allocation12 + $0x20] sm:$0xff] }
 0xb16   : > { %3950 = vmatmul.msk.f32.vlgmr.msrb.gmra.mxu1 %vm860_vm11, %v2501_v60  ;;  %2806 = vmatpush.msra.mxu3 %v5171_v54 }
 0xb17   : > { %3079 = vmatpush.msrb.mxu0 %v3036_v18 }
 0xb18   : > { %2807 = vmatpush.msra.mxu3 %v5174_v58 }
 0xb1a   : > { %2808 = vmatpush.msra.mxu3 %v5177_v61 }
 0xb1c   : > { %v2384_v45 = vpop.f32.mrf.mxu1  ;;  %2809 = vmatpush.msra.mxu3 %v5180_v17  ;;  %v2580_v54 = vpop.f32.mrf.mxu2 }
 0xb1d   : > { %v2504_v56 = vpop.f32.mrf.mxu0  ;;  %3943 = vmatmul.msk.f32.gmra.mxu3 %vm860_vm11, %v2384_v45 }
 0xb1e   : > { %3951 = vmatmul.msk.f32.gmra.mxu1 %vm860_vm11, %v2504_v56 }
 0xb24   : > { %v2387_v24 = vpop.f32.mrf.mxu1  ;;  %v2583_v61 = vpop.f32.mrf.mxu2 }
 0xb25   : > { %v2507_v52 = vpop.f32.mrf.mxu0  ;;  %3944 = vmatmul.msk.f32.gmra.mxu3 %vm860_vm11, %v2387_v24 }
 0xb26   : > { %3952 = vmatmul.msk.f32.gmra.mxu1 %vm860_vm11, %v2507_v52 }
 0xb2c   : > { %v2390_v58 = vpop.f32.mrf.mxu1  ;;  %v2586_v17 = vpop.f32.mrf.mxu2 }
 0xb2d   : > { %v2510_v0 = vpop.f32.mrf.mxu0  ;;  %3945 = vmatmul.msk.f32.gmra.mxu3 %vm860_vm11, %v2390_v58 }
 0xb2e   : > { %3953 = vmatmul.msk.f32.gmra.mxu1 %vm860_vm11, %v2510_v0 }
 0xb34   : > { %v2589_v32 = vpop.f32.mrf.mxu2 }
 0xb35   : > { %3958 = vmatmul.msk.f32.vlgmr.msrb.gmra.mxu3 %vm860_vm11, %v2580_v54  ;;  %v2675_v24 = vpop.f32.mrf.mxu0 }
 0xb36   : > { %3966 = vmatmul.msk.f32.vlgmr.msra.gmra.mxu1 %vm860_vm11, %v4715_v16 }
 0xb3d   : > { %3959 = vmatmul.msk.f32.gmra.mxu3 %vm860_vm11, %v2583_v61  ;;  %v2678_v50 = vpop.f32.mrf.mxu0 }
 0xb3e   : > { %3967 = vmatmul.msk.f32.gmra.mxu1 %vm860_vm11, %v4732_v21 }
 0xb45   : > { %3960 = vmatmul.msk.f32.gmra.mxu3 %vm860_vm11, %v2586_v17  ;;  %v4190_v17 = vld [vmem:[%s5705_s12] ss:$0 sm:$0xff]  ;;  %v2681_v34 = vpop.f32.mrf.mxu0 }
 0xb46   : > { %3968 = vmatmul.msk.f32.gmra.mxu1 %vm860_vm11, %v4749_v26 }
 0xb4d   : > { %3961 = vmatmul.msk.f32.gmra.mxu3 %vm860_vm11, %v2589_v32 }
 0xb4e   : > { %3969 = vmatmul.msk.f32.gmra.mxu1 %vm860_vm11, %v4766_v31 }
 0xb93   : > { %v2547_v1 = vpop.f32.mrf.mxu1 }
 0xb98   : > { %v2472_v38 = vpop.f32.mrf.mxu3 }
 0xb99   : > { %v2473_v56 = vadd.f32 %v2472_v38, %v5366_v6 }
 0xb9b   : > { %v2550_v11 = vpop.f32.mrf.mxu1  ;;  %v2559_v52 = vadd.f32 %v2547_v1, %v2473_v56 }
 0xba0   : > { %v2475_v59 = vpop.f32.mrf.mxu3 }
 0xba1   : > { %v2476_v0 = vadd.f32 %v2475_v59, %v5368_v27 }
 0xba3   : > { %v2553_v10 = vpop.f32.mrf.mxu1  ;;  %v2560_v22 = vadd.f32 %v2550_v11, %v2476_v0 }
 0xba8   : > { %v2478_v41 = vpop.f32.mrf.mxu3 }
 0xbab   : > { %v2556_v7 = vpop.f32.mrf.mxu1 }
 0xbb0   : > { %v2481_v60 = vpop.f32.mrf.mxu3 }
 0xbb3   : > { %v2708_v46 = vpop.f32.mrf.mxu1 }
 0xbb4   : > { %3970 = vmatmul.msk.f32.vlgmr.msra.gmra.mxu2 %vm860_vm11, %v2708_v46 }
 0xbb8   : > { %v2625_v45 = vpop.f32.mrf.mxu3 }
 0xbb9   : > { %v2637_v54 = vadd.f32 %v2625_v45, %v2559_v52 }
 0xbbb   : > { %v2711_v23 = vpop.f32.mrf.mxu1  ;;  %v2687_v61 = vadd.f32 %v2675_v24, %v2637_v54 }
 0xbbc   : > { %3971 = vmatmul.msk.f32.gmra.mxu2 %vm860_vm11, %v2711_v23  ;;  %v2479_v23 = vadd.f32 %v2478_v41, %v5374_v62  ;;  %v2482_v62 = vadd.f32 %v2481_v60, %v5380_v51  ;;  %v2684_v60 = vpop.f32.mrf.mxu0 }
 0xbbe   : > { %v2562_v18 = vadd.f32 %v2556_v7, %v2482_v62 }
 0xbc0   : > { %v2628_v58 = vpop.f32.mrf.mxu3 }
 0xbc1   : > { %v2638_v39 = vadd.f32 %v2628_v58, %v2560_v22 }
 0xbc3   : > { %v2714_v14 = vpop.f32.mrf.mxu1  ;;  %v2688_v27 = vadd.f32 %v2678_v50, %v2638_v39 }
 0xbc4   : > { %3972 = vmatmul.msk.f32.gmra.mxu2 %vm860_vm11, %v2714_v14 }
 0xbc8   : > { %v2631_v14 = vpop.f32.mrf.mxu3 }
 0xbcb   : > { %v2717_v37 = vpop.f32.mrf.mxu1 }
 0xbcc   : > { %3973 = vmatmul.msk.f32.gmra.mxu2 %vm860_vm11, %v2717_v37  ;;  %v2561_v37 = vadd.f32 %v2553_v10, %v2479_v23 }
 0xbce   : > { %v2639_v11 = vadd.f32 %v2631_v14, %v2561_v37 }
 0xbd0   : > { %v2689_v12 = vadd.f32 %v2681_v34, %v2639_v11  ;;  %v2634_v13 = vpop.f32.mrf.mxu3 }
 0xbd1   : > { %v2640_v56 = vadd.f32 %v2634_v13, %v2562_v18 }
 0xbd3   : > { %v2690_v52 = vadd.f32 %v2684_v60, %v2640_v56 }
 0xc37   : > { %v2754_v32 = vpop.f32.mrf.mxu2 }
 0xc38   : > { %v2766_v49 = vadd.f32 %v2754_v32, %v2687_v61 }
 0xc3a   : > { %v2774_v46 = vadd.f32 %v4190_v17, %v2766_v49 }
 0xc3c   : > { %v2778_v6 = vmax.f32 %v2774_v46, 0.0 }
 0xc3e   : > { %3974 = vmatmul.msk.f32.vlgmr.msra.gmra.mxu3 %vm860_vm11, %v2778_v6  ;;  %3978 = vmatmul.msk.f32.vlgmr.msra.gmra.mxu0 %vm860_vm11, %v2778_v6 }
 0xc3f   : > { %3297 = vmatpush.msra.mxu0 %v4950_v43  ;;  %v2757_v1 = vpop.f32.mrf.mxu2 }
 0xc40   : > { %v2767_v38 = vadd.f32 %v2757_v1, %v2688_v27 }
 0xc41   : > { %3298 = vmatpush.msra.mxu0 %v4947_v48 }
 0xc42   : > { %v2775_v59 = vadd.f32 %v4190_v17, %v2767_v38 }
 0xc43   : > { %3299 = vmatpush.msra.mxu0 %v4953_v9 }
 0xc44   : > { %v2779_v41 = vmax.f32 %v2775_v59, 0.0 }
 0xc45   : > { %3300 = vmatpush.msra.mxu0 %v4957_v33 }
 0xc46   : > { %3975 = vmatmul.msk.f32.gmra.mxu3 %vm860_vm11, %v2779_v41  ;;  %3979 = vmatmul.msk.f32.gmra.mxu0 %vm860_vm11, %v2779_v41 }
 0xc47   : > { %3301 = vmatpush.msra.mxu0 %v4961_v44  ;;  %v2760_v10 = vpop.f32.mrf.mxu2 }
 0xc48   : > { %v2768_v45 = vadd.f32 %v2760_v10, %v2689_v12 }
 0xc49   : > { %3302 = vmatpush.msra.mxu0 %v4965_v40 }
 0xc4a   : > { %v2776_v24 = vadd.f32 %v4190_v17, %v2768_v45 }
 0xc4b   : > { %3303 = vmatpush.msra.mxu0 %v4971_v28 }
 0xc4c   : > { %v2780_v51 = vmax.f32 %v2776_v24, 0.0 }
 0xc4d   : > { %3304 = vmatpush.msra.mxu0 %v4975_v63 }
 0xc4e   : > { %3976 = vmatmul.msk.f32.gmra.mxu3 %vm860_vm11, %v2780_v51  ;;  %3980 = vmatmul.msk.f32.gmra.mxu0 %vm860_vm11, %v2780_v51 }
 0xc4f   : > { %v2763_v54 = vpop.f32.mrf.mxu2 }
 0xc50   : > { %v2769_v58 = vadd.f32 %v2763_v54, %v2690_v52 }
 0xc52   : > { %v2777_v0 = vadd.f32 %v4190_v17, %v2769_v58 }
 0xc54   : > { %v2781_v7 = vmax.f32 %v2777_v0, 0.0 }
 0xc56   : > { %3977 = vmatmul.msk.f32.gmra.mxu3 %vm860_vm11, %v2781_v7  ;;  %3981 = vmatmul.msk.f32.gmra.mxu0 %vm860_vm11, %v2781_v7 }
 0xcbb   : > { %v2840_v61 = vpop.f32.mrf.mxu0 }
 0xcbc   : > { %v2841_v27 = vadd.f32 %v5199_v8, %v2840_v61 }
 0xcc1   : > { %v2811_v32 = vpop.f32.mrf.mxu3 }
 0xcc2   : > { %v2812_v11 = vadd.f32 %v5199_v8, %v2811_v32 }
 0xcc3   : > { %v2843_v22 = vpop.f32.mrf.mxu0 }
 0xcc4   : > { %v2844_v14 = vadd.f32 %v5199_v8, %v2843_v22  ;;  %v3215_v22 = vld [vmem:[#allocation12 + $0x58] sm:$0xff] }
 0xcc9   : > { %v2814_v49 = vpop.f32.mrf.mxu3 }
 0xcca   : > { %v2815_v38 = vadd.f32 %v5199_v8, %v2814_v49  ;;  %v3214_v49 = vld [vmem:[#allocation12 + $0x50] sm:$0xff] }
 0xccb   : > { %v2846_v50 = vpop.f32.mrf.mxu0 }
 0xccc   : > { %v2847_v6 = vadd.f32 %v5199_v8, %v2846_v50  ;;  %v3213_v50 = vld [vmem:[#allocation12 + $0x48] sm:$0xff] }
 0xcd1   : > { %v2817_v39 = vpop.f32.mrf.mxu3 }
 0xcd2   : > { %v2818_v37 = vadd.f32 %v5199_v8, %v2817_v39  ;;  %v3212_v39 = vld [vmem:[#allocation12 + $0x40] sm:$0xff] }
 0xcd3   : > { %v2849_v46 = vpop.f32.mrf.mxu0 }
 0xcd4   : > { %v2850_v23 = vadd.f32 %v5199_v8, %v2849_v46  ;;  %v3409_v46 = vld [vmem:[#allocation13 + $0x28] sm:$0xff] }
 0xcd6   : > { %2900 = vmatpush.msrb.mxu1 %v2850_v23  ;;  %v3408_v23 = vld [vmem:[#allocation13 + $0x20] sm:$0xff] }
 0xcd8   : > { %2901 = vmatpush.msrb.mxu1 %v2847_v6  ;;  %v5758_v6 = vld [vmem:[#allocation21_spill] sm:$0xff] }
 0xcd9   : > { %v2820_v17 = vpop.f32.mrf.mxu3 }
 0xcda   : > { %v2821_v1 = vadd.f32 %v5199_v8, %v2820_v17  ;;  %2902 = vmatpush.msrb.mxu1 %v2844_v14  ;;  %v2864_v8 = vsel %vm2860_vm7, 1.0, %v5754_v3  ;;  %v5760_v14 = vld [vmem:[#allocation24_spill] sm:$0xff]  ;;  %v5761_v17 = vld [vmem:[#allocation26_spill] sm:$0xff] }
 0xcdc   : > { %2903 = vmatpush.msrb.mxu1 %v2841_v27  ;;  %2961 = vmatpush.msrb.mxu2 %v2821_v1  ;;  %v5762_v27 = vld [vmem:[#allocation27_spill] sm:$0xff]  ;;  %v5763_v1 = vld [vmem:[#allocation28_spill] sm:$0xff] }
 0xcdd   : > { %3982 = vmatmul.msk.f32.vlgmr.msrb.gmra.mxu1 %vm860_vm11, %v5205_v55  ;;  %v2856_v55 = vsel %vm2852_vm8, 1.0, %v5754_v3 }
 0xcde   : > { %2962 = vmatpush.msrb.mxu2 %v2818_v37  ;;  %v5764_v37 = vld [vmem:[#allocation29_spill] sm:$0xff] }
 0xce0   : > { %2963 = vmatpush.msrb.mxu2 %v2815_v38  ;;  %v3034_v38 = vld [vmem:[#allocation12 + $0x18] sm:$0xff] }
 0xce1   : > { %3141 = vmatpush.msra.mxu1 %v3034_v38 }
 0xce2   : > { %2964 = vmatpush.msrb.mxu2 %v2812_v11  ;;  %v3033_v11 = vld [vmem:[#allocation12 + $0x10] sm:$0xff] }
 0xce3   : > { %3990 = vmatmul.msk.f32.vlgmr.msrb.gmra.mxu2 %vm860_vm11, %v5215_v42  ;;  %v2865_v42 = vsel %vm2861_vm9, 1.0, %v5754_v3  ;;  %3142 = vmatpush.msra.mxu1 %v3033_v11 }
 0xce5   : > { %3983 = vmatmul.msk.f32.gmra.mxu1 %vm860_vm11, %v5218_v47  ;;  %v5755_v47 = vld [vmem:[#allocation22_spill] sm:$0xff] }
 0xce6   : > { %vm2862_vm12 = vcmp.eq.s32.totalorder %v5755_v47, %v5194_v5  ;;  %vm2854_vm13 = vcmp.eq.s32.totalorder %v5755_v47, %v5191_v2 }
 0xce7   : > { %v2858_v36 = vsel %vm2854_vm13, 1.0, %v5754_v3 }
 0xceb   : > { %3991 = vmatmul.msk.f32.gmra.mxu2 %vm860_vm11, %v5227_v4  ;;  %v2866_v4 = vsel %vm2862_vm12, 1.0, %v5754_v3 }
 0xced   : > { %3984 = vmatmul.msk.f32.gmra.mxu1 %vm860_vm11, %v5306_v35 }
 0xcf3   : > { %3992 = vmatmul.msk.f32.gmra.mxu2 %vm860_vm11, %v5295_v53  ;;  %v5756_v53 = vld [vmem:[#allocation25_spill] sm:$0xff] }
 0xcf4   : > { %vm2863_vm14 = vcmp.eq.s32.totalorder %v5756_v53, %v5194_v5  ;;  %vm2855_vm15 = vcmp.eq.s32.totalorder %v5756_v53, %v5191_v2 }
 0xcf5   : > { %3985 = vmatmul.msk.f32.gmra.mxu1 %vm860_vm11, %v5318_v19  ;;  %v2867_v35 = vsel %vm2863_vm14, 1.0, %v5754_v3 }
 0xcfb   : > { %3993 = vmatmul.msk.f32.gmra.mxu2 %vm860_vm11, %v5309_v57  ;;  %v2859_v57 = vsel %vm2855_vm15, 1.0, %v5754_v3 }
 0xcfd   : > { %3986 = vmatmul.msk.f32.gmra.mxu1 %vm860_vm11, %v2864_v8  ;;  %v3032_v8 = vld [vmem:[#allocation12 + $0x8] sm:$0xff] }
 0xcfe   : > { %3143 = vmatpush.msra.mxu1 %v3032_v8 }
 0xd03   : > { %3994 = vmatmul.msk.f32.gmra.mxu2 %vm860_vm11, %v2856_v55  ;;  %v3031_v55 = vld [vmem:[#allocation12] sm:$0xff] }
 0xd04   : > { %3144 = vmatpush.msra.mxu1 %v3031_v55 }
 0xd05   : > { %3987 = vmatmul.msk.f32.gmra.mxu1 %vm860_vm11, %v2865_v42 }
 0xd0b   : > { %3995 = vmatmul.msk.f32.gmra.mxu2 %vm860_vm11, %v2857_v29 }
 0xd0d   : > { %3988 = vmatmul.msk.f32.gmra.mxu1 %vm860_vm11, %v2866_v4 }
 0xd13   : > { %3996 = vmatmul.msk.f32.gmra.mxu2 %vm860_vm11, %v2858_v36 }
 0xd15   : > { %3989 = vmatmul.msk.f32.gmra.mxu1 %vm860_vm11, %v2867_v35  ;;  %v3333_v35 = vld [vmem:[#allocation13 + $0x18] sm:$0xff] }
 0xd16   : > { %3370 = vmatpush.msrb.mxu1 %v3333_v35 }
 0xd1b   : > { %3997 = vmatmul.msk.f32.gmra.mxu2 %vm860_vm11, %v2859_v57  ;;  %v3332_v57 = vld [vmem:[#allocation13 + $0x10] sm:$0xff] }
 0xd1c   : > { %3371 = vmatpush.msrb.mxu1 %v3332_v57 }
 0xd5a   : > { %v2905_v19 = vpop.f32.mrf.mxu1 }
 0xd62   : > { %v2908_v59 = vpop.f32.mrf.mxu1 }
 0xd66   : > { %v2966_v34 = vpop.f32.mrf.mxu2 }
 0xd67   : > { %v2967_v62 = vadd.f32 %v2966_v34, %v2905_v19  ;;  %v3331_v19 = vld [vmem:[#allocation13 + $0x8] sm:$0xff]  ;;  %v3330_v34 = vld [vmem:[#allocation13] sm:$0xff] }
 0xd68   : > { %3372 = vmatpush.msrb.mxu1 %v3331_v19  ;;  %v5644_v19 = vld [vmem:[%s5708_s15] ss:$0 sm:$0xff] }
 0xd69   : > { %4006 = vmatmul.msk.f32.vlgmr.msrb.gmra.mxu0 %vm860_vm11, %v2967_v62 }
 0xd6a   : > { %v2911_v5 = vpop.f32.mrf.mxu1  ;;  %3373 = vmatpush.msrb.mxu1 %v3330_v34 }
 0xd6e   : > { %v2969_v41 = vpop.f32.mrf.mxu2 }
 0xd6f   : > { %v2970_v12 = vadd.f32 %v2969_v41, %v2908_v59 }
 0xd71   : > { %4007 = vmatmul.msk.f32.gmra.mxu0 %vm860_vm11, %v2970_v12 }
 0xd72   : > { %v2914_v13 = vpop.f32.mrf.mxu1 }
 0xd76   : > { %v2972_v10 = vpop.f32.mrf.mxu2 }
 0xd77   : > { %v2973_v2 = vadd.f32 %v2972_v10, %v2911_v5 }
 0xd79   : > { %4008 = vmatmul.msk.f32.gmra.mxu0 %vm860_vm11, %v2973_v2 }
 0xd7a   : > { %v2917_v3 = vpop.f32.mrf.mxu1 }
 0xd7e   : > { %v2975_v18 = vpop.f32.mrf.mxu2 }
 0xd7f   : > { %v2976_v45 = vadd.f32 %v2975_v18, %v2914_v13 }
 0xd81   : > { %4009 = vmatmul.msk.f32.gmra.mxu0 %vm860_vm11, %v2976_v45 }
 0xd82   : > { %v2920_v51 = vpop.f32.mrf.mxu1 }
 0xd86   : > { %v2978_v56 = vpop.f32.mrf.mxu2 }
 0xd87   : > { %v2979_v24 = vadd.f32 %v2978_v56, %v2917_v3 }
 0xd89   : > { %4010 = vmatmul.msk.f32.gmra.mxu0 %vm860_vm11, %v2979_v24 }
 0xd8a   : > { %v2923_v54 = vpop.f32.mrf.mxu1 }
 0xd8e   : > { %v2981_v60 = vpop.f32.mrf.mxu2 }
 0xd8f   : > { %v2982_v52 = vadd.f32 %v2981_v60, %v2920_v51 }
 0xd91   : > { %4011 = vmatmul.msk.f32.gmra.mxu0 %vm860_vm11, %v2982_v52 }
 0xd92   : > { %v2926_v7 = vpop.f32.mrf.mxu1 }
 0xd96   : > { %v2984_v58 = vpop.f32.mrf.mxu2 }
 0xd97   : > { %v2985_v0 = vadd.f32 %v2984_v58, %v2923_v54  ;;  %v3530_v58 = vld [vmem:[#allocation13 + $0x58] sm:$0xff] }
 0xd98   : > { %3567 = vmatpush.msrb.mxu0 %v3530_v58 }
 0xd99   : > { %4012 = vmatmul.msk.f32.gmra.mxu0 %vm860_vm11, %v2985_v0 }
 0xd9e   : > { %v2987_v61 = vpop.f32.mrf.mxu2 }
 0xd9f   : > { %v2988_v32 = vadd.f32 %v2987_v61, %v2926_v7  ;;  %v3529_v7 = vld [vmem:[#allocation13 + $0x50] sm:$0xff]  ;;  %v3528_v61 = vld [vmem:[#allocation13 + $0x48] sm:$0xff] }
 0xda0   : > { %3568 = vmatpush.msrb.mxu0 %v3529_v7 }
 0xda1   : > { %2998 = vmatpush.msrb.mxu3 %v2988_v32  ;;  %4013 = vmatmul.msk.f32.gmra.mxu0 %vm860_vm11, %v2988_v32 }
 0xda2   : > { %3178 = vmatpush.msra.mxu2 %v2988_v32  ;;  %3569 = vmatpush.msrb.mxu0 %v3528_v61  ;;  %v3527_v32 = vld [vmem:[#allocation13 + $0x40] sm:$0xff] }
 0xda3   : > { %2999 = vmatpush.msrb.mxu3 %v2985_v0 }
 0xda4   : > { %3179 = vmatpush.msra.mxu2 %v2985_v0  ;;  %3570 = vmatpush.msrb.mxu0 %v3527_v32 }
 0xda5   : > { %3000 = vmatpush.msrb.mxu3 %v2982_v52 }
 0xda6   : > { %3180 = vmatpush.msra.mxu2 %v2982_v52 }
 0xda7   : > { %3001 = vmatpush.msrb.mxu3 %v2979_v24 }
 0xda8   : > { %3181 = vmatpush.msra.mxu2 %v2979_v24 }
 0xda9   : > { %3002 = vmatpush.msrb.mxu3 %v2976_v45  ;;  %4038 = vmatmul.msk.f32.vlgmr.msra.gmra.mxu0 %vm696_vm2, %v4712_v15 }
 0xdaa   : > { %3182 = vmatpush.msra.mxu2 %v2976_v45 }
 0xdab   : > { %3003 = vmatpush.msrb.mxu3 %v2973_v2 }
 0xdac   : > { %3183 = vmatpush.msra.mxu2 %v2973_v2 }
 0xdad   : > { %3004 = vmatpush.msrb.mxu3 %v2970_v12 }
 0xdae   : > { %3184 = vmatpush.msra.mxu2 %v2970_v12 }
 0xdaf   : > { %3005 = vmatpush.msrb.mxu3 %v2967_v62 }
 0xdb0   : > { %3185 = vmatpush.msra.mxu2 %v2967_v62  ;;  %3998 = vmatmul.msk.f32.vlgmr.msrb.gmra.mxu3 %vm696_vm2, %v4712_v15  ;;  %v3411_v15 = vld [vmem:[#allocation13 + $0x38] sm:$0xff] }
 0xdb1   : > { %4022 = vmatmul.msk.f32.vlgmr.msra.gmra.mxu2 %vm696_vm2, %v4715_v16  ;;  %3252 = vmatpush.msra.mxu3 %v3215_v22 }
 0xdb2   : > { %4039 = vmatmul.msk.f32.gmra.mxu0 %vm696_vm2, %v4729_v20  ;;  %3448 = vmatpush.msrb.mxu2 %v3411_v15 }
 0xdb3   : > { %3253 = vmatpush.msra.mxu3 %v3214_v49 }
 0xdb5   : > { %3254 = vmatpush.msra.mxu3 %v3213_v50 }
 0xdb7   : > { %3255 = vmatpush.msra.mxu3 %v3212_v39 }
 0xdb8   : > { %3999 = vmatmul.msk.f32.gmra.mxu3 %vm696_vm2, %v4729_v20  ;;  %v3410_v20 = vld [vmem:[#allocation13 + $0x30] sm:$0xff] }
 0xdb9   : > { %3493 = vmatpush.msrb.mxu3 %v4950_v43  ;;  %4023 = vmatmul.msk.f32.gmra.mxu2 %vm696_vm2, %v4732_v21 }
 0xdba   : > { %4040 = vmatmul.msk.f32.gmra.mxu0 %vm696_vm2, %v4746_v25  ;;  %3449 = vmatpush.msrb.mxu2 %v3410_v20 }
 0xdbb   : > { %3494 = vmatpush.msrb.mxu3 %v4947_v48 }
 0xdbc   : > { %3450 = vmatpush.msrb.mxu2 %v3409_v46 }
 0xdbd   : > { %3495 = vmatpush.msrb.mxu3 %v4953_v9 }
 0xdbe   : > { %3451 = vmatpush.msrb.mxu2 %v3408_v23 }
 0xdbf   : > { %3496 = vmatpush.msrb.mxu3 %v4957_v33 }
 0xdc0   : > { %4000 = vmatmul.msk.f32.gmra.mxu3 %vm696_vm2, %v4746_v25  ;;  %v5757_v25 = vld [vmem:[#allocation20_spill] sm:$0xff] }
 0xdc1   : > { %3497 = vmatpush.msrb.mxu3 %v4961_v44  ;;  %4024 = vmatmul.msk.f32.gmra.mxu2 %vm696_vm2, %v4749_v26 }
 0xdc2   : > { %4041 = vmatmul.msk.f32.gmra.mxu0 %vm696_vm2, %v4763_v30 }
 0xdc3   : > { %3498 = vmatpush.msrb.mxu3 %v4965_v40 }
 0xdc5   : > { %3499 = vmatpush.msrb.mxu3 %v4971_v28 }
 0xdc7   : > { %3500 = vmatpush.msrb.mxu3 %v4975_v63 }
 0xdc8   : > { %4001 = vmatmul.msk.f32.gmra.mxu3 %vm696_vm2, %v4763_v30  ;;  %v5759_v30 = vld [vmem:[#allocation23_spill] sm:$0xff] }
 0xdc9   : > { %4025 = vmatmul.msk.f32.gmra.mxu2 %vm696_vm2, %v4766_v31 }
 0xdca   : > { %4042 = vmatmul.msk.f32.gmra.mxu0 %vm696_vm2, %v5757_v25 }
 0xdd0   : > { %4002 = vmatmul.msk.f32.gmra.mxu3 %vm696_vm2, %v5757_v25 }
 0xdd1   : > { %4026 = vmatmul.msk.f32.gmra.mxu2 %vm696_vm2, %v5758_v6 }
 0xdd2   : > { %4043 = vmatmul.msk.f32.gmra.mxu0 %vm696_vm2, %v5759_v30 }
 0xdd8   : > { %4003 = vmatmul.msk.f32.gmra.mxu3 %vm696_vm2, %v5759_v30 }
 0xdd9   : > { %4027 = vmatmul.msk.f32.gmra.mxu2 %vm696_vm2, %v5760_v14 }
 0xdda   : > { %4044 = vmatmul.msk.f32.gmra.mxu0 %vm696_vm2, %v5761_v17 }
 0xde0   : > { %4004 = vmatmul.msk.f32.gmra.mxu3 %vm696_vm2, %v5761_v17 }
 0xde1   : > { %4028 = vmatmul.msk.f32.gmra.mxu2 %vm696_vm2, %v5762_v27 }
 0xde2   : > { %4045 = vmatmul.msk.f32.gmra.mxu0 %vm696_vm2, %v5763_v1 }
 0xde8   : > { %4005 = vmatmul.msk.f32.gmra.mxu3 %vm696_vm2, %v5763_v1 }
 0xde9   : > { %4029 = vmatmul.msk.f32.gmra.mxu2 %vm696_vm2, %v5764_v37 }
 0xdf1   : > { %4054 = vmatmul.msk.f32.vlgmr.msrb.gmra.mxu2 %vm860_vm11, %v4975_v63  ;;  %v5555_v63 = vpop.f32.mrf.mxu0 }
 0xdf9   : > { %4055 = vmatmul.msk.f32.gmra.mxu2 %vm860_vm11, %v4971_v28 }
 0xe01   : > { %4056 = vmatmul.msk.f32.gmra.mxu2 %vm860_vm11, %v4965_v40  ;;  %v5559_v40 = vpop.f32.mrf.mxu0 }
 0xe09   : > { %4057 = vmatmul.msk.f32.gmra.mxu2 %vm860_vm11, %v4961_v44  ;;  %v5563_v44 = vpop.f32.mrf.mxu0 }
 0xe11   : > { %4058 = vmatmul.msk.f32.gmra.mxu2 %vm860_vm11, %v4957_v33  ;;  %v5567_v28 = vpop.f32.mrf.mxu0 }
 0xe19   : > { %4059 = vmatmul.msk.f32.gmra.mxu2 %vm860_vm11, %v4953_v9  ;;  %v5571_v29 = vpop.f32.mrf.mxu0 }
 0xe21   : > { %4060 = vmatmul.msk.f32.gmra.mxu2 %vm860_vm11, %v4947_v48 }
 0xe29   : > { %4061 = vmatmul.msk.f32.gmra.mxu2 %vm860_vm11, %v4950_v43  ;;  %v5577_v43 = vpop.f32.mrf.mxu0 }
 0xe31   : > { %v5581_v59 = vpop.f32.mrf.mxu0 }
 0xe33   : > { %v3007_v33 = vpop.f32.mrf.mxu3 }
 0xe34   : > { %v3187_v42 = vpop.f32.mrf.mxu2  ;;  %4014 = vmatmul.msk.f32.vlgmr.msra.gmra.mxu1 %vm860_vm11, %v3007_v33 }
 0xe35   : > { %4030 = vmatmul.msk.f32.vlgmr.msra.gmra.mxu3 %vm860_vm11, %v3187_v42 }
 0xe39   : > { %v5585_v41 = vpop.f32.mrf.mxu0 }
 0xe3b   : > { %v3010_v47 = vpop.f32.mrf.mxu3 }
 0xe3c   : > { %v3190_v9 = vpop.f32.mrf.mxu2  ;;  %4015 = vmatmul.msk.f32.gmra.mxu1 %vm860_vm11, %v3010_v47 }
 0xe3d   : > { %4031 = vmatmul.msk.f32.gmra.mxu3 %vm860_vm11, %v3190_v9 }
 0xe41   : > { %v3306_v10 = vpop.f32.mrf.mxu0 }
 0xe43   : > { %v3013_v48 = vpop.f32.mrf.mxu3 }
 0xe44   : > { %v3193_v4 = vpop.f32.mrf.mxu2  ;;  %4016 = vmatmul.msk.f32.gmra.mxu1 %vm860_vm11, %v3013_v48 }
 0xe45   : > { %4032 = vmatmul.msk.f32.gmra.mxu3 %vm860_vm11, %v3193_v4 }
 0xe49   : > { %v3309_v56 = vpop.f32.mrf.mxu0 }
 0xe4b   : > { %v3016_v53 = vpop.f32.mrf.mxu3 }
 0xe4c   : > { %v3196_v36 = vpop.f32.mrf.mxu2  ;;  %4017 = vmatmul.msk.f32.gmra.mxu1 %vm860_vm11, %v3016_v53 }
 0xe4d   : > { %4033 = vmatmul.msk.f32.gmra.mxu3 %vm860_vm11, %v3196_v36 }
 0xe51   : > { %v3312_v24 = vpop.f32.mrf.mxu0 }
 0xe53   : > { %v3019_v62 = vpop.f32.mrf.mxu3 }
 0xe54   : > { %v3199_v5 = vpop.f32.mrf.mxu2  ;;  %4018 = vmatmul.msk.f32.gmra.mxu1 %vm860_vm11, %v3019_v62 }
 0xe55   : > { %4034 = vmatmul.msk.f32.gmra.mxu3 %vm860_vm11, %v3199_v5 }
 0xe59   : > { %v3315_v51 = vpop.f32.mrf.mxu0 }
 0xe5b   : > { %v3022_v12 = vpop.f32.mrf.mxu3 }
 0xe5c   : > { %v3202_v13 = vpop.f32.mrf.mxu2  ;;  %4019 = vmatmul.msk.f32.gmra.mxu1 %vm860_vm11, %v3022_v12 }
 0xe5d   : > { %4035 = vmatmul.msk.f32.gmra.mxu3 %vm860_vm11, %v3202_v13 }
 0xe61   : > { %v3318_v60 = vpop.f32.mrf.mxu0 }
 0xe63   : > { %v3025_v2 = vpop.f32.mrf.mxu3 }
 0xe64   : > { %v3205_v18 = vpop.f32.mrf.mxu2  ;;  %4020 = vmatmul.msk.f32.gmra.mxu1 %vm860_vm11, %v3025_v2 }
 0xe65   : > { %4036 = vmatmul.msk.f32.gmra.mxu3 %vm860_vm11, %v3205_v18 }
 0xe6b   : > { %v3028_v3 = vpop.f32.mrf.mxu3 }
 0xe6c   : > { %v3208_v45 = vpop.f32.mrf.mxu2  ;;  %4021 = vmatmul.msk.f32.gmra.mxu1 %vm860_vm11, %v3028_v3 }
 0xe6d   : > { %4037 = vmatmul.msk.f32.gmra.mxu3 %vm860_vm11, %v3208_v45 }
 0xe74   : > { %4046 = vmatmul.msk.f32.vlgmr.msrb.gmra.mxu1 %vm860_vm11, %v3306_v10  ;;  %v3453_v42 = vpop.f32.mrf.mxu2 }
 0xe75   : > { %4062 = vmatmul.msk.f32.vlgmr.msrb.gmra.mxu3 %vm696_vm2, %v4715_v16  ;;  %v3321_v16 = vpop.f32.mrf.mxu0 }
 0xe7c   : > { %4047 = vmatmul.msk.f32.gmra.mxu1 %vm860_vm11, %v3309_v56  ;;  %v3456_v4 = vpop.f32.mrf.mxu2 }
 0xe7d   : > { %4063 = vmatmul.msk.f32.gmra.mxu3 %vm696_vm2, %v4732_v21  ;;  %v3324_v21 = vpop.f32.mrf.mxu0 }
 0xe84   : > { %4048 = vmatmul.msk.f32.gmra.mxu1 %vm860_vm11, %v3312_v24 }
 0xe85   : > { %4064 = vmatmul.msk.f32.gmra.mxu3 %vm696_vm2, %v4749_v26  ;;  %v3327_v26 = vpop.f32.mrf.mxu0 }
 0xe8c   : > { %4049 = vmatmul.msk.f32.gmra.mxu1 %vm860_vm11, %v3315_v51 }
 0xe8d   : > { %4065 = vmatmul.msk.f32.gmra.mxu3 %vm696_vm2, %v4766_v31 }
 0xe94   : > { %4050 = vmatmul.msk.f32.gmra.mxu1 %vm860_vm11, %v3318_v60 }
 0xe95   : > { %4066 = vmatmul.msk.f32.gmra.mxu3 %vm696_vm2, %v5758_v6 }
 0xe9c   : > { %4051 = vmatmul.msk.f32.gmra.mxu1 %vm860_vm11, %v3321_v16 }
 0xe9d   : > { %4067 = vmatmul.msk.f32.gmra.mxu3 %vm696_vm2, %v5760_v14 }
 0xea4   : > { %4052 = vmatmul.msk.f32.gmra.mxu1 %vm860_vm11, %v3324_v21 }
 0xea5   : > { %4068 = vmatmul.msk.f32.gmra.mxu3 %vm696_vm2, %v5762_v27 }
 0xeac   : > { %4053 = vmatmul.msk.f32.gmra.mxu1 %vm860_vm11, %v3327_v26 }
 0xead   : > { %4069 = vmatmul.msk.f32.gmra.mxu3 %vm696_vm2, %v5764_v37 }
 0xeb1   : > { %v3146_v46 = vpop.f32.mrf.mxu1 }
 0xeb2   : > { %v3147_v9 = vadd.f32 %v3146_v46, %v5555_v63  ;;  %v3459_v63 = vpop.f32.mrf.mxu2 }
 0xeb8   : > { %v3257_v31 = vpop.f32.mrf.mxu3 }
 0xeb9   : > { %v3149_v30 = vpop.f32.mrf.mxu1  ;;  %v3281_v48 = vadd.f32 %v3257_v31, %v3147_v9 }
 0xeba   : > { %v3150_v35 = vadd.f32 %v3149_v30, %v5559_v40  ;;  %v3462_v16 = vpop.f32.mrf.mxu2 }
 0xec0   : > { %v3260_v52 = vpop.f32.mrf.mxu3 }
 0xec1   : > { %v3152_v17 = vpop.f32.mrf.mxu1  ;;  %v3282_v62 = vadd.f32 %v3260_v52, %v3150_v35 }
 0xec2   : > { %v3153_v10 = vadd.f32 %v3152_v17, %v5563_v44 }
 0xec8   : > { %v3263_v54 = vpop.f32.mrf.mxu3 }
 0xec9   : > { %v3155_v1 = vpop.f32.mrf.mxu1  ;;  %v3283_v45 = vadd.f32 %v3263_v54, %v3153_v10 }
 0xeca   : > { %v3156_v21 = vadd.f32 %v3155_v1, %v5567_v28 }
 0xed0   : > { %v5617_v0 = vpop.f32.mrf.mxu3 }
 0xed1   : > { %v3158_v38 = vpop.f32.mrf.mxu1  ;;  %v3284_v44 = vadd.f32 %v5617_v0, %v3156_v21 }
 0xed2   : > { %v3159_v32 = vadd.f32 %v3158_v38, %v5571_v29 }
 0xed8   : > { %v5619_v22 = vpop.f32.mrf.mxu3 }
 0xed9   : > { %v3161_v11 = vpop.f32.mrf.mxu1 }
 0xee0   : > { %v5621_v49 = vpop.f32.mrf.mxu3 }
 0xee1   : > { %v5635_v8 = vpop.f32.mrf.mxu1 }
 0xee8   : > { %v5623_v50 = vpop.f32.mrf.mxu3 }
 0xee9   : > { %v5637_v55 = vpop.f32.mrf.mxu1 }
 0xeea   : > { %v3168_v35 = vadd.f32 %v5637_v55, %v5585_v41 }
 0xef0   : > { %v5625_v39 = vpop.f32.mrf.mxu3 }
 0xef1   : > { %v3375_v33 = vpop.f32.mrf.mxu1 }
 0xef2   : > { %v3399_v53 = vadd.f32 %v3375_v33, %v3281_v48 }
 0xef4   : > { %v3477_v57 = vadd.f32 %v3453_v42, %v3399_v53 }
 0xef8   : > { %v3502_v15 = vpop.f32.mrf.mxu3 }
 0xef9   : > { %4070 = vmatmul.msk.f32.vlgmr.msrb.gmra.mxu0 %vm860_vm11, %v3502_v15  ;;  %v3378_v47 = vpop.f32.mrf.mxu1 }
 0xefa   : > { %v3400_v12 = vadd.f32 %v3378_v47, %v3282_v62  ;;  %v3165_v47 = vadd.f32 %v5635_v8, %v5581_v59 }
 0xefc   : > { %v3478_v2 = vadd.f32 %v3456_v4, %v3400_v12  ;;  %v3287_v9 = vadd.f32 %v5623_v50, %v3165_v47 }
 0xf00   : > { %v3505_v20 = vpop.f32.mrf.mxu3 }
 0xf01   : > { %4071 = vmatmul.msk.f32.gmra.mxu0 %vm860_vm11, %v3505_v20  ;;  %v3381_v36 = vpop.f32.mrf.mxu1  ;;  %v3465_v20 = vpop.f32.mrf.mxu2 }
 0xf02   : > { %v3401_v24 = vadd.f32 %v3381_v36, %v3283_v45 }
 0xf04   : > { %v3479_v26 = vadd.f32 %v3459_v63, %v3401_v24 }
 0xf08   : > { %v3508_v25 = vpop.f32.mrf.mxu3 }
 0xf09   : > { %4072 = vmatmul.msk.f32.gmra.mxu0 %vm860_vm11, %v3508_v25  ;;  %v3384_v18 = vpop.f32.mrf.mxu1  ;;  %v3285_v25 = vadd.f32 %v5619_v22, %v3159_v32 }
 0xf0a   : > { %v3402_v7 = vadd.f32 %v3384_v18, %v3284_v44 }
 0xf0c   : > { %v3480_v15 = vadd.f32 %v3462_v16, %v3402_v7 }
 0xf10   : > { %v3511_v23 = vpop.f32.mrf.mxu3 }
 0xf11   : > { %4073 = vmatmul.msk.f32.gmra.mxu0 %vm860_vm11, %v3511_v23  ;;  %v3387_v58 = vpop.f32.mrf.mxu1 }
 0xf12   : > { %v3403_v23 = vadd.f32 %v3387_v58, %v3285_v25 }
 0xf14   : > { %v3481_v17 = vadd.f32 %v3465_v20, %v3403_v23 }
 0xf18   : > { %v3514_v6 = vpop.f32.mrf.mxu3 }
 0xf19   : > { %4074 = vmatmul.msk.f32.gmra.mxu0 %vm860_vm11, %v3514_v6  ;;  %v3390_v6 = vpop.f32.mrf.mxu1 }
 0xf20   : > { %v3517_v14 = vpop.f32.mrf.mxu3 }
 0xf21   : > { %4075 = vmatmul.msk.f32.gmra.mxu0 %vm860_vm11, %v3517_v14  ;;  %v3162_v14 = vadd.f32 %v3161_v11, %v5577_v43  ;;  %v3393_v42 = vpop.f32.mrf.mxu1 }
 0xf28   : > { %v3520_v27 = vpop.f32.mrf.mxu3 }
 0xf29   : > { %4076 = vmatmul.msk.f32.gmra.mxu0 %vm860_vm11, %v3520_v27  ;;  %v3286_v27 = vadd.f32 %v5621_v49, %v3162_v14  ;;  %v3405_v49 = vadd.f32 %v3393_v42, %v3287_v9  ;;  %v3396_v8 = vpop.f32.mrf.mxu1 }
 0xf2b   : > { %v3404_v38 = vadd.f32 %v3390_v6, %v3286_v27 }
 0xf30   : > { %v3523_v37 = vpop.f32.mrf.mxu3 }
 0xf31   : > { %4077 = vmatmul.msk.f32.gmra.mxu0 %vm860_vm11, %v3523_v37  ;;  %v3468_v37 = vpop.f32.mrf.mxu2 }
 0xf32   : > { %v3482_v43 = vadd.f32 %v3468_v37, %v3404_v38 }
 0xf39   : > { %v3471_v53 = vpop.f32.mrf.mxu2 }
 0xf3a   : > { %v3483_v59 = vadd.f32 %v3471_v53, %v3405_v49 }
 0xf76   : > { %v3572_v34 = vpop.f32.mrf.mxu0 }
 0xf77   : > { %v3596_v5 = vadd.f32 %v3572_v34, %v3477_v57  ;;  %v3288_v34 = vadd.f32 %v5625_v39, %v3168_v35 }
 0xf79   : > { %v3608_v13 = vadd.f32 %v5644_v19, %v3596_v5  ;;  %v3406_v50 = vadd.f32 %v3396_v8, %v3288_v34 }
 0xf7b   : > { %v3616_v40 = vmax.f32 %v3608_v13, 0.0  ;;  %v3474_v13 = vpop.f32.mrf.mxu2 }
 0xf7c   : > { %v3484_v63 = vadd.f32 %v3474_v13, %v3406_v50 }
 0xf7d   : > { %3624 = vst.msk [vmem:[%s5652_s26] sm:$0xff] %vm860_vm11, %v3616_v40 }
 0xf7e   : > { %v3575_v3 = vpop.f32.mrf.mxu0 }
 0xf7f   : > { %v3597_v56 = vadd.f32 %v3575_v3, %v3478_v2 }
 0xf81   : > { %v3609_v51 = vadd.f32 %v5644_v19, %v3597_v56 }
 0xf83   : > { %v3617_v60 = vmax.f32 %v3609_v51, 0.0 }
 0xf85   : > { %3625 = vst.msk [vmem:[%s5652_s26 + $0x8] sm:$0xff] %vm860_vm11, %v3617_v60 }
 0xf86   : > { %v3578_v31 = vpop.f32.mrf.mxu0 }
 0xf87   : > { %v3598_v52 = vadd.f32 %v3578_v31, %v3479_v26 }
 0xf89   : > { %v3610_v54 = vadd.f32 %v5644_v19, %v3598_v52 }
 0xf8b   : > { %v3618_v61 = vmax.f32 %v3610_v54, 0.0 }
 0xf8d   : > { %3626 = vst.msk [vmem:[%s5652_s26 + $0x10] sm:$0xff] %vm860_vm11, %v3618_v61 }
 0xf8e   : > { %v3581_v28 = vpop.f32.mrf.mxu0 }
 0xf8f   : > { %v3599_v46 = vadd.f32 %v3581_v28, %v3480_v15 }
 0xf91   : > { %v3611_v0 = vadd.f32 %v5644_v19, %v3599_v46 }
 0xf93   : > { %v3619_v30 = vmax.f32 %v3611_v0, 0.0 }
 0xf95   : > { %3627 = vst.msk [vmem:[%s5652_s26 + $0x18] sm:$0xff] %vm860_vm11, %v3619_v30 }
 0xf96   : > { %v3584_v29 = vpop.f32.mrf.mxu0 }
 0xf97   : > { %v3600_v1 = vadd.f32 %v3584_v29, %v3481_v17 }
 0xf99   : > { %v3612_v22 = vadd.f32 %v5644_v19, %v3600_v1 }
 0xf9b   : > { %v3620_v33 = vmax.f32 %v3612_v22, 0.0 }
 0xf9d   : > { %3628 = vst.msk [vmem:[%s5652_s26 + $0x20] sm:$0xff] %vm860_vm11, %v3620_v33 }
 0xf9e   : > { %v3587_v11 = vpop.f32.mrf.mxu0 }
 0xf9f   : > { %v3601_v48 = vadd.f32 %v3587_v11, %v3482_v43 }
 0xfa1   : > { %v3613_v4 = vadd.f32 %v5644_v19, %v3601_v48 }
 0xfa3   : > { %v3621_v36 = vmax.f32 %v3613_v4, 0.0 }
 0xfa5   : > { %3629 = vst.msk [vmem:[%s5652_s26 + $0x28] sm:$0xff] %vm860_vm11, %v3621_v36 }
 0xfa6   : > { %v3590_v57 = vpop.f32.mrf.mxu0 }
 0xfa7   : > { %v3602_v62 = vadd.f32 %v3590_v57, %v3483_v59 }
 0xfa9   : > { %v3614_v5 = vadd.f32 %v5644_v19, %v3602_v62 }
 0xfab   : > { %v3622_v12 = vmax.f32 %v3614_v5, 0.0 }
 0xfad   : > { %3630 = vst.msk [vmem:[%s5652_s26 + $0x30] sm:$0xff] %vm860_vm11, %v3622_v12 }
 0xfae   : > { %v3593_v40 = vpop.f32.mrf.mxu0 }
 0xfaf   : > { %v3603_v10 = vadd.f32 %v3593_v40, %v3484_v63 }
 0xfb1   : > { %v3615_v41 = vadd.f32 %v5644_v19, %v3603_v10 }
 0xfb3   : > { %v3623_v55 = vmax.f32 %v3615_v41, 0.0 }
 0xfb5   : > { %3631 = vst.msk [vmem:[%s5652_s26 + $0x38] sm:$0xff] %vm860_vm11, %v3623_v55 }
 0xfb6 PF: > { %s31_s21 = sadd.s32 1, %s4458_s21  }
 0xfb7   : > { %p28_p7 = scmp.ge.s32.totalorder %s31_s21, 4  }
 0xfb9   :  { %30 = sbr.rel (!%p28_p7) target bundleno = 11 (0xb), region = 164 }
 0xfbe   :  { %3653 = vsyncpa [#allocation3], 1 }
 0xfbf   :  { %3655 = vsyncpa [#allocation3 + $0x1], 1 }
 0xfc0   :  { %3656 = vsyncpa [#allocation5], 1 }
 0xfc1   :  { %3657 = vsyncpa [#allocation8], 1 }
 0xfc2   :  { %3658 = vsyncpa [#allocation11], 1 }
 0xfc3   :  { %3659 = vsyncpa [#allocation14], 1 }

</bundles_post_ra>
